<compile_context>
chip_gen: v7x
topology: tpu7x:2x2x1
jax: 0.10.0
libtpu: 0.0.40
codegen_flags: <defaults>
</compile_context>

<pallas_src>
import functools

import jax
import jax.numpy as jnp
from jax import lax
from jax.experimental import pallas as pl
from jax.experimental.pallas import tpu as pltpu

F32 = jnp.float32
PI = 3.141592653589793

# ----------------------------- graph / config sizes ---------------------------------
N_CELL, N_TRACK, N_PRE, N_TOPO = 64, 16, 16, 8
N_NODE = N_TOPO + N_TRACK
N_EVENT = 8                                     # events batched along the grid

CONFIG = {
    "cell inputsize": 8,
    "track inputsize": 6,
    "cell hidden size": 32,
    "track hidden size": 32,
    "node init layers": [32, 32],
    "track init layers": [32, 32],
    "node net layers": [64, 64],
    "n GN blocks": 2,
    "n iterations": [2, 1],
}
TRANSFORM_VAR = {
    "cell_eta": {"mean": 0.0, "std": 1.5},
    "cell_e": {"mean": 0.5, "std": 1.0},
}


def _round8(n):
    return ((n + 7) // 8) * 8


# --------------------------- packed-slab layout constants ----------------------------
DIN_CELL = CONFIG["cell inputsize"]
DIN_TRACK = CONFIG["track inputsize"]
DIN_CELL_PAD = _round8(DIN_CELL)                # 8
DIN_TRACK_PAD = _round8(DIN_TRACK)              # 8
DH = CONFIG["cell hidden size"]                 # 32
G0, G1 = CONFIG["node net layers"]              # 64, 64
N_SCALARS = 26

# cell slab (N_CELL, 32): [features | eta phi layer energy | pad | A_track2cell]
CCOL_ETA = DIN_CELL_PAD
CCOL_PHI = CCOL_ETA + 1
CCOL_LAY = CCOL_ETA + 2
CCOL_E = CCOL_ETA + 3
CCOL_ADJ_TC = _round8(CCOL_E + 1)               # 16
CELL_SLAB_W = CCOL_ADJ_TC + N_TRACK             # 32

# track slab (N_TRACK, 16): [features(pad) | eta0 phi0 eta4 phi4 pt isTrack e_trk ptgt]
TCOL_ETA0 = DIN_TRACK_PAD
TCOL_PHI0 = TCOL_ETA0 + 1
TCOL_ETA4 = TCOL_ETA0 + 2
TCOL_PHI4 = TCOL_ETA0 + 3
TCOL_PT = TCOL_ETA0 + 4
TCOL_ISTRK = TCOL_ETA0 + 5
TCOL_ETRK = TCOL_ETA0 + 6
TCOL_PTGT = TCOL_ETA0 + 7
TRACK_SLAB_W = DIN_TRACK_PAD + 8                # 16

# adjacency slab (24, 128):
#   rows 0:N_PRE        cols 0:64 A_cell2pre | 64:80 A_track2pre | 80:96 A_prepre
#   rows N_PRE:N_PRE+8  cols 0:64 A_cell2topo | 64:80 A_pre2topo | 80 topo parent target
#                       cols 96:112 rows N_PRE:N_PRE+5 = track rows [eta0 phi0 eta4 phi4 pt]
ADJ_ROWS = N_PRE + N_TOPO                       # 24
ACOL_SRC2 = N_CELL                              # 64
ACOL_MISC = N_CELL + N_TRACK                    # 80
ACOL_TRKROWS = 96
ADJ_SLAB_W = 128

# output slabs
CELL_OUT_W = 64                                 # [0:DH] hidden | [DH:DH+4] track vals
NCOL_SC = DH                                    # node scalars at 32:58
NCOL_PT = DH + N_SCALARS                        # 58: parent target
NODE_ROW_PRE = N_NODE                           # 24: pre hidden rows
NODE_ROW_GREP = NODE_ROW_PRE + N_PRE            # 40: global rep row
NODE_ROW_GLOB = NODE_ROW_GREP + 1               # 41: packed globals row
NODE_OUT_ROWS = _round8(NODE_ROW_GLOB + 1)      # 48
NODE_OUT_W = 64
GCOL_E, GCOL_TRK, GCOL_TOPO = 0, 6, 8           # globals row: eglob(6) | tglob(2) | topoglob(13)


# --------------------------- parameter slab layouts ----------------------------------
def _weight_layout(cfg):
    dh = cfg["cell hidden size"]
    fc = cfg["node init layers"]
    ft = cfg["track init layers"]
    g = cfg["node net layers"]
    entries = [
        ("cw1", _round8(cfg["cell inputsize"]), fc[0]),
        ("cw2", _round8(fc[0]), fc[1]),
        ("cw3", _round8(fc[1]), dh),
        ("tw1", _round8(cfg["track inputsize"]), ft[0]),
        ("tw2", _round8(ft[0]), ft[1]),
        ("tw3", _round8(ft[1]), dh),
    ]
    for i in range(cfg["n GN blocks"]):
        entries += [(f"g{i}w1", _round8(3 * dh), g[0]),
                    (f"g{i}w2", _round8(g[0]), g[1]),
                    (f"g{i}w3", _round8(g[1]), dh)]
    lay, off = {}, 0
    for name, rows, cols in entries:
        lay[name] = (off, rows, cols)
        off += rows
    return lay, _round8(off), max(c for _, _, c in entries)


def _bias_layout(cfg):
    dh = cfg["cell hidden size"]
    fc = cfg["node init layers"]
    ft = cfg["track init layers"]
    g = cfg["node net layers"]
    entries = [("cb1", fc[0]), ("csc", fc[0]), ("csh", fc[0]), ("cb2", fc[1]), ("cb3", dh),
               ("tb1", ft[0]), ("tsc", ft[0]), ("tsh", ft[0]), ("tb2", ft[1]), ("tb3", dh)]
    for i in range(cfg["n GN blocks"]):
        entries += [(f"g{i}b1", g[0]), (f"g{i}b2", g[1]), (f"g{i}b3", dh)]
    lay = {n: (i, c) for i, (n, c) in enumerate(entries)}
    return lay, _round8(len(entries)), max(c for _, c in entries)


# --------------------------------- fused kernel --------------------------------------
def _mpnn_fused_kernel(cell_ref, track_ref, adj_ref, w_ref, b_ref, o_cell, o_node, *,
                       wlay, brow, n_blocks, n_iters,
                       eta_std, eta_mean, e_std, e_mean, th_r2, th_r42):
    n_cell = cell_ref.shape[0]
    n_track = track_ref.shape[0]
    n_pre, n_topo = N_PRE, N_TOPO
    n_node = n_topo + n_track
    dh = DH

    # deterministic pad regions in the packed output slabs
    o_cell[...] = jnp.zeros_like(o_cell)
    o_node[...] = jnp.zeros_like(o_node)

    cell = cell_ref[...]
    track = track_ref[...]
    adj = adj_ref[...]

    # ---- unpack per-event slabs (static slices) -------------------------------------
    cell_feat = cell[:, 0:DIN_CELL_PAD]
    eta_n = cell[:, CCOL_ETA:CCOL_ETA + 1]
    phi_c = cell[:, CCOL_PHI:CCOL_PHI + 1]
    lay_c = cell[:, CCOL_LAY:CCOL_LAY + 1]
    e_norm = cell[:, CCOL_E:CCOL_E + 1]
    adj_tc = cell[:, CCOL_ADJ_TC:CCOL_ADJ_TC + n_track]                  # (Nc, Nt)

    track_feat = track[:, 0:DIN_TRACK_PAD]                               # zero padded
    eta_t0c = track[:, TCOL_ETA0:TCOL_ETA0 + 1]
    phi_t0c = track[:, TCOL_PHI0:TCOL_PHI0 + 1]
    etrk_c = track[:, TCOL_ETRK:TCOL_ETRK + 1]
    tpt_c = track[:, TCOL_PTGT:TCOL_PTGT + 1]

    a_c2p = adj[0:n_pre, 0:n_cell]
    a_t2p = adj[0:n_pre, ACOL_SRC2:ACOL_SRC2 + n_track]
    a_pp = adj[0:n_pre, ACOL_MISC:ACOL_MISC + n_pre]
    a_c2topo = adj[n_pre:n_pre + n_topo, 0:n_cell]
    a_p2t = adj[n_pre:n_pre + n_topo, ACOL_SRC2:ACOL_SRC2 + n_pre]
    topo_pt = adj[n_pre:n_pre + n_topo, ACOL_MISC:ACOL_MISC + 1]
    eta_t0 = adj[n_pre + 0:n_pre + 1, ACOL_TRKROWS:ACOL_TRKROWS + n_track]   # (1, Nt)
    phi_t0 = adj[n_pre + 1:n_pre + 2, ACOL_TRKROWS:ACOL_TRKROWS + n_track]
    eta_t4 = adj[n_pre + 2:n_pre + 3, ACOL_TRKROWS:ACOL_TRKROWS + n_track]
    phi_t4 = adj[n_pre + 3:n_pre + 4, ACOL_TRKROWS:ACOL_TRKROWS + n_track]
    pt_t = adj[n_pre + 4:n_pre + 5, ACOL_TRKROWS:ACOL_TRKROWS + n_track]

    # ---- resident weight / bias slab accessors (static, sublane-aligned slices) -----
    def W(name):
        off, rows, cols = wlay[name]
        return w_ref[off:off + rows, 0:cols]

    def Bias(name):
        r, cols = brow[name]
        return b_ref[r:r + 1, 0:cols]

    # ---- init MLPs: Linear -> ReLU -> BN(affine) -> Linear -> ReLU -> Linear --------
    def init_mlp(x, p):
        h = jnp.maximum(jnp.dot(x, W(p + "w1"), preferred_element_type=F32)
                        + Bias(p + "b1"), 0.0)
        h = h * Bias(p + "sc") + Bias(p + "sh")
        h = jnp.maximum(jnp.dot(h, W(p + "w2"), preferred_element_type=F32)
                        + Bias(p + "b2"), 0.0)
        return jnp.dot(h, W(p + "w3"), preferred_element_type=F32) + Bias(p + "b3")

    h_cells = init_mlp(cell_feat, "c")
    h_tracks = init_mlp(track_feat, "t")
    o_cell[:, 0:dh] = h_cells

    # ---- cells -> global: per-layer energy sums via a single layer one-hot ----------
    lay_onehot = (lay_c == lax.broadcasted_iota(jnp.int32, (n_cell, 6), 1)
                  .astype(F32)).astype(F32)                              # (Nc, 6)
    o_node[NODE_ROW_GLOB:NODE_ROW_GLOB + 1, GCOL_E:GCOL_E + 6] = jnp.sum(
        e_norm * lay_onehot, axis=0, keepdims=True)

    # ---- cells/tracks -> pre_nodes, initial global rep -------------------------------
    h_pre = (jnp.dot(a_c2p, h_cells, preferred_element_type=F32)
             + jnp.dot(a_t2p, h_tracks, preferred_element_type=F32))
    grep = jnp.sum(h_pre, axis=0, keepdims=True)                         # (1, dh)

    # ---- GN blocks (NodeNetwork on pre_node_to_pre_node), statically unrolled -------
    for b_i in range(n_blocks):
        off1 = wlay[f"g{b_i}w1"][0]
        w1a = w_ref[off1:off1 + dh, 0:G0]                 # rows for msg_sum
        w1h = w_ref[off1 + dh:off1 + 2 * dh, 0:G0]        # rows for hidden rep
        w1g = w_ref[off1 + 2 * dh:off1 + 3 * dh, 0:G0]    # rows for global rep
        w2 = W(f"g{b_i}w2")
        w3 = W(f"g{b_i}w3")
        b1 = Bias(f"g{b_i}b1")
        b2 = Bias(f"g{b_i}b2")
        b3 = Bias(f"g{b_i}b3")
        for _ in range(n_iters[b_i]):
            agg = jnp.dot(a_pp, h_pre, preferred_element_type=F32)
            z = (jnp.dot(agg, w1a, preferred_element_type=F32)
                 + jnp.dot(h_pre, w1h, preferred_element_type=F32)
                 + jnp.dot(grep, w1g, preferred_element_type=F32)
                 + b1)
            z = jnp.maximum(z, 0.0)
            z = jnp.maximum(jnp.dot(z, w2, preferred_element_type=F32) + b2, 0.0)
            out = jnp.dot(z, w3, preferred_element_type=F32) + b3
            # output / ||output||  (rsqrt on EUP; +1e-12 guards an exactly-zero row)
            inv = lax.rsqrt(jnp.sum(out * out, axis=1, keepdims=True) + 1e-12)
            h_pre = out * inv
            grep = jnp.sum(h_pre, axis=0, keepdims=True)
    o_node[NODE_ROW_PRE:NODE_ROW_PRE + n_pre, 0:dh] = h_pre
    o_node[NODE_ROW_GREP:NODE_ROW_GREP + 1, 0:dh] = grep

    # ---- pre -> topo (sum); topos/tracks stacked onto the 'nodes' ntype --------------
    h_topo = jnp.dot(a_p2t, h_pre, preferred_element_type=F32)
    o_node[0:n_topo, 0:dh] = h_topo
    o_node[n_topo:n_node, 0:dh] = h_tracks
    o_node[0:n_topo, NCOL_PT:NCOL_PT + 1] = topo_pt
    o_node[n_topo:n_node, NCOL_PT:NCOL_PT + 1] = tpt_c

    # ---- track_to_cell dR matching (squared-distance compare, no sqrt) --------------
    eta_c = eta_n * eta_std + eta_mean

    def delta_r2(phi0, eta0, phi1, eta1):
        deta = eta0 - eta1
        dphi = phi0 - phi1
        dphi = jnp.where(dphi > PI, dphi - 2.0 * PI, dphi)
        dphi = jnp.where(dphi < -PI, dphi + 2.0 * PI, dphi)
        return deta * deta + dphi * dphi

    layer_012 = lay_onehot[:, 0:1] + lay_onehot[:, 1:2] + lay_onehot[:, 2:3]
    layer_345 = lay_onehot[:, 3:4] + lay_onehot[:, 4:5] + lay_onehot[:, 5:6]
    lab = (delta_r2(phi_c, eta_c, phi_t0, eta_t0) < th_r2).astype(F32) * layer_012
    lab4 = (delta_r2(phi_c, eta_c, phi_t4, eta_t4) < th_r42).astype(F32) * layer_345
    ntr = jnp.sum(adj_tc * lab, axis=1, keepdims=True)
    spt = jnp.sum(adj_tc * (lab * pt_t), axis=1, keepdims=True)
    ntr4 = jnp.sum(adj_tc * lab4, axis=1, keepdims=True)
    spt4 = jnp.sum(adj_tc * (lab4 * pt_t), axis=1, keepdims=True)
    o_cell[:, dh + 0:dh + 1] = ntr
    o_cell[:, dh + 1:dh + 2] = spt
    o_cell[:, dh + 2:dh + 3] = ntr4
    o_cell[:, dh + 3:dh + 4] = spt4

    # ---- cell_to_topo aggregation (topo_vals_edge + topo_vals_nodes) ----------------
    energy = jnp.exp(e_norm * e_std + e_mean)
    we = eta_c * energy
    wp = phi_c * energy
    wl = lay_c * energy
    base8 = jnp.concatenate([we, wp, wl, energy, ntr, spt, ntr4, spt4], axis=1)
    s_base = jnp.dot(a_c2topo, base8, preferred_element_type=F32)        # (Ntopo, 8)
    s_we = jnp.dot(a_c2topo, we * lay_onehot, preferred_element_type=F32)
    s_wp = jnp.dot(a_c2topo, wp * lay_onehot, preferred_element_type=F32)
    s_e = jnp.dot(a_c2topo, energy * lay_onehot, preferred_element_type=F32)
    esum = s_base[:, 3:4]
    inv_e = 1.0 / esum        # exact: feeds integer-bin layer comparisons below

    # node scalars, topo rows (columns match move_from_topostracks_to_nodes ordering):
    # [eta, phi, layer, phi_l1..3, eta_l1..3, phi_l4..6, eta_l4..6, ene_l1..6,
    #  energy, nTracks, tracks_pt, nTracks_4, tracks_pt_4]
    sc0 = NCOL_SC
    o_node[0:n_topo, sc0 + 0:sc0 + 3] = s_base[:, 0:3] * inv_e
    o_node[0:n_topo, sc0 + 3:sc0 + 6] = s_wp[:, 0:3] * inv_e
    o_node[0:n_topo, sc0 + 6:sc0 + 9] = s_we[:, 0:3] * inv_e
    o_node[0:n_topo, sc0 + 9:sc0 + 12] = s_wp[:, 3:6] * inv_e
    o_node[0:n_topo, sc0 + 12:sc0 + 15] = s_we[:, 3:6] * inv_e
    o_node[0:n_topo, sc0 + 15:sc0 + 18] = s_e[:, 0:3] * inv_e
    # ene_l4..6 reuse layers 0..2 exactly as in the reference (bug preserved)
    o_node[0:n_topo, sc0 + 18:sc0 + 21] = s_e[:, 0:3] * inv_e
    o_node[0:n_topo, sc0 + 21:sc0 + 22] = esum
    o_node[0:n_topo, sc0 + 22:sc0 + 26] = s_base[:, 4:8]
    # node scalars, track rows: eta0, phi0, then energy_track in all remaining columns
    o_node[n_topo:n_node, sc0 + 0:sc0 + 1] = eta_t0c
    o_node[n_topo:n_node, sc0 + 1:sc0 + 2] = phi_t0c
    o_node[n_topo:n_node, sc0 + 2:sc0 + 26] = jnp.broadcast_to(etrk_c, (n_track, 24))

    # ---- tracks -> global: [sum(track_pt), sum(isTrack)] ----------------------------
    o_node[NODE_ROW_GLOB:NODE_ROW_GLOB + 1, GCOL_TRK:GCOL_TRK + 2] = jnp.sum(
        track[:, TCOL_PT:TCOL_PT + 2], axis=0, keepdims=True)

    # ---- topos -> global: 13 masked sums (track nodes contribute 0 via 1-isTrack) ---
    lay_node = s_base[:, 2:3] * inv_e
    t_ntr = s_base[:, 4:5]
    has_tr = (t_ntr > 0.0).astype(F32)
    no_tr = (t_ntr == 0.0).astype(F32)
    bins = [(lay_node < 1.0).astype(F32),
            ((lay_node > 1.0) & (lay_node < 2.0)).astype(F32),
            ((lay_node > 2.0) & (lay_node < 3.0)).astype(F32),
            ((lay_node > 3.0) & (lay_node < 4.0)).astype(F32),
            ((lay_node > 4.0) & (lay_node < 5.0)).astype(F32),
            (lay_node > 5.0).astype(F32)]
    cols = [jnp.ones((n_topo, 1), F32)]
    for b in bins:
        cols.append(has_tr * b)
        cols.append(no_tr * b)
    o_node[NODE_ROW_GLOB:NODE_ROW_GLOB + 1, GCOL_TOPO:GCOL_TOPO + 13] = jnp.sum(
        jnp.concatenate(cols, axis=1), axis=0, keepdims=True)


# ----------------------------------- forward -------------------------------------------
def mpnn_forward(cell_slab, track_slab, adj_slab, w_slab, b_slab, *, cfg, tv):
    B = cell_slab.shape[0]
    dh = cfg["cell hidden size"]
    wlay, _, _ = _weight_layout(cfg)
    brow, _, _ = _bias_layout(cfg)

    kernel = functools.partial(
        _mpnn_fused_kernel,
        wlay=wlay, brow=brow,
        n_blocks=cfg["n GN blocks"], n_iters=tuple(cfg["n iterations"]),
        eta_std=tv["cell_eta"]["std"], eta_mean=tv["cell_eta"]["mean"],
        e_std=tv["cell_e"]["std"], e_mean=tv["cell_e"]["mean"],
        th_r2=0.035 ** 2, th_r42=0.15 ** 2)

    out_shapes = (
        jax.ShapeDtypeStruct((B, N_CELL, CELL_OUT_W), F32),
        jax.ShapeDtypeStruct((B, NODE_OUT_ROWS, NODE_OUT_W), F32),
    )
    in_specs = [
        pl.BlockSpec((pl.Squeezed(), N_CELL, CELL_SLAB_W), lambda b: (b, 0, 0)),
        pl.BlockSpec((pl.Squeezed(), N_TRACK, TRACK_SLAB_W), lambda b: (b, 0, 0)),
        pl.BlockSpec((pl.Squeezed(), ADJ_ROWS, ADJ_SLAB_W), lambda b: (b, 0, 0)),
        # weights / biases: constant index_map -> DMA'd once, resident across the grid
        pl.BlockSpec(w_slab.shape, lambda b: (0, 0)),
        pl.BlockSpec(b_slab.shape, lambda b: (0, 0)),
    ]
    out_specs = (
        pl.BlockSpec((pl.Squeezed(), N_CELL, CELL_OUT_W), lambda b: (b, 0, 0)),
        pl.BlockSpec((pl.Squeezed(), NODE_OUT_ROWS, NODE_OUT_W), lambda b: (b, 0, 0)),
    )

    in_bytes = (cell_slab.size + track_slab.size + adj_slab.size
                + w_slab.size + b_slab.size) * 4
    out_bytes = B * (N_CELL * CELL_OUT_W + NODE_OUT_ROWS * NODE_OUT_W) * 4
    cost = pl.CostEstimate(flops=2_000_000 * B, transcendentals=256 * B,
                           bytes_accessed=int(in_bytes + out_bytes))

    cell_out, node_out = pl.pallas_call(
        kernel,
        out_shape=out_shapes,
        grid=(B,),
        in_specs=in_specs,
        out_specs=out_specs,
        compiler_params=pltpu.CompilerParams(dimension_semantics=("parallel",)),
        cost_estimate=cost,
    )(cell_slab, track_slab, adj_slab, w_slab, b_slab)

    # slice the packed output slabs apart (pure layout plumbing, outside the kernel)
    grep = node_out[:, NODE_ROW_GREP:NODE_ROW_GREP + 1, 0:dh]
    return dict(
        cell_hidden=cell_out[:, :, 0:dh],
        cell_track_vals=cell_out[:, :, dh:dh + 4],
        track_hidden=node_out[:, N_TOPO:N_NODE, 0:dh],
        topo_hidden=node_out[:, 0:N_TOPO, 0:dh],
        node_hidden=node_out[:, 0:N_NODE, 0:dh],
        node_scalars=node_out[:, 0:N_NODE, NCOL_SC:NCOL_SC + N_SCALARS],
        node_parent_target=node_out[:, 0:N_NODE, NCOL_PT:NCOL_PT + 1],
        pre_hidden=node_out[:, NODE_ROW_PRE:NODE_ROW_PRE + N_PRE, 0:dh],
        pre_global_rep=jnp.broadcast_to(grep, (B, N_PRE, dh)),
        energy_globals=node_out[:, NODE_ROW_GLOB, GCOL_E:GCOL_E + 6],
        track_globals=node_out[:, NODE_ROW_GLOB, GCOL_TRK:GCOL_TRK + 2],
        topo_globals=node_out[:, NODE_ROW_GLOB, GCOL_TOPO:GCOL_TOPO + 13],
    )


# -------------------------------- parameter init / packing ----------------------------
def _linear(key, din, dout):
    kw, kb = jax.random.split(key)
    bound = din ** -0.5
    w = jax.random.uniform(kw, (din, dout), F32, -bound, bound)
    b = jax.random.uniform(kb, (1, dout), F32, -bound, bound)
    return w, b


def init_mlp_params(key, din, features, dout):
    # TODO(synk): BatchNorm1d in inference mode (running stats folded into affine).
    assert len(features) == 2
    ks = jax.random.split(key, 6)
    w1, b1 = _linear(ks[0], din, features[0])
    w2, b2 = _linear(ks[1], features[0], features[1])
    w3, b3 = _linear(ks[2], features[1], dout)
    gamma = 1.0 + 0.05 * jax.random.normal(ks[3], (1, features[0]), F32)
    beta = 0.05 * jax.random.normal(ks[4], (1, features[0]), F32)
    rmean = 0.05 * jax.random.normal(ks[5], (1, features[0]), F32)
    rvar = jnp.ones((1, features[0]), F32)
    scale = gamma / jnp.sqrt(rvar + 1e-5)
    shift = beta - rmean * scale
    return dict(w1=w1, b1=b1, scale=scale, shift=shift, w2=w2, b2=b2, w3=w3, b3=b3)


def node_net_params(key, hidden, features):
    ks = jax.random.split(key, 3)
    w1, b1 = _linear(ks[0], 3 * hidden, features[0])   # rows: [msg_sum | hidden | global]
    w2, b2 = _linear(ks[1], features[0], features[1])
    w3, b3 = _linear(ks[2], features[1], hidden)
    return dict(w1=w1, b1=b1, w2=w2, b2=b2, w3=w3, b3=b3)


def pack_params(params, cfg):
    """Pack the 28 parameter tensors into two VMEM-resident slabs."""
    wlay, wrows, wwidth = _weight_layout(cfg)
    brow, brows, bwidth = _bias_layout(cfg)
    w_slab = jnp.zeros((wrows, wwidth), F32)
    b_slab = jnp.zeros((brows, bwidth), F32)

    def pw(slab, name, w):
        off = wlay[name][0]
        return slab.at[off:off + w.shape[0], 0:w.shape[1]].set(w.astype(F32))

    def pb(slab, name, b):
        r = brow[name][0]
        b = jnp.reshape(b, (1, -1)).astype(F32)
        return slab.at[r:r + 1, 0:b.shape[1]].set(b)

    ci, ti = params["cell_init"], params["track_init"]
    for pfx, p in (("c", ci), ("t", ti)):
        w_slab = pw(w_slab, pfx + "w1", p["w1"])
        w_slab = pw(w_slab, pfx + "w2", p["w2"])
        w_slab = pw(w_slab, pfx + "w3", p["w3"])
        b_slab = pb(b_slab, pfx + "b1", p["b1"])
        b_slab = pb(b_slab, pfx + "sc", p["scale"])
        b_slab = pb(b_slab, pfx + "sh", p["shift"])
        b_slab = pb(b_slab, pfx + "b2", p["b2"])
        b_slab = pb(b_slab, pfx + "b3", p["b3"])
    for i, bp in enumerate(params["node_nets"]):
        w_slab = pw(w_slab, f"g{i}w1", bp["w1"])
        w_slab = pw(w_slab, f"g{i}w2", bp["w2"])
        w_slab = pw(w_slab, f"g{i}w3", bp["w3"])
        b_slab = pb(b_slab, f"g{i}b1", bp["b1"])
        b_slab = pb(b_slab, f"g{i}b2", bp["b2"])
        b_slab = pb(b_slab, f"g{i}b3", bp["b3"])
    return w_slab, b_slab


def pack_graph_slabs(g):
    """Pack per-event graph data (leading batch dim B) into three input slabs."""
    B = g["cell_feat"].shape[0]
    cell_slab = jnp.zeros((B, N_CELL, CELL_SLAB_W), F32)
    cell_slab = cell_slab.at[:, :, 0:DIN_CELL].set(g["cell_feat"])
    cell_slab = cell_slab.at[:, :, CCOL_ETA:CCOL_ETA + 4].set(g["cell_scalars"])
    cell_slab = cell_slab.at[:, :, CCOL_ADJ_TC:CCOL_ADJ_TC + N_TRACK].set(g["A_track2cell"])

    track_slab = jnp.zeros((B, N_TRACK, TRACK_SLAB_W), F32)
    track_slab = track_slab.at[:, :, 0:DIN_TRACK].set(g["track_feat"])
    track_slab = track_slab.at[:, :, TCOL_ETA0:TCOL_ETA0 + 8].set(g["track_scalars"])

    adj_slab = jnp.zeros((B, ADJ_ROWS, ADJ_SLAB_W), F32)
    adj_slab = adj_slab.at[:, 0:N_PRE, 0:N_CELL].set(g["A_cell2pre"])
    adj_slab = adj_slab.at[:, 0:N_PRE, ACOL_SRC2:ACOL_SRC2 + N_TRACK].set(g["A_track2pre"])
    adj_slab = adj_slab.at[:, 0:N_PRE, ACOL_MISC:ACOL_MISC + N_PRE].set(g["A_prepre"])
    adj_slab = adj_slab.at[:, N_PRE:N_PRE + N_TOPO, 0:N_CELL].set(g["A_cell2topo"])
    adj_slab = adj_slab.at[:, N_PRE:N_PRE + N_TOPO, ACOL_SRC2:ACOL_SRC2 + N_PRE].set(
        g["A_pre2topo"])
    adj_slab = adj_slab.at[:, N_PRE:N_PRE + N_TOPO, ACOL_MISC:ACOL_MISC + 1].set(
        g["topo_parent_target"])
    track_rows = jnp.swapaxes(g["track_scalars"][:, :, 0:5], 1, 2)       # (B, 5, Nt)
    adj_slab = adj_slab.at[:, N_PRE:N_PRE + 5, ACOL_TRKROWS:ACOL_TRKROWS + N_TRACK].set(
        track_rows)
    return cell_slab, track_slab, adj_slab


# ------------------------------------- main ---------------------------------------------
def _assign_adj(n_dst, n_src, batch):
    idx = jnp.arange(n_src) % n_dst
    a = jax.nn.one_hot(idx, n_dst, dtype=F32).T                          # (n_dst, n_src)
    return jnp.broadcast_to(a[None], (batch, n_dst, n_src))


if __name__ == "__main__":
    key = jax.random.PRNGKey(0)
    ks = iter(jax.random.split(key, 40))
    cfg, tv = CONFIG, TRANSFORM_VAR
    B = N_EVENT

    params = dict(
        cell_init=init_mlp_params(next(ks), cfg["cell inputsize"],
                                  cfg["node init layers"], cfg["cell hidden size"]),
        track_init=init_mlp_params(next(ks), cfg["track inputsize"],
                                   cfg["track init layers"], cfg["track hidden size"]),
        node_nets=[node_net_params(next(ks), cfg["cell hidden size"],
                                   cfg["node net layers"])
                   for _ in range(cfg["n GN blocks"])],
    )
    w_slab, b_slab = pack_params(params, cfg)

    # batched per-event raw quantities
    cell_feat = jax.random.normal(next(ks), (B, N_CELL, cfg["cell inputsize"]), F32)
    track_feat = jax.random.normal(next(ks), (B, N_TRACK, cfg["track inputsize"]), F32)
    energy_cell = jax.random.normal(next(ks), (B, N_CELL, 1), F32)
    layer_cell = jax.random.randint(next(ks), (B, N_CELL, 1), 0, 6).astype(F32)
    eta_cell = jax.random.normal(next(ks), (B, N_CELL, 1), F32)
    phi_cell = jax.random.uniform(next(ks), (B, N_CELL, 1), F32, -PI, PI)
    track_pt = jnp.abs(jax.random.normal(next(ks), (B, N_TRACK, 1), F32)) + 0.1
    track_isTrack = jnp.ones((B, N_TRACK, 1), F32)
    track_eta_layer_0 = jax.random.normal(next(ks), (B, N_TRACK, 1), F32)
    track_phi_layer_0 = jax.random.uniform(next(ks), (B, N_TRACK, 1), F32, -PI, PI)
    track_eta_layer_4 = jax.random.normal(next(ks), (B, N_TRACK, 1), F32)
    track_phi_layer_4 = jax.random.uniform(next(ks), (B, N_TRACK, 1), F32, -PI, PI)
    energy_track = jax.random.normal(next(ks), (B, N_TRACK, 1), F32)
    track_parent_target = jax.random.normal(next(ks), (B, N_TRACK, 1), F32)
    topo_parent_target = jax.random.normal(next(ks), (B, N_TOPO, 1), F32)

    cell_scalars = jnp.concatenate(
        [eta_cell, phi_cell, layer_cell, energy_cell], axis=-1)          # (B, Nc, 4)
    track_scalars = jnp.concatenate(
        [track_eta_layer_0, track_phi_layer_0, track_eta_layer_4, track_phi_layer_4,
         track_pt, track_isTrack, energy_track, track_parent_target], axis=-1)  # (B, Nt, 8)

    graph = dict(
        cell_feat=cell_feat, track_feat=track_feat,
        cell_scalars=cell_scalars, track_scalars=track_scalars,
        topo_parent_target=topo_parent_target,
        A_cell2pre=_assign_adj(N_PRE, N_CELL, B),
        A_track2pre=_assign_adj(N_PRE, N_TRACK, B),
        A_pre2topo=_assign_adj(N_TOPO, N_PRE, B),
        A_cell2topo=_assign_adj(N_TOPO, N_CELL, B),
        A_prepre=jnp.ones((B, N_PRE, N_PRE), F32),         # fully connected pre_nodes
        A_track2cell=jnp.ones((B, N_CELL, N_TRACK), F32),  # all tracks see all cells
    )
    cell_slab, track_slab, adj_slab = pack_graph_slabs(graph)

    fwd = jax.jit(functools.partial(mpnn_forward, cfg=cfg, tv=tv))
    out = fwd(cell_slab, track_slab, adj_slab, w_slab, b_slab)
    jax.block_until_ready(out)
    print("KERNEL_OK")
</pallas_src>

<mosaic_0001>
module attributes {stable_mosaic.version = 11 : i64} {
  func.func @_mpnn_fused_kernel(%arg0: i32, %arg1: memref<1x64x32xf32, #tpu.memory_space<vmem>>, %arg2: memref<1x16x16xf32, #tpu.memory_space<vmem>>, %arg3: memref<1x24x128xf32, #tpu.memory_space<vmem>>, %arg4: memref<592x64xf32, #tpu.memory_space<vmem>>, %arg5: memref<16x64xf32, #tpu.memory_space<vmem>>, %arg6: memref<1x64x64xf32, #tpu.memory_space<vmem>>, %arg7: memref<1x48x64xf32, #tpu.memory_space<vmem>>) attributes {dimension_semantics = [#tpu.dimension_semantics<parallel>], iteration_bounds = array<i64: 8>, scalar_prefetch = 0 : i64, scratch_operands = 0 : i64, tpu.core_type = #tpu.core_type<tc>, window_params = [{transform_indices = @transform_0, window_bounds = array<i64: 1, 64, 32>}, {transform_indices = @transform_1, window_bounds = array<i64: 1, 16, 16>}, {transform_indices = @transform_2, window_bounds = array<i64: 1, 24, 128>}, {pipeline_mode = #tpu.pipeline_mode<synchronous>, transform_indices = @transform_3, window_bounds = array<i64: 592, 64>}, {pipeline_mode = #tpu.pipeline_mode<synchronous>, transform_indices = @transform_4, window_bounds = array<i64: 16, 64>}, {transform_indices = @transform_5, window_bounds = array<i64: 1, 64, 64>}, {transform_indices = @transform_6, window_bounds = array<i64: 1, 48, 64>}]} {
    %cst = arith.constant 0.000000e+00 : f32
    %0 = vector.broadcast %cst : f32 to vector<64x64xf32>
    %c0 = arith.constant 0 : index
    %c0_0 = arith.constant 0 : index
    %c0_1 = arith.constant 0 : index
    %1 = vector.load %arg6[%c0, %c0_0, %c0_1] : memref<1x64x64xf32, #tpu.memory_space<vmem>>, vector<1x64x64xf32>
    %2 = vector.shape_cast %1 : vector<1x64x64xf32> to vector<64x64xf32>
    %3 = vector.shape_cast %0 : vector<64x64xf32> to vector<1x64x64xf32>
    tpu.vector_store %arg6[%c0, %c0_0, %c0_1], %3 {strides = array<i32>} : memref<1x64x64xf32, #tpu.memory_space<vmem>>, vector<1x64x64xf32>,
    %cst_2 = arith.constant 0.000000e+00 : f32
    %4 = vector.broadcast %cst_2 : f32 to vector<48x64xf32>
    %c0_3 = arith.constant 0 : index
    %c0_4 = arith.constant 0 : index
    %c0_5 = arith.constant 0 : index
    %5 = vector.load %arg7[%c0_3, %c0_4, %c0_5] : memref<1x48x64xf32, #tpu.memory_space<vmem>>, vector<1x48x64xf32>
    %6 = vector.shape_cast %5 : vector<1x48x64xf32> to vector<48x64xf32>
    %7 = vector.shape_cast %4 : vector<48x64xf32> to vector<1x48x64xf32>
    tpu.vector_store %arg7[%c0_3, %c0_4, %c0_5], %7 {strides = array<i32>} : memref<1x48x64xf32, #tpu.memory_space<vmem>>, vector<1x48x64xf32>,
    %c0_6 = arith.constant 0 : index
    %c0_7 = arith.constant 0 : index
    %c0_8 = arith.constant 0 : index
    %8 = vector.load %arg1[%c0_6, %c0_7, %c0_8] : memref<1x64x32xf32, #tpu.memory_space<vmem>>, vector<1x64x32xf32>
    %9 = vector.shape_cast %8 : vector<1x64x32xf32> to vector<64x32xf32>
    %c0_9 = arith.constant 0 : index
    %c0_10 = arith.constant 0 : index
    %c0_11 = arith.constant 0 : index
    %10 = vector.load %arg2[%c0_9, %c0_10, %c0_11] : memref<1x16x16xf32, #tpu.memory_space<vmem>>, vector<1x16x16xf32>
    %11 = vector.shape_cast %10 : vector<1x16x16xf32> to vector<16x16xf32>
    %c0_12 = arith.constant 0 : index
    %c0_13 = arith.constant 0 : index
    %c0_14 = arith.constant 0 : index
    %12 = vector.load %arg3[%c0_12, %c0_13, %c0_14] : memref<1x24x128xf32, #tpu.memory_space<vmem>>, vector<1x24x128xf32>
    %13 = vector.shape_cast %12 : vector<1x24x128xf32> to vector<24x128xf32>
    %14 = vector.extract_strided_slice %9 {offsets = [0, 0], sizes = [64, 8], strides = [1, 1]} : vector<64x32xf32> to vector<64x8xf32>
    %15 = vector.extract_strided_slice %9 {offsets = [0, 8], sizes = [64, 1], strides = [1, 1]} : vector<64x32xf32> to vector<64x1xf32>
    %16 = vector.extract_strided_slice %9 {offsets = [0, 9], sizes = [64, 1], strides = [1, 1]} : vector<64x32xf32> to vector<64x1xf32>
    %17 = vector.extract_strided_slice %9 {offsets = [0, 10], sizes = [64, 1], strides = [1, 1]} : vector<64x32xf32> to vector<64x1xf32>
    %18 = vector.extract_strided_slice %9 {offsets = [0, 11], sizes = [64, 1], strides = [1, 1]} : vector<64x32xf32> to vector<64x1xf32>
    %19 = vector.extract_strided_slice %9 {offsets = [0, 16], sizes = [64, 16], strides = [1, 1]} : vector<64x32xf32> to vector<64x16xf32>
    %20 = vector.extract_strided_slice %11 {offsets = [0, 0], sizes = [16, 8], strides = [1, 1]} : vector<16x16xf32> to vector<16x8xf32>
    %21 = vector.extract_strided_slice %11 {offsets = [0, 8], sizes = [16, 1], strides = [1, 1]} : vector<16x16xf32> to vector<16x1xf32>
    %22 = vector.extract_strided_slice %11 {offsets = [0, 9], sizes = [16, 1], strides = [1, 1]} : vector<16x16xf32> to vector<16x1xf32>
    %23 = vector.extract_strided_slice %11 {offsets = [0, 14], sizes = [16, 1], strides = [1, 1]} : vector<16x16xf32> to vector<16x1xf32>
    %24 = vector.extract_strided_slice %11 {offsets = [0, 15], sizes = [16, 1], strides = [1, 1]} : vector<16x16xf32> to vector<16x1xf32>
    %25 = vector.extract_strided_slice %13 {offsets = [0, 0], sizes = [16, 64], strides = [1, 1]} : vector<24x128xf32> to vector<16x64xf32>
    %26 = vector.extract_strided_slice %13 {offsets = [0, 64], sizes = [16, 16], strides = [1, 1]} : vector<24x128xf32> to vector<16x16xf32>
    %27 = vector.extract_strided_slice %13 {offsets = [0, 80], sizes = [16, 16], strides = [1, 1]} : vector<24x128xf32> to vector<16x16xf32>
    %28 = vector.extract_strided_slice %13 {offsets = [16, 0], sizes = [8, 64], strides = [1, 1]} : vector<24x128xf32> to vector<8x64xf32>
    %29 = vector.extract_strided_slice %13 {offsets = [16, 64], sizes = [8, 16], strides = [1, 1]} : vector<24x128xf32> to vector<8x16xf32>
    %30 = vector.extract_strided_slice %13 {offsets = [16, 80], sizes = [8, 1], strides = [1, 1]} : vector<24x128xf32> to vector<8x1xf32>
    %31 = vector.extract_strided_slice %13 {offsets = [16, 96], sizes = [1, 16], strides = [1, 1]} : vector<24x128xf32> to vector<1x16xf32>
    %32 = vector.extract_strided_slice %13 {offsets = [17, 96], sizes = [1, 16], strides = [1, 1]} : vector<24x128xf32> to vector<1x16xf32>
    %33 = vector.extract_strided_slice %13 {offsets = [18, 96], sizes = [1, 16], strides = [1, 1]} : vector<24x128xf32> to vector<1x16xf32>
    %34 = vector.extract_strided_slice %13 {offsets = [19, 96], sizes = [1, 16], strides = [1, 1]} : vector<24x128xf32> to vector<1x16xf32>
    %35 = vector.extract_strided_slice %13 {offsets = [20, 96], sizes = [1, 16], strides = [1, 1]} : vector<24x128xf32> to vector<1x16xf32>
    %c0_15 = arith.constant 0 : index
    %c0_16 = arith.constant 0 : index
    %36 = vector.load %arg4[%c0_15, %c0_16] : memref<592x64xf32, #tpu.memory_space<vmem>>, vector<8x32xf32>
    %cst_17 = arith.constant dense<0.000000e+00> : vector<64x32xf32>
    %37 = tpu.matmul %14, %36, %cst_17 {dimension_numbers = #tpu.dot_dimension_numbers<[1], [0], [0], [1], [0, 0, 1, 1], [], []>} : vector<64x8xf32>, vector<8x32xf32>, vector<64x32xf32> -> vector<64x32xf32>
    %c0_18 = arith.constant 0 : index
    %c0_19 = arith.constant 0 : index
    %38 = vector.load %arg5[%c0_18, %c0_19] : memref<16x64xf32, #tpu.memory_space<vmem>>, vector<1x32xf32>
    %39 = vector.broadcast %38 : vector<1x32xf32> to vector<64x32xf32>
    %40 = arith.addf %37, %39 : vector<64x32xf32>
    %cst_20 = arith.constant 0.000000e+00 : f32
    %41 = vector.broadcast %cst_20 : f32 to vector<64x32xf32>
    %42 = arith.maximumf %40, %41 : vector<64x32xf32>
    %c1 = arith.constant 1 : index
    %c0_21 = arith.constant 0 : index
    %43 = vector.load %arg5[%c1, %c0_21] : memref<16x64xf32, #tpu.memory_space<vmem>>, vector<1x32xf32>
    %44 = vector.broadcast %43 : vector<1x32xf32> to vector<64x32xf32>
    %45 = arith.mulf %42, %44 : vector<64x32xf32>
    %c2 = arith.constant 2 : index
    %c0_22 = arith.constant 0 : index
    %46 = vector.load %arg5[%c2, %c0_22] : memref<16x64xf32, #tpu.memory_space<vmem>>, vector<1x32xf32>
    %47 = vector.broadcast %46 : vector<1x32xf32> to vector<64x32xf32>
    %48 = arith.addf %45, %47 : vector<64x32xf32>
    %c8 = arith.constant 8 : index
    %c0_23 = arith.constant 0 : index
    %49 = vector.load %arg4[%c8, %c0_23] : memref<592x64xf32, #tpu.memory_space<vmem>>, vector<32x32xf32>
    %cst_24 = arith.constant dense<0.000000e+00> : vector<64x32xf32>
    %50 = tpu.matmul %48, %49, %cst_24 {dimension_numbers = #tpu.dot_dimension_numbers<[1], [0], [0], [1], [0, 0, 1, 1], [], []>} : vector<64x32xf32>, vector<32x32xf32>, vector<64x32xf32> -> vector<64x32xf32>
    %c3 = arith.constant 3 : index
    %c0_25 = arith.constant 0 : index
    %51 = vector.load %arg5[%c3, %c0_25] : memref<16x64xf32, #tpu.memory_space<vmem>>, vector<1x32xf32>
    %52 = vector.broadcast %51 : vector<1x32xf32> to vector<64x32xf32>
    %53 = arith.addf %50, %52 : vector<64x32xf32>
    %cst_26 = arith.constant 0.000000e+00 : f32
    %54 = vector.broadcast %cst_26 : f32 to vector<64x32xf32>
    %55 = arith.maximumf %53, %54 : vector<64x32xf32>
    %c40 = arith.constant 40 : index
    %c0_27 = arith.constant 0 : index
    %56 = vector.load %arg4[%c40, %c0_27] : memref<592x64xf32, #tpu.memory_space<vmem>>, vector<32x32xf32>
    %cst_28 = arith.constant dense<0.000000e+00> : vector<64x32xf32>
    %57 = tpu.matmul %55, %56, %cst_28 {dimension_numbers = #tpu.dot_dimension_numbers<[1], [0], [0], [1], [0, 0, 1, 1], [], []>} : vector<64x32xf32>, vector<32x32xf32>, vector<64x32xf32> -> vector<64x32xf32>
    %c4 = arith.constant 4 : index
    %c0_29 = arith.constant 0 : index
    %58 = vector.load %arg5[%c4, %c0_29] : memref<16x64xf32, #tpu.memory_space<vmem>>, vector<1x32xf32>
    %59 = vector.broadcast %58 : vector<1x32xf32> to vector<64x32xf32>
    %60 = arith.addf %57, %59 : vector<64x32xf32>
    %c72 = arith.constant 72 : index
    %c0_30 = arith.constant 0 : index
    %61 = vector.load %arg4[%c72, %c0_30] : memref<592x64xf32, #tpu.memory_space<vmem>>, vector<8x32xf32>
    %cst_31 = arith.constant dense<0.000000e+00> : vector<16x32xf32>
    %62 = tpu.matmul %20, %61, %cst_31 {dimension_numbers = #tpu.dot_dimension_numbers<[1], [0], [0], [1], [0, 0, 1, 1], [], []>} : vector<16x8xf32>, vector<8x32xf32>, vector<16x32xf32> -> vector<16x32xf32>
    %c5 = arith.constant 5 : index
    %c0_32 = arith.constant 0 : index
    %63 = vector.load %arg5[%c5, %c0_32] : memref<16x64xf32, #tpu.memory_space<vmem>>, vector<1x32xf32>
    %64 = vector.broadcast %63 : vector<1x32xf32> to vector<16x32xf32>
    %65 = arith.addf %62, %64 : vector<16x32xf32>
    %cst_33 = arith.constant 0.000000e+00 : f32
    %66 = vector.broadcast %cst_33 : f32 to vector<16x32xf32>
    %67 = arith.maximumf %65, %66 : vector<16x32xf32>
    %c6 = arith.constant 6 : index
    %c0_34 = arith.constant 0 : index
    %68 = vector.load %arg5[%c6, %c0_34] : memref<16x64xf32, #tpu.memory_space<vmem>>, vector<1x32xf32>
    %69 = vector.broadcast %68 : vector<1x32xf32> to vector<16x32xf32>
    %70 = arith.mulf %67, %69 : vector<16x32xf32>
    %c7 = arith.constant 7 : index
    %c0_35 = arith.constant 0 : index
    %71 = vector.load %arg5[%c7, %c0_35] : memref<16x64xf32, #tpu.memory_space<vmem>>, vector<1x32xf32>
    %72 = vector.broadcast %71 : vector<1x32xf32> to vector<16x32xf32>
    %73 = arith.addf %70, %72 : vector<16x32xf32>
    %c80 = arith.constant 80 : index
    %c0_36 = arith.constant 0 : index
    %74 = vector.load %arg4[%c80, %c0_36] : memref<592x64xf32, #tpu.memory_space<vmem>>, vector<32x32xf32>
    %cst_37 = arith.constant dense<0.000000e+00> : vector<16x32xf32>
    %75 = tpu.matmul %73, %74, %cst_37 {dimension_numbers = #tpu.dot_dimension_numbers<[1], [0], [0], [1], [0, 0, 1, 1], [], []>} : vector<16x32xf32>, vector<32x32xf32>, vector<16x32xf32> -> vector<16x32xf32>
    %c8_38 = arith.constant 8 : index
    %c0_39 = arith.constant 0 : index
    %76 = vector.load %arg5[%c8_38, %c0_39] : memref<16x64xf32, #tpu.memory_space<vmem>>, vector<1x32xf32>
    %77 = vector.broadcast %76 : vector<1x32xf32> to vector<16x32xf32>
    %78 = arith.addf %75, %77 : vector<16x32xf32>
    %cst_40 = arith.constant 0.000000e+00 : f32
    %79 = vector.broadcast %cst_40 : f32 to vector<16x32xf32>
    %80 = arith.maximumf %78, %79 : vector<16x32xf32>
    %c112 = arith.constant 112 : index
    %c0_41 = arith.constant 0 : index
    %81 = vector.load %arg4[%c112, %c0_41] : memref<592x64xf32, #tpu.memory_space<vmem>>, vector<32x32xf32>
    %cst_42 = arith.constant dense<0.000000e+00> : vector<16x32xf32>
    %82 = tpu.matmul %80, %81, %cst_42 {dimension_numbers = #tpu.dot_dimension_numbers<[1], [0], [0], [1], [0, 0, 1, 1], [], []>} : vector<16x32xf32>, vector<32x32xf32>, vector<16x32xf32> -> vector<16x32xf32>
    %c9 = arith.constant 9 : index
    %c0_43 = arith.constant 0 : index
    %83 = vector.load %arg5[%c9, %c0_43] : memref<16x64xf32, #tpu.memory_space<vmem>>, vector<1x32xf32>
    %84 = vector.broadcast %83 : vector<1x32xf32> to vector<16x32xf32>
    %85 = arith.addf %82, %84 : vector<16x32xf32>
    %c0_44 = arith.constant 0 : index
    %c0_45 = arith.constant 0 : index
    %c0_46 = arith.constant 0 : index
    %86 = vector.load %arg6[%c0_44, %c0_45, %c0_46] : memref<1x64x64xf32, #tpu.memory_space<vmem>>, vector<1x64x32xf32>
    %87 = vector.shape_cast %86 : vector<1x64x32xf32> to vector<64x32xf32>
    %88 = vector.shape_cast %60 : vector<64x32xf32> to vector<1x64x32xf32>
    tpu.vector_store %arg6[%c0_44, %c0_45, %c0_46], %88 {strides = array<i32>} : memref<1x64x64xf32, #tpu.memory_space<vmem>>, vector<1x64x32xf32>,
    %89 = tpu.iota {dimensions = array<i32: 1>} : vector<64x6xi32>
    %90 = arith.sitofp %89 : vector<64x6xi32> to vector<64x6xf32>
    %91 = vector.broadcast %17 : vector<64x1xf32> to vector<64x6xf32>
    %92 = arith.cmpf oeq, %91, %90 : vector<64x6xf32>
    %93 = arith.extui %92 : vector<64x6xi1> to vector<64x6xi32>
    %94 = arith.sitofp %93 : vector<64x6xi32> to vector<64x6xf32>
    %95 = vector.broadcast %18 : vector<64x1xf32> to vector<64x6xf32>
    %96 = arith.mulf %95, %94 : vector<64x6xf32>
    %cst_47 = arith.constant dense<0.000000e+00> : vector<6xf32>
    %97 = vector.multi_reduction <add>, %96, %cst_47 [0] : vector<64x6xf32> to vector<6xf32>
    %98 = vector.shape_cast %97 : vector<6xf32> to vector<1x6xf32>
    %c0_48 = arith.constant 0 : index
    %c41 = arith.constant 41 : index
    %c0_49 = arith.constant 0 : index
    %99 = vector.load %arg7[%c0_48, %c41, %c0_49] : memref<1x48x64xf32, #tpu.memory_space<vmem>>, vector<1x1x6xf32>
    %100 = vector.shape_cast %99 : vector<1x1x6xf32> to vector<1x6xf32>
    %101 = vector.shape_cast %98 : vector<1x6xf32> to vector<1x1x6xf32>
    tpu.vector_store %arg7[%c0_48, %c41, %c0_49], %101 {strides = array<i32>} : memref<1x48x64xf32, #tpu.memory_space<vmem>>, vector<1x1x6xf32>,
    %cst_50 = arith.constant dense<0.000000e+00> : vector<16x32xf32>
    %102 = tpu.matmul %25, %60, %cst_50 {dimension_numbers = #tpu.dot_dimension_numbers<[1], [0], [0], [1], [0, 0, 1, 1], [], []>} : vector<16x64xf32>, vector<64x32xf32>, vector<16x32xf32> -> vector<16x32xf32>
    %cst_51 = arith.constant dense<0.000000e+00> : vector<16x32xf32>
    %103 = tpu.matmul %26, %85, %cst_51 {dimension_numbers = #tpu.dot_dimension_numbers<[1], [0], [0], [1], [0, 0, 1, 1], [], []>} : vector<16x16xf32>, vector<16x32xf32>, vector<16x32xf32> -> vector<16x32xf32>
    %104 = arith.addf %102, %103 : vector<16x32xf32>
    %cst_52 = arith.constant dense<0.000000e+00> : vector<32xf32>
    %105 = vector.multi_reduction <add>, %104, %cst_52 [0] : vector<16x32xf32> to vector<32xf32>
    %106 = vector.shape_cast %105 : vector<32xf32> to vector<1x32xf32>
    %c144 = arith.constant 144 : index
    %c0_53 = arith.constant 0 : index
    %107 = vector.load %arg4[%c144, %c0_53] : memref<592x64xf32, #tpu.memory_space<vmem>>, vector<32x64xf32>
    %c176 = arith.constant 176 : index
    %c0_54 = arith.constant 0 : index
    %108 = vector.load %arg4[%c176, %c0_54] : memref<592x64xf32, #tpu.memory_space<vmem>>, vector<32x64xf32>
    %c208 = arith.constant 208 : index
    %c0_55 = arith.constant 0 : index
    %109 = vector.load %arg4[%c208, %c0_55] : memref<592x64xf32, #tpu.memory_space<vmem>>, vector<32x64xf32>
    %c240 = arith.constant 240 : index
    %c0_56 = arith.constant 0 : index
    %110 = vector.load %arg4[%c240, %c0_56] : memref<592x64xf32, #tpu.memory_space<vmem>>, vector<64x64xf32>
    %c304 = arith.constant 304 : index
    %c0_57 = arith.constant 0 : index
    %111 = vector.load %arg4[%c304, %c0_57] : memref<592x64xf32, #tpu.memory_space<vmem>>, vector<64x32xf32>
    %c10 = arith.constant 10 : index
    %c0_58 = arith.constant 0 : index
    %112 = vector.load %arg5[%c10, %c0_58] : memref<16x64xf32, #tpu.memory_space<vmem>>, vector<1x64xf32>
    %c11 = arith.constant 11 : index
    %c0_59 = arith.constant 0 : index
    %113 = vector.load %arg5[%c11, %c0_59] : memref<16x64xf32, #tpu.memory_space<vmem>>, vector<1x64xf32>
    %c12 = arith.constant 12 : index
    %c0_60 = arith.constant 0 : index
    %114 = vector.load %arg5[%c12, %c0_60] : memref<16x64xf32, #tpu.memory_space<vmem>>, vector<1x32xf32>
    %cst_61 = arith.constant dense<0.000000e+00> : vector<16x32xf32>
    %115 = tpu.matmul %27, %104, %cst_61 {dimension_numbers = #tpu.dot_dimension_numbers<[1], [0], [0], [1], [0, 0, 1, 1], [], []>} : vector<16x16xf32>, vector<16x32xf32>, vector<16x32xf32> -> vector<16x32xf32>
    %cst_62 = arith.constant dense<0.000000e+00> : vector<16x64xf32>
    %116 = tpu.matmul %115, %107, %cst_62 {dimension_numbers = #tpu.dot_dimension_numbers<[1], [0], [0], [1], [0, 0, 1, 1], [], []>} : vector<16x32xf32>, vector<32x64xf32>, vector<16x64xf32> -> vector<16x64xf32>
    %cst_63 = arith.constant dense<0.000000e+00> : vector<16x64xf32>
    %117 = tpu.matmul %104, %108, %cst_63 {dimension_numbers = #tpu.dot_dimension_numbers<[1], [0], [0], [1], [0, 0, 1, 1], [], []>} : vector<16x32xf32>, vector<32x64xf32>, vector<16x64xf32> -> vector<16x64xf32>
    %118 = arith.addf %116, %117 : vector<16x64xf32>
    %cst_64 = arith.constant dense<0.000000e+00> : vector<1x64xf32>
    %119 = tpu.matmul %106, %109, %cst_64 {dimension_numbers = #tpu.dot_dimension_numbers<[1], [0], [0], [1], [0, 0, 1, 1], [], []>} : vector<1x32xf32>, vector<32x64xf32>, vector<1x64xf32> -> vector<1x64xf32>
    %120 = vector.broadcast %119 : vector<1x64xf32> to vector<16x64xf32>
    %121 = arith.addf %118, %120 : vector<16x64xf32>
    %122 = vector.broadcast %112 : vector<1x64xf32> to vector<16x64xf32>
    %123 = arith.addf %121, %122 : vector<16x64xf32>
    %cst_65 = arith.constant 0.000000e+00 : f32
    %124 = vector.broadcast %cst_65 : f32 to vector<16x64xf32>
    %125 = arith.maximumf %123, %124 : vector<16x64xf32>
    %cst_66 = arith.constant dense<0.000000e+00> : vector<16x64xf32>
    %126 = tpu.matmul %125, %110, %cst_66 {dimension_numbers = #tpu.dot_dimension_numbers<[1], [0], [0], [1], [0, 0, 1, 1], [], []>} : vector<16x64xf32>, vector<64x64xf32>, vector<16x64xf32> -> vector<16x64xf32>
    %127 = vector.broadcast %113 : vector<1x64xf32> to vector<16x64xf32>
    %128 = arith.addf %126, %127 : vector<16x64xf32>
    %cst_67 = arith.constant 0.000000e+00 : f32
    %129 = vector.broadcast %cst_67 : f32 to vector<16x64xf32>
    %130 = arith.maximumf %128, %129 : vector<16x64xf32>
    %cst_68 = arith.constant dense<0.000000e+00> : vector<16x32xf32>
    %131 = tpu.matmul %130, %111, %cst_68 {dimension_numbers = #tpu.dot_dimension_numbers<[1], [0], [0], [1], [0, 0, 1, 1], [], []>} : vector<16x64xf32>, vector<64x32xf32>, vector<16x32xf32> -> vector<16x32xf32>
    %132 = vector.broadcast %114 : vector<1x32xf32> to vector<16x32xf32>
    %133 = arith.addf %131, %132 : vector<16x32xf32>
    %134 = arith.mulf %133, %133 : vector<16x32xf32>
    %cst_69 = arith.constant dense<0.000000e+00> : vector<16xf32>
    %135 = vector.multi_reduction <add>, %134, %cst_69 [1] : vector<16x32xf32> to vector<16xf32>
    %136 = vector.shape_cast %135 : vector<16xf32> to vector<16x1xf32>
    %cst_70 = arith.constant 9.99999996E-13 : f32
    %137 = vector.broadcast %cst_70 : f32 to vector<16x1xf32>
    %138 = arith.addf %136, %137 : vector<16x1xf32>
    %139 = math.rsqrt %138 : vector<16x1xf32>
    %140 = vector.broadcast %139 : vector<16x1xf32> to vector<16x32xf32>
    %141 = arith.mulf %133, %140 : vector<16x32xf32>
    %cst_71 = arith.constant dense<0.000000e+00> : vector<32xf32>
    %142 = vector.multi_reduction <add>, %141, %cst_71 [0] : vector<16x32xf32> to vector<32xf32>
    %143 = vector.shape_cast %142 : vector<32xf32> to vector<1x32xf32>
    %cst_72 = arith.constant dense<0.000000e+00> : vector<16x32xf32>
    %144 = tpu.matmul %27, %141, %cst_72 {dimension_numbers = #tpu.dot_dimension_numbers<[1], [0], [0], [1], [0, 0, 1, 1], [], []>} : vector<16x16xf32>, vector<16x32xf32>, vector<16x32xf32> -> vector<16x32xf32>
    %cst_73 = arith.constant dense<0.000000e+00> : vector<16x64xf32>
    %145 = tpu.matmul %144, %107, %cst_73 {dimension_numbers = #tpu.dot_dimension_numbers<[1], [0], [0], [1], [0, 0, 1, 1], [], []>} : vector<16x32xf32>, vector<32x64xf32>, vector<16x64xf32> -> vector<16x64xf32>
    %cst_74 = arith.constant dense<0.000000e+00> : vector<16x64xf32>
    %146 = tpu.matmul %141, %108, %cst_74 {dimension_numbers = #tpu.dot_dimension_numbers<[1], [0], [0], [1], [0, 0, 1, 1], [], []>} : vector<16x32xf32>, vector<32x64xf32>, vector<16x64xf32> -> vector<16x64xf32>
    %147 = arith.addf %145, %146 : vector<16x64xf32>
    %cst_75 = arith.constant dense<0.000000e+00> : vector<1x64xf32>
    %148 = tpu.matmul %143, %109, %cst_75 {dimension_numbers = #tpu.dot_dimension_numbers<[1], [0], [0], [1], [0, 0, 1, 1], [], []>} : vector<1x32xf32>, vector<32x64xf32>, vector<1x64xf32> -> vector<1x64xf32>
    %149 = vector.broadcast %148 : vector<1x64xf32> to vector<16x64xf32>
    %150 = arith.addf %147, %149 : vector<16x64xf32>
    %151 = vector.broadcast %112 : vector<1x64xf32> to vector<16x64xf32>
    %152 = arith.addf %150, %151 : vector<16x64xf32>
    %cst_76 = arith.constant 0.000000e+00 : f32
    %153 = vector.broadcast %cst_76 : f32 to vector<16x64xf32>
    %154 = arith.maximumf %152, %153 : vector<16x64xf32>
    %cst_77 = arith.constant dense<0.000000e+00> : vector<16x64xf32>
    %155 = tpu.matmul %154, %110, %cst_77 {dimension_numbers = #tpu.dot_dimension_numbers<[1], [0], [0], [1], [0, 0, 1, 1], [], []>} : vector<16x64xf32>, vector<64x64xf32>, vector<16x64xf32> -> vector<16x64xf32>
    %156 = vector.broadcast %113 : vector<1x64xf32> to vector<16x64xf32>
    %157 = arith.addf %155, %156 : vector<16x64xf32>
    %cst_78 = arith.constant 0.000000e+00 : f32
    %158 = vector.broadcast %cst_78 : f32 to vector<16x64xf32>
    %159 = arith.maximumf %157, %158 : vector<16x64xf32>
    %cst_79 = arith.constant dense<0.000000e+00> : vector<16x32xf32>
    %160 = tpu.matmul %159, %111, %cst_79 {dimension_numbers = #tpu.dot_dimension_numbers<[1], [0], [0], [1], [0, 0, 1, 1], [], []>} : vector<16x64xf32>, vector<64x32xf32>, vector<16x32xf32> -> vector<16x32xf32>
    %161 = vector.broadcast %114 : vector<1x32xf32> to vector<16x32xf32>
    %162 = arith.addf %160, %161 : vector<16x32xf32>
    %163 = arith.mulf %162, %162 : vector<16x32xf32>
    %cst_80 = arith.constant dense<0.000000e+00> : vector<16xf32>
    %164 = vector.multi_reduction <add>, %163, %cst_80 [1] : vector<16x32xf32> to vector<16xf32>
    %165 = vector.shape_cast %164 : vector<16xf32> to vector<16x1xf32>
    %cst_81 = arith.constant 9.99999996E-13 : f32
    %166 = vector.broadcast %cst_81 : f32 to vector<16x1xf32>
    %167 = arith.addf %165, %166 : vector<16x1xf32>
    %168 = math.rsqrt %167 : vector<16x1xf32>
    %169 = vector.broadcast %168 : vector<16x1xf32> to vector<16x32xf32>
    %170 = arith.mulf %162, %169 : vector<16x32xf32>
    %cst_82 = arith.constant dense<0.000000e+00> : vector<32xf32>
    %171 = vector.multi_reduction <add>, %170, %cst_82 [0] : vector<16x32xf32> to vector<32xf32>
    %172 = vector.shape_cast %171 : vector<32xf32> to vector<1x32xf32>
    %c368 = arith.constant 368 : index
    %c0_83 = arith.constant 0 : index
    %173 = vector.load %arg4[%c368, %c0_83] : memref<592x64xf32, #tpu.memory_space<vmem>>, vector<32x64xf32>
    %c400 = arith.constant 400 : index
    %c0_84 = arith.constant 0 : index
    %174 = vector.load %arg4[%c400, %c0_84] : memref<592x64xf32, #tpu.memory_space<vmem>>, vector<32x64xf32>
    %c432 = arith.constant 432 : index
    %c0_85 = arith.constant 0 : index
    %175 = vector.load %arg4[%c432, %c0_85] : memref<592x64xf32, #tpu.memory_space<vmem>>, vector<32x64xf32>
    %c464 = arith.constant 464 : index
    %c0_86 = arith.constant 0 : index
    %176 = vector.load %arg4[%c464, %c0_86] : memref<592x64xf32, #tpu.memory_space<vmem>>, vector<64x64xf32>
    %c528 = arith.constant 528 : index
    %c0_87 = arith.constant 0 : index
    %177 = vector.load %arg4[%c528, %c0_87] : memref<592x64xf32, #tpu.memory_space<vmem>>, vector<64x32xf32>
    %c13 = arith.constant 13 : index
    %c0_88 = arith.constant 0 : index
    %178 = vector.load %arg5[%c13, %c0_88] : memref<16x64xf32, #tpu.memory_space<vmem>>, vector<1x64xf32>
    %c14 = arith.constant 14 : index
    %c0_89 = arith.constant 0 : index
    %179 = vector.load %arg5[%c14, %c0_89] : memref<16x64xf32, #tpu.memory_space<vmem>>, vector<1x64xf32>
    %c15 = arith.constant 15 : index
    %c0_90 = arith.constant 0 : index
    %180 = vector.load %arg5[%c15, %c0_90] : memref<16x64xf32, #tpu.memory_space<vmem>>, vector<1x32xf32>
    %cst_91 = arith.constant dense<0.000000e+00> : vector<16x32xf32>
    %181 = tpu.matmul %27, %170, %cst_91 {dimension_numbers = #tpu.dot_dimension_numbers<[1], [0], [0], [1], [0, 0, 1, 1], [], []>} : vector<16x16xf32>, vector<16x32xf32>, vector<16x32xf32> -> vector<16x32xf32>
    %cst_92 = arith.constant dense<0.000000e+00> : vector<16x64xf32>
    %182 = tpu.matmul %181, %173, %cst_92 {dimension_numbers = #tpu.dot_dimension_numbers<[1], [0], [0], [1], [0, 0, 1, 1], [], []>} : vector<16x32xf32>, vector<32x64xf32>, vector<16x64xf32> -> vector<16x64xf32>
    %cst_93 = arith.constant dense<0.000000e+00> : vector<16x64xf32>
    %183 = tpu.matmul %170, %174, %cst_93 {dimension_numbers = #tpu.dot_dimension_numbers<[1], [0], [0], [1], [0, 0, 1, 1], [], []>} : vector<16x32xf32>, vector<32x64xf32>, vector<16x64xf32> -> vector<16x64xf32>
    %184 = arith.addf %182, %183 : vector<16x64xf32>
    %cst_94 = arith.constant dense<0.000000e+00> : vector<1x64xf32>
    %185 = tpu.matmul %172, %175, %cst_94 {dimension_numbers = #tpu.dot_dimension_numbers<[1], [0], [0], [1], [0, 0, 1, 1], [], []>} : vector<1x32xf32>, vector<32x64xf32>, vector<1x64xf32> -> vector<1x64xf32>
    %186 = vector.broadcast %185 : vector<1x64xf32> to vector<16x64xf32>
    %187 = arith.addf %184, %186 : vector<16x64xf32>
    %188 = vector.broadcast %178 : vector<1x64xf32> to vector<16x64xf32>
    %189 = arith.addf %187, %188 : vector<16x64xf32>
    %cst_95 = arith.constant 0.000000e+00 : f32
    %190 = vector.broadcast %cst_95 : f32 to vector<16x64xf32>
    %191 = arith.maximumf %189, %190 : vector<16x64xf32>
    %cst_96 = arith.constant dense<0.000000e+00> : vector<16x64xf32>
    %192 = tpu.matmul %191, %176, %cst_96 {dimension_numbers = #tpu.dot_dimension_numbers<[1], [0], [0], [1], [0, 0, 1, 1], [], []>} : vector<16x64xf32>, vector<64x64xf32>, vector<16x64xf32> -> vector<16x64xf32>
    %193 = vector.broadcast %179 : vector<1x64xf32> to vector<16x64xf32>
    %194 = arith.addf %192, %193 : vector<16x64xf32>
    %cst_97 = arith.constant 0.000000e+00 : f32
    %195 = vector.broadcast %cst_97 : f32 to vector<16x64xf32>
    %196 = arith.maximumf %194, %195 : vector<16x64xf32>
    %cst_98 = arith.constant dense<0.000000e+00> : vector<16x32xf32>
    %197 = tpu.matmul %196, %177, %cst_98 {dimension_numbers = #tpu.dot_dimension_numbers<[1], [0], [0], [1], [0, 0, 1, 1], [], []>} : vector<16x64xf32>, vector<64x32xf32>, vector<16x32xf32> -> vector<16x32xf32>
    %198 = vector.broadcast %180 : vector<1x32xf32> to vector<16x32xf32>
    %199 = arith.addf %197, %198 : vector<16x32xf32>
    %200 = arith.mulf %199, %199 : vector<16x32xf32>
    %cst_99 = arith.constant dense<0.000000e+00> : vector<16xf32>
    %201 = vector.multi_reduction <add>, %200, %cst_99 [1] : vector<16x32xf32> to vector<16xf32>
    %202 = vector.shape_cast %201 : vector<16xf32> to vector<16x1xf32>
    %cst_100 = arith.constant 9.99999996E-13 : f32
    %203 = vector.broadcast %cst_100 : f32 to vector<16x1xf32>
    %204 = arith.addf %202, %203 : vector<16x1xf32>
    %205 = math.rsqrt %204 : vector<16x1xf32>
    %206 = vector.broadcast %205 : vector<16x1xf32> to vector<16x32xf32>
    %207 = arith.mulf %199, %206 : vector<16x32xf32>
    %cst_101 = arith.constant dense<0.000000e+00> : vector<32xf32>
    %208 = vector.multi_reduction <add>, %207, %cst_101 [0] : vector<16x32xf32> to vector<32xf32>
    %209 = vector.shape_cast %208 : vector<32xf32> to vector<1x32xf32>
    %c0_102 = arith.constant 0 : index
    %c24 = arith.constant 24 : index
    %c0_103 = arith.constant 0 : index
    %210 = vector.load %arg7[%c0_102, %c24, %c0_103] : memref<1x48x64xf32, #tpu.memory_space<vmem>>, vector<1x16x32xf32>
    %211 = vector.shape_cast %210 : vector<1x16x32xf32> to vector<16x32xf32>
    %212 = vector.shape_cast %207 : vector<16x32xf32> to vector<1x16x32xf32>
    tpu.vector_store %arg7[%c0_102, %c24, %c0_103], %212 {strides = array<i32>} : memref<1x48x64xf32, #tpu.memory_space<vmem>>, vector<1x16x32xf32>,
    %c0_104 = arith.constant 0 : index
    %c40_105 = arith.constant 40 : index
    %c0_106 = arith.constant 0 : index
    %213 = vector.load %arg7[%c0_104, %c40_105, %c0_106] : memref<1x48x64xf32, #tpu.memory_space<vmem>>, vector<1x1x32xf32>
    %214 = vector.shape_cast %213 : vector<1x1x32xf32> to vector<1x32xf32>
    %215 = vector.shape_cast %209 : vector<1x32xf32> to vector<1x1x32xf32>
    tpu.vector_store %arg7[%c0_104, %c40_105, %c0_106], %215 {strides = array<i32>} : memref<1x48x64xf32, #tpu.memory_space<vmem>>, vector<1x1x32xf32>,
    %cst_107 = arith.constant dense<0.000000e+00> : vector<8x32xf32>
    %216 = tpu.matmul %29, %207, %cst_107 {dimension_numbers = #tpu.dot_dimension_numbers<[1], [0], [0], [1], [0, 0, 1, 1], [], []>} : vector<8x16xf32>, vector<16x32xf32>, vector<8x32xf32> -> vector<8x32xf32>
    %c0_108 = arith.constant 0 : index
    %c0_109 = arith.constant 0 : index
    %c0_110 = arith.constant 0 : index
    %217 = vector.load %arg7[%c0_108, %c0_109, %c0_110] : memref<1x48x64xf32, #tpu.memory_space<vmem>>, vector<1x8x32xf32>
    %218 = vector.shape_cast %217 : vector<1x8x32xf32> to vector<8x32xf32>
    %219 = vector.shape_cast %216 : vector<8x32xf32> to vector<1x8x32xf32>
    tpu.vector_store %arg7[%c0_108, %c0_109, %c0_110], %219 {strides = array<i32>} : memref<1x48x64xf32, #tpu.memory_space<vmem>>, vector<1x8x32xf32>,
    %c0_111 = arith.constant 0 : index
    %c8_112 = arith.constant 8 : index
    %c0_113 = arith.constant 0 : index
    %220 = vector.load %arg7[%c0_111, %c8_112, %c0_113] : memref<1x48x64xf32, #tpu.memory_space<vmem>>, vector<1x16x32xf32>
    %221 = vector.shape_cast %220 : vector<1x16x32xf32> to vector<16x32xf32>
    %222 = vector.shape_cast %85 : vector<16x32xf32> to vector<1x16x32xf32>
    tpu.vector_store %arg7[%c0_111, %c8_112, %c0_113], %222 {strides = array<i32>} : memref<1x48x64xf32, #tpu.memory_space<vmem>>, vector<1x16x32xf32>,
    %c0_114 = arith.constant 0 : index
    %c0_115 = arith.constant 0 : index
    %c58 = arith.constant 58 : index
    %223 = vector.load %arg7[%c0_114, %c0_115, %c58] : memref<1x48x64xf32, #tpu.memory_space<vmem>>, vector<1x8x1xf32>
    %224 = vector.shape_cast %223 : vector<1x8x1xf32> to vector<8x1xf32>
    %225 = vector.shape_cast %30 : vector<8x1xf32> to vector<1x8x1xf32>
    tpu.vector_store %arg7[%c0_114, %c0_115, %c58], %225 {strides = array<i32>} : memref<1x48x64xf32, #tpu.memory_space<vmem>>, vector<1x8x1xf32>,
    %c0_116 = arith.constant 0 : index
    %c8_117 = arith.constant 8 : index
    %c58_118 = arith.constant 58 : index
    %226 = vector.load %arg7[%c0_116, %c8_117, %c58_118] : memref<1x48x64xf32, #tpu.memory_space<vmem>>, vector<1x16x1xf32>
    %227 = vector.shape_cast %226 : vector<1x16x1xf32> to vector<16x1xf32>
    %228 = vector.shape_cast %24 : vector<16x1xf32> to vector<1x16x1xf32>
    tpu.vector_store %arg7[%c0_116, %c8_117, %c58_118], %228 {strides = array<i32>} : memref<1x48x64xf32, #tpu.memory_space<vmem>>, vector<1x16x1xf32>,
    %cst_119 = arith.constant 1.500000e+00 : f32
    %229 = vector.broadcast %cst_119 : f32 to vector<64x1xf32>
    %230 = arith.mulf %15, %229 : vector<64x1xf32>
    %cst_120 = arith.constant 0.000000e+00 : f32
    %231 = vector.broadcast %cst_120 : f32 to vector<64x1xf32>
    %232 = arith.addf %230, %231 : vector<64x1xf32>
    %233 = vector.extract_strided_slice %94 {offsets = [0, 0], sizes = [64, 1], strides = [1, 1]} : vector<64x6xf32> to vector<64x1xf32>
    %234 = vector.extract_strided_slice %94 {offsets = [0, 1], sizes = [64, 1], strides = [1, 1]} : vector<64x6xf32> to vector<64x1xf32>
    %235 = arith.addf %233, %234 : vector<64x1xf32>
    %236 = vector.extract_strided_slice %94 {offsets = [0, 2], sizes = [64, 1], strides = [1, 1]} : vector<64x6xf32> to vector<64x1xf32>
    %237 = arith.addf %235, %236 : vector<64x1xf32>
    %238 = vector.extract_strided_slice %94 {offsets = [0, 3], sizes = [64, 1], strides = [1, 1]} : vector<64x6xf32> to vector<64x1xf32>
    %239 = vector.extract_strided_slice %94 {offsets = [0, 4], sizes = [64, 1], strides = [1, 1]} : vector<64x6xf32> to vector<64x1xf32>
    %240 = arith.addf %238, %239 : vector<64x1xf32>
    %241 = vector.extract_strided_slice %94 {offsets = [0, 5], sizes = [64, 1], strides = [1, 1]} : vector<64x6xf32> to vector<64x1xf32>
    %242 = arith.addf %240, %241 : vector<64x1xf32>
    %243 = vector.broadcast %232 : vector<64x1xf32> to vector<64x16xf32>
    %244 = vector.broadcast %31 : vector<1x16xf32> to vector<64x16xf32>
    %245 = arith.subf %243, %244 : vector<64x16xf32>
    %246 = vector.broadcast %16 : vector<64x1xf32> to vector<64x16xf32>
    %247 = vector.broadcast %32 : vector<1x16xf32> to vector<64x16xf32>
    %248 = arith.subf %246, %247 : vector<64x16xf32>
    %cst_121 = arith.constant 3.14159274 : f32
    %249 = vector.broadcast %cst_121 : f32 to vector<64x16xf32>
    %250 = arith.cmpf ogt, %248, %249 : vector<64x16xf32>
    %cst_122 = arith.constant 6.28318548 : f32
    %251 = vector.broadcast %cst_122 : f32 to vector<64x16xf32>
    %252 = arith.subf %248, %251 : vector<64x16xf32>
    %253 = arith.select %250, %252, %248 : vector<64x16xi1>, vector<64x16xf32>
    %cst_123 = arith.constant -3.14159274 : f32
    %254 = vector.broadcast %cst_123 : f32 to vector<64x16xf32>
    %255 = arith.cmpf olt, %253, %254 : vector<64x16xf32>
    %cst_124 = arith.constant 6.28318548 : f32
    %256 = vector.broadcast %cst_124 : f32 to vector<64x16xf32>
    %257 = arith.addf %253, %256 : vector<64x16xf32>
    %258 = arith.select %255, %257, %253 : vector<64x16xi1>, vector<64x16xf32>
    %259 = arith.mulf %245, %245 : vector<64x16xf32>
    %260 = arith.mulf %258, %258 : vector<64x16xf32>
    %261 = arith.addf %259, %260 : vector<64x16xf32>
    %cst_125 = arith.constant 1.225000e-03 : f32
    %262 = vector.broadcast %cst_125 : f32 to vector<64x16xf32>
    %263 = arith.cmpf olt, %261, %262 : vector<64x16xf32>
    %264 = arith.extui %263 : vector<64x16xi1> to vector<64x16xi32>
    %265 = arith.sitofp %264 : vector<64x16xi32> to vector<64x16xf32>
    %266 = vector.broadcast %237 : vector<64x1xf32> to vector<64x16xf32>
    %267 = arith.mulf %265, %266 : vector<64x16xf32>
    %268 = vector.broadcast %232 : vector<64x1xf32> to vector<64x16xf32>
    %269 = vector.broadcast %33 : vector<1x16xf32> to vector<64x16xf32>
    %270 = arith.subf %268, %269 : vector<64x16xf32>
    %271 = vector.broadcast %16 : vector<64x1xf32> to vector<64x16xf32>
    %272 = vector.broadcast %34 : vector<1x16xf32> to vector<64x16xf32>
    %273 = arith.subf %271, %272 : vector<64x16xf32>
    %cst_126 = arith.constant 3.14159274 : f32
    %274 = vector.broadcast %cst_126 : f32 to vector<64x16xf32>
    %275 = arith.cmpf ogt, %273, %274 : vector<64x16xf32>
    %cst_127 = arith.constant 6.28318548 : f32
    %276 = vector.broadcast %cst_127 : f32 to vector<64x16xf32>
    %277 = arith.subf %273, %276 : vector<64x16xf32>
    %278 = arith.select %275, %277, %273 : vector<64x16xi1>, vector<64x16xf32>
    %cst_128 = arith.constant -3.14159274 : f32
    %279 = vector.broadcast %cst_128 : f32 to vector<64x16xf32>
    %280 = arith.cmpf olt, %278, %279 : vector<64x16xf32>
    %cst_129 = arith.constant 6.28318548 : f32
    %281 = vector.broadcast %cst_129 : f32 to vector<64x16xf32>
    %282 = arith.addf %278, %281 : vector<64x16xf32>
    %283 = arith.select %280, %282, %278 : vector<64x16xi1>, vector<64x16xf32>
    %284 = arith.mulf %270, %270 : vector<64x16xf32>
    %285 = arith.mulf %283, %283 : vector<64x16xf32>
    %286 = arith.addf %284, %285 : vector<64x16xf32>
    %cst_130 = arith.constant 2.250000e-02 : f32
    %287 = vector.broadcast %cst_130 : f32 to vector<64x16xf32>
    %288 = arith.cmpf olt, %286, %287 : vector<64x16xf32>
    %289 = arith.extui %288 : vector<64x16xi1> to vector<64x16xi32>
    %290 = arith.sitofp %289 : vector<64x16xi32> to vector<64x16xf32>
    %291 = vector.broadcast %242 : vector<64x1xf32> to vector<64x16xf32>
    %292 = arith.mulf %290, %291 : vector<64x16xf32>
    %293 = arith.mulf %19, %267 : vector<64x16xf32>
    %cst_131 = arith.constant dense<0.000000e+00> : vector<64xf32>
    %294 = vector.multi_reduction <add>, %293, %cst_131 [1] : vector<64x16xf32> to vector<64xf32>
    %295 = vector.shape_cast %294 : vector<64xf32> to vector<64x1xf32>
    %296 = vector.broadcast %35 : vector<1x16xf32> to vector<64x16xf32>
    %297 = arith.mulf %267, %296 : vector<64x16xf32>
    %298 = arith.mulf %19, %297 : vector<64x16xf32>
    %cst_132 = arith.constant dense<0.000000e+00> : vector<64xf32>
    %299 = vector.multi_reduction <add>, %298, %cst_132 [1] : vector<64x16xf32> to vector<64xf32>
    %300 = vector.shape_cast %299 : vector<64xf32> to vector<64x1xf32>
    %301 = arith.mulf %19, %292 : vector<64x16xf32>
    %cst_133 = arith.constant dense<0.000000e+00> : vector<64xf32>
    %302 = vector.multi_reduction <add>, %301, %cst_133 [1] : vector<64x16xf32> to vector<64xf32>
    %303 = vector.shape_cast %302 : vector<64xf32> to vector<64x1xf32>
    %304 = vector.broadcast %35 : vector<1x16xf32> to vector<64x16xf32>
    %305 = arith.mulf %292, %304 : vector<64x16xf32>
    %306 = arith.mulf %19, %305 : vector<64x16xf32>
    %cst_134 = arith.constant dense<0.000000e+00> : vector<64xf32>
    %307 = vector.multi_reduction <add>, %306, %cst_134 [1] : vector<64x16xf32> to vector<64xf32>
    %308 = vector.shape_cast %307 : vector<64xf32> to vector<64x1xf32>
    %c0_135 = arith.constant 0 : index
    %c0_136 = arith.constant 0 : index
    %c32 = arith.constant 32 : index
    %309 = vector.load %arg6[%c0_135, %c0_136, %c32] : memref<1x64x64xf32, #tpu.memory_space<vmem>>, vector<1x64x1xf32>
    %310 = vector.shape_cast %309 : vector<1x64x1xf32> to vector<64x1xf32>
    %311 = vector.shape_cast %295 : vector<64x1xf32> to vector<1x64x1xf32>
    tpu.vector_store %arg6[%c0_135, %c0_136, %c32], %311 {strides = array<i32>} : memref<1x64x64xf32, #tpu.memory_space<vmem>>, vector<1x64x1xf32>,
    %c0_137 = arith.constant 0 : index
    %c0_138 = arith.constant 0 : index
    %c33 = arith.constant 33 : index
    %312 = vector.load %arg6[%c0_137, %c0_138, %c33] : memref<1x64x64xf32, #tpu.memory_space<vmem>>, vector<1x64x1xf32>
    %313 = vector.shape_cast %312 : vector<1x64x1xf32> to vector<64x1xf32>
    %314 = vector.shape_cast %300 : vector<64x1xf32> to vector<1x64x1xf32>
    tpu.vector_store %arg6[%c0_137, %c0_138, %c33], %314 {strides = array<i32>} : memref<1x64x64xf32, #tpu.memory_space<vmem>>, vector<1x64x1xf32>,
    %c0_139 = arith.constant 0 : index
    %c0_140 = arith.constant 0 : index
    %c34 = arith.constant 34 : index
    %315 = vector.load %arg6[%c0_139, %c0_140, %c34] : memref<1x64x64xf32, #tpu.memory_space<vmem>>, vector<1x64x1xf32>
    %316 = vector.shape_cast %315 : vector<1x64x1xf32> to vector<64x1xf32>
    %317 = vector.shape_cast %303 : vector<64x1xf32> to vector<1x64x1xf32>
    tpu.vector_store %arg6[%c0_139, %c0_140, %c34], %317 {strides = array<i32>} : memref<1x64x64xf32, #tpu.memory_space<vmem>>, vector<1x64x1xf32>,
    %c0_141 = arith.constant 0 : index
    %c0_142 = arith.constant 0 : index
    %c35 = arith.constant 35 : index
    %318 = vector.load %arg6[%c0_141, %c0_142, %c35] : memref<1x64x64xf32, #tpu.memory_space<vmem>>, vector<1x64x1xf32>
    %319 = vector.shape_cast %318 : vector<1x64x1xf32> to vector<64x1xf32>
    %320 = vector.shape_cast %308 : vector<64x1xf32> to vector<1x64x1xf32>
    tpu.vector_store %arg6[%c0_141, %c0_142, %c35], %320 {strides = array<i32>} : memref<1x64x64xf32, #tpu.memory_space<vmem>>, vector<1x64x1xf32>,
    %cst_143 = arith.constant 1.000000e+00 : f32
    %321 = vector.broadcast %cst_143 : f32 to vector<64x1xf32>
    %322 = arith.mulf %18, %321 : vector<64x1xf32>
    %cst_144 = arith.constant 5.000000e-01 : f32
    %323 = vector.broadcast %cst_144 : f32 to vector<64x1xf32>
    %324 = arith.addf %322, %323 : vector<64x1xf32>
    %325 = math.exp %324 : vector<64x1xf32>
    %326 = arith.mulf %232, %325 : vector<64x1xf32>
    %327 = arith.mulf %16, %325 : vector<64x1xf32>
    %328 = arith.mulf %17, %325 : vector<64x1xf32>
    %329 = tpu.concatenate %326, %327, %328, %325, %295, %300, %303, %308 in 1 : vector<64x1xf32>, vector<64x1xf32>, vector<64x1xf32>, vector<64x1xf32>, vector<64x1xf32>, vector<64x1xf32>, vector<64x1xf32>, vector<64x1xf32> -> vector<64x8xf32>
    %cst_145 = arith.constant dense<0.000000e+00> : vector<8x8xf32>
    %330 = tpu.matmul %28, %329, %cst_145 {dimension_numbers = #tpu.dot_dimension_numbers<[1], [0], [0], [1], [0, 0, 1, 1], [], []>} : vector<8x64xf32>, vector<64x8xf32>, vector<8x8xf32> -> vector<8x8xf32>
    %331 = vector.broadcast %326 : vector<64x1xf32> to vector<64x6xf32>
    %332 = arith.mulf %331, %94 : vector<64x6xf32>
    %cst_146 = arith.constant dense<0.000000e+00> : vector<8x6xf32>
    %333 = tpu.matmul %28, %332, %cst_146 {dimension_numbers = #tpu.dot_dimension_numbers<[1], [0], [0], [1], [0, 0, 1, 1], [], []>} : vector<8x64xf32>, vector<64x6xf32>, vector<8x6xf32> -> vector<8x6xf32>
    %334 = vector.broadcast %327 : vector<64x1xf32> to vector<64x6xf32>
    %335 = arith.mulf %334, %94 : vector<64x6xf32>
    %cst_147 = arith.constant dense<0.000000e+00> : vector<8x6xf32>
    %336 = tpu.matmul %28, %335, %cst_147 {dimension_numbers = #tpu.dot_dimension_numbers<[1], [0], [0], [1], [0, 0, 1, 1], [], []>} : vector<8x64xf32>, vector<64x6xf32>, vector<8x6xf32> -> vector<8x6xf32>
    %337 = vector.broadcast %325 : vector<64x1xf32> to vector<64x6xf32>
    %338 = arith.mulf %337, %94 : vector<64x6xf32>
    %cst_148 = arith.constant dense<0.000000e+00> : vector<8x6xf32>
    %339 = tpu.matmul %28, %338, %cst_148 {dimension_numbers = #tpu.dot_dimension_numbers<[1], [0], [0], [1], [0, 0, 1, 1], [], []>} : vector<8x64xf32>, vector<64x6xf32>, vector<8x6xf32> -> vector<8x6xf32>
    %340 = vector.extract_strided_slice %330 {offsets = [0, 3], sizes = [8, 1], strides = [1, 1]} : vector<8x8xf32> to vector<8x1xf32>
    %cst_149 = arith.constant 1.000000e+00 : f32
    %341 = vector.broadcast %cst_149 : f32 to vector<8x1xf32>
    %342 = arith.divf %341, %340 : vector<8x1xf32>
    %343 = vector.extract_strided_slice %330 {offsets = [0, 0], sizes = [8, 3], strides = [1, 1]} : vector<8x8xf32> to vector<8x3xf32>
    %344 = vector.broadcast %342 : vector<8x1xf32> to vector<8x3xf32>
    %345 = arith.mulf %343, %344 : vector<8x3xf32>
    %c0_150 = arith.constant 0 : index
    %c0_151 = arith.constant 0 : index
    %c32_152 = arith.constant 32 : index
    %346 = vector.load %arg7[%c0_150, %c0_151, %c32_152] : memref<1x48x64xf32, #tpu.memory_space<vmem>>, vector<1x8x3xf32>
    %347 = vector.shape_cast %346 : vector<1x8x3xf32> to vector<8x3xf32>
    %348 = vector.shape_cast %345 : vector<8x3xf32> to vector<1x8x3xf32>
    tpu.vector_store %arg7[%c0_150, %c0_151, %c32_152], %348 {strides = array<i32>} : memref<1x48x64xf32, #tpu.memory_space<vmem>>, vector<1x8x3xf32>,
    %349 = vector.extract_strided_slice %336 {offsets = [0, 0], sizes = [8, 3], strides = [1, 1]} : vector<8x6xf32> to vector<8x3xf32>
    %350 = vector.broadcast %342 : vector<8x1xf32> to vector<8x3xf32>
    %351 = arith.mulf %349, %350 : vector<8x3xf32>
    %c0_153 = arith.constant 0 : index
    %c0_154 = arith.constant 0 : index
    %c35_155 = arith.constant 35 : index
    %352 = vector.load %arg7[%c0_153, %c0_154, %c35_155] : memref<1x48x64xf32, #tpu.memory_space<vmem>>, vector<1x8x3xf32>
    %353 = vector.shape_cast %352 : vector<1x8x3xf32> to vector<8x3xf32>
    %354 = vector.shape_cast %351 : vector<8x3xf32> to vector<1x8x3xf32>
    tpu.vector_store %arg7[%c0_153, %c0_154, %c35_155], %354 {strides = array<i32>} : memref<1x48x64xf32, #tpu.memory_space<vmem>>, vector<1x8x3xf32>,
    %355 = vector.extract_strided_slice %333 {offsets = [0, 0], sizes = [8, 3], strides = [1, 1]} : vector<8x6xf32> to vector<8x3xf32>
    %356 = vector.broadcast %342 : vector<8x1xf32> to vector<8x3xf32>
    %357 = arith.mulf %355, %356 : vector<8x3xf32>
    %c0_156 = arith.constant 0 : index
    %c0_157 = arith.constant 0 : index
    %c38 = arith.constant 38 : index
    %358 = vector.load %arg7[%c0_156, %c0_157, %c38] : memref<1x48x64xf32, #tpu.memory_space<vmem>>, vector<1x8x3xf32>
    %359 = vector.shape_cast %358 : vector<1x8x3xf32> to vector<8x3xf32>
    %360 = vector.shape_cast %357 : vector<8x3xf32> to vector<1x8x3xf32>
    tpu.vector_store %arg7[%c0_156, %c0_157, %c38], %360 {strides = array<i32>} : memref<1x48x64xf32, #tpu.memory_space<vmem>>, vector<1x8x3xf32>,
    %361 = vector.extract_strided_slice %336 {offsets = [0, 3], sizes = [8, 3], strides = [1, 1]} : vector<8x6xf32> to vector<8x3xf32>
    %362 = vector.broadcast %342 : vector<8x1xf32> to vector<8x3xf32>
    %363 = arith.mulf %361, %362 : vector<8x3xf32>
    %c0_158 = arith.constant 0 : index
    %c0_159 = arith.constant 0 : index
    %c41_160 = arith.constant 41 : index
    %364 = vector.load %arg7[%c0_158, %c0_159, %c41_160] : memref<1x48x64xf32, #tpu.memory_space<vmem>>, vector<1x8x3xf32>
    %365 = vector.shape_cast %364 : vector<1x8x3xf32> to vector<8x3xf32>
    %366 = vector.shape_cast %363 : vector<8x3xf32> to vector<1x8x3xf32>
    tpu.vector_store %arg7[%c0_158, %c0_159, %c41_160], %366 {strides = array<i32>} : memref<1x48x64xf32, #tpu.memory_space<vmem>>, vector<1x8x3xf32>,
    %367 = vector.extract_strided_slice %333 {offsets = [0, 3], sizes = [8, 3], strides = [1, 1]} : vector<8x6xf32> to vector<8x3xf32>
    %368 = vector.broadcast %342 : vector<8x1xf32> to vector<8x3xf32>
    %369 = arith.mulf %367, %368 : vector<8x3xf32>
    %c0_161 = arith.constant 0 : index
    %c0_162 = arith.constant 0 : index
    %c44 = arith.constant 44 : index
    %370 = vector.load %arg7[%c0_161, %c0_162, %c44] : memref<1x48x64xf32, #tpu.memory_space<vmem>>, vector<1x8x3xf32>
    %371 = vector.shape_cast %370 : vector<1x8x3xf32> to vector<8x3xf32>
    %372 = vector.shape_cast %369 : vector<8x3xf32> to vector<1x8x3xf32>
    tpu.vector_store %arg7[%c0_161, %c0_162, %c44], %372 {strides = array<i32>} : memref<1x48x64xf32, #tpu.memory_space<vmem>>, vector<1x8x3xf32>,
    %373 = vector.extract_strided_slice %339 {offsets = [0, 0], sizes = [8, 3], strides = [1, 1]} : vector<8x6xf32> to vector<8x3xf32>
    %374 = vector.broadcast %342 : vector<8x1xf32> to vector<8x3xf32>
    %375 = arith.mulf %373, %374 : vector<8x3xf32>
    %c0_163 = arith.constant 0 : index
    %c0_164 = arith.constant 0 : index
    %c47 = arith.constant 47 : index
    %376 = vector.load %arg7[%c0_163, %c0_164, %c47] : memref<1x48x64xf32, #tpu.memory_space<vmem>>, vector<1x8x3xf32>
    %377 = vector.shape_cast %376 : vector<1x8x3xf32> to vector<8x3xf32>
    %378 = vector.shape_cast %375 : vector<8x3xf32> to vector<1x8x3xf32>
    tpu.vector_store %arg7[%c0_163, %c0_164, %c47], %378 {strides = array<i32>} : memref<1x48x64xf32, #tpu.memory_space<vmem>>, vector<1x8x3xf32>,
    %379 = vector.extract_strided_slice %339 {offsets = [0, 0], sizes = [8, 3], strides = [1, 1]} : vector<8x6xf32> to vector<8x3xf32>
    %380 = vector.broadcast %342 : vector<8x1xf32> to vector<8x3xf32>
    %381 = arith.mulf %379, %380 : vector<8x3xf32>
    %c0_165 = arith.constant 0 : index
    %c0_166 = arith.constant 0 : index
    %c50 = arith.constant 50 : index
    %382 = vector.load %arg7[%c0_165, %c0_166, %c50] : memref<1x48x64xf32, #tpu.memory_space<vmem>>, vector<1x8x3xf32>
    %383 = vector.shape_cast %382 : vector<1x8x3xf32> to vector<8x3xf32>
    %384 = vector.shape_cast %381 : vector<8x3xf32> to vector<1x8x3xf32>
    tpu.vector_store %arg7[%c0_165, %c0_166, %c50], %384 {strides = array<i32>} : memref<1x48x64xf32, #tpu.memory_space<vmem>>, vector<1x8x3xf32>,
    %c0_167 = arith.constant 0 : index
    %c0_168 = arith.constant 0 : index
    %c53 = arith.constant 53 : index
    %385 = vector.load %arg7[%c0_167, %c0_168, %c53] : memref<1x48x64xf32, #tpu.memory_space<vmem>>, vector<1x8x1xf32>
    %386 = vector.shape_cast %385 : vector<1x8x1xf32> to vector<8x1xf32>
    %387 = vector.shape_cast %340 : vector<8x1xf32> to vector<1x8x1xf32>
    tpu.vector_store %arg7[%c0_167, %c0_168, %c53], %387 {strides = array<i32>} : memref<1x48x64xf32, #tpu.memory_space<vmem>>, vector<1x8x1xf32>,
    %388 = vector.extract_strided_slice %330 {offsets = [0, 4], sizes = [8, 4], strides = [1, 1]} : vector<8x8xf32> to vector<8x4xf32>
    %c0_169 = arith.constant 0 : index
    %c0_170 = arith.constant 0 : index
    %c54 = arith.constant 54 : index
    %389 = vector.load %arg7[%c0_169, %c0_170, %c54] : memref<1x48x64xf32, #tpu.memory_space<vmem>>, vector<1x8x4xf32>
    %390 = vector.shape_cast %389 : vector<1x8x4xf32> to vector<8x4xf32>
    %391 = vector.shape_cast %388 : vector<8x4xf32> to vector<1x8x4xf32>
    tpu.vector_store %arg7[%c0_169, %c0_170, %c54], %391 {strides = array<i32>} : memref<1x48x64xf32, #tpu.memory_space<vmem>>, vector<1x8x4xf32>,
    %c0_171 = arith.constant 0 : index
    %c8_172 = arith.constant 8 : index
    %c32_173 = arith.constant 32 : index
    %392 = vector.load %arg7[%c0_171, %c8_172, %c32_173] : memref<1x48x64xf32, #tpu.memory_space<vmem>>, vector<1x16x1xf32>
    %393 = vector.shape_cast %392 : vector<1x16x1xf32> to vector<16x1xf32>
    %394 = vector.shape_cast %21 : vector<16x1xf32> to vector<1x16x1xf32>
    tpu.vector_store %arg7[%c0_171, %c8_172, %c32_173], %394 {strides = array<i32>} : memref<1x48x64xf32, #tpu.memory_space<vmem>>, vector<1x16x1xf32>,
    %c0_174 = arith.constant 0 : index
    %c8_175 = arith.constant 8 : index
    %c33_176 = arith.constant 33 : index
    %395 = vector.load %arg7[%c0_174, %c8_175, %c33_176] : memref<1x48x64xf32, #tpu.memory_space<vmem>>, vector<1x16x1xf32>
    %396 = vector.shape_cast %395 : vector<1x16x1xf32> to vector<16x1xf32>
    %397 = vector.shape_cast %22 : vector<16x1xf32> to vector<1x16x1xf32>
    tpu.vector_store %arg7[%c0_174, %c8_175, %c33_176], %397 {strides = array<i32>} : memref<1x48x64xf32, #tpu.memory_space<vmem>>, vector<1x16x1xf32>,
    %398 = vector.shape_cast %23 : vector<16x1xf32> to vector<16x1xf32>
    %399 = vector.broadcast %398 : vector<16x1xf32> to vector<16x24xf32>
    %c0_177 = arith.constant 0 : index
    %c8_178 = arith.constant 8 : index
    %c34_179 = arith.constant 34 : index
    %400 = vector.load %arg7[%c0_177, %c8_178, %c34_179] : memref<1x48x64xf32, #tpu.memory_space<vmem>>, vector<1x16x24xf32>
    %401 = vector.shape_cast %400 : vector<1x16x24xf32> to vector<16x24xf32>
    %402 = vector.shape_cast %399 : vector<16x24xf32> to vector<1x16x24xf32>
    tpu.vector_store %arg7[%c0_177, %c8_178, %c34_179], %402 {strides = array<i32>} : memref<1x48x64xf32, #tpu.memory_space<vmem>>, vector<1x16x24xf32>,
    %403 = vector.extract_strided_slice %11 {offsets = [0, 12], sizes = [16, 2], strides = [1, 1]} : vector<16x16xf32> to vector<16x2xf32>
    %cst_180 = arith.constant dense<0.000000e+00> : vector<2xf32>
    %404 = vector.multi_reduction <add>, %403, %cst_180 [0] : vector<16x2xf32> to vector<2xf32>
    %405 = vector.shape_cast %404 : vector<2xf32> to vector<1x2xf32>
    %c0_181 = arith.constant 0 : index
    %c41_182 = arith.constant 41 : index
    %c6_183 = arith.constant 6 : index
    %406 = vector.load %arg7[%c0_181, %c41_182, %c6_183] : memref<1x48x64xf32, #tpu.memory_space<vmem>>, vector<1x1x2xf32>
    %407 = vector.shape_cast %406 : vector<1x1x2xf32> to vector<1x2xf32>
    %408 = vector.shape_cast %405 : vector<1x2xf32> to vector<1x1x2xf32>
    tpu.vector_store %arg7[%c0_181, %c41_182, %c6_183], %408 {strides = array<i32>} : memref<1x48x64xf32, #tpu.memory_space<vmem>>, vector<1x1x2xf32>,
    %409 = vector.extract_strided_slice %330 {offsets = [0, 2], sizes = [8, 1], strides = [1, 1]} : vector<8x8xf32> to vector<8x1xf32>
    %410 = arith.mulf %409, %342 : vector<8x1xf32>
    %411 = vector.extract_strided_slice %330 {offsets = [0, 4], sizes = [8, 1], strides = [1, 1]} : vector<8x8xf32> to vector<8x1xf32>
    %cst_184 = arith.constant 0.000000e+00 : f32
    %412 = vector.broadcast %cst_184 : f32 to vector<8x1xf32>
    %413 = arith.cmpf ogt, %411, %412 : vector<8x1xf32>
    %414 = arith.extui %413 : vector<8x1xi1> to vector<8x1xi32>
    %415 = arith.sitofp %414 : vector<8x1xi32> to vector<8x1xf32>
    %cst_185 = arith.constant 0.000000e+00 : f32
    %416 = vector.broadcast %cst_185 : f32 to vector<8x1xf32>
    %417 = arith.cmpf oeq, %411, %416 : vector<8x1xf32>
    %418 = arith.extui %417 : vector<8x1xi1> to vector<8x1xi32>
    %419 = arith.sitofp %418 : vector<8x1xi32> to vector<8x1xf32>
    %cst_186 = arith.constant 1.000000e+00 : f32
    %420 = vector.broadcast %cst_186 : f32 to vector<8x1xf32>
    %421 = arith.cmpf olt, %410, %420 : vector<8x1xf32>
    %422 = arith.extui %421 : vector<8x1xi1> to vector<8x1xi32>
    %423 = arith.sitofp %422 : vector<8x1xi32> to vector<8x1xf32>
    %cst_187 = arith.constant 1.000000e+00 : f32
    %424 = vector.broadcast %cst_187 : f32 to vector<8x1xf32>
    %425 = arith.cmpf ogt, %410, %424 : vector<8x1xf32>
    %cst_188 = arith.constant 2.000000e+00 : f32
    %426 = vector.broadcast %cst_188 : f32 to vector<8x1xf32>
    %427 = arith.cmpf olt, %410, %426 : vector<8x1xf32>
    %428 = arith.andi %425, %427 : vector<8x1xi1>
    %429 = arith.extui %428 : vector<8x1xi1> to vector<8x1xi32>
    %430 = arith.sitofp %429 : vector<8x1xi32> to vector<8x1xf32>
    %cst_189 = arith.constant 2.000000e+00 : f32
    %431 = vector.broadcast %cst_189 : f32 to vector<8x1xf32>
    %432 = arith.cmpf ogt, %410, %431 : vector<8x1xf32>
    %cst_190 = arith.constant 3.000000e+00 : f32
    %433 = vector.broadcast %cst_190 : f32 to vector<8x1xf32>
    %434 = arith.cmpf olt, %410, %433 : vector<8x1xf32>
    %435 = arith.andi %432, %434 : vector<8x1xi1>
    %436 = arith.extui %435 : vector<8x1xi1> to vector<8x1xi32>
    %437 = arith.sitofp %436 : vector<8x1xi32> to vector<8x1xf32>
    %cst_191 = arith.constant 3.000000e+00 : f32
    %438 = vector.broadcast %cst_191 : f32 to vector<8x1xf32>
    %439 = arith.cmpf ogt, %410, %438 : vector<8x1xf32>
    %cst_192 = arith.constant 4.000000e+00 : f32
    %440 = vector.broadcast %cst_192 : f32 to vector<8x1xf32>
    %441 = arith.cmpf olt, %410, %440 : vector<8x1xf32>
    %442 = arith.andi %439, %441 : vector<8x1xi1>
    %443 = arith.extui %442 : vector<8x1xi1> to vector<8x1xi32>
    %444 = arith.sitofp %443 : vector<8x1xi32> to vector<8x1xf32>
    %cst_193 = arith.constant 4.000000e+00 : f32
    %445 = vector.broadcast %cst_193 : f32 to vector<8x1xf32>
    %446 = arith.cmpf ogt, %410, %445 : vector<8x1xf32>
    %cst_194 = arith.constant 5.000000e+00 : f32
    %447 = vector.broadcast %cst_194 : f32 to vector<8x1xf32>
    %448 = arith.cmpf olt, %410, %447 : vector<8x1xf32>
    %449 = arith.andi %446, %448 : vector<8x1xi1>
    %450 = arith.extui %449 : vector<8x1xi1> to vector<8x1xi32>
    %451 = arith.sitofp %450 : vector<8x1xi32> to vector<8x1xf32>
    %cst_195 = arith.constant 5.000000e+00 : f32
    %452 = vector.broadcast %cst_195 : f32 to vector<8x1xf32>
    %453 = arith.cmpf ogt, %410, %452 : vector<8x1xf32>
    %454 = arith.extui %453 : vector<8x1xi1> to vector<8x1xi32>
    %455 = arith.sitofp %454 : vector<8x1xi32> to vector<8x1xf32>
    %cst_196 = arith.constant 1.000000e+00 : f32
    %456 = vector.broadcast %cst_196 : f32 to vector<8x1xf32>
    %457 = arith.mulf %415, %423 : vector<8x1xf32>
    %458 = arith.mulf %419, %423 : vector<8x1xf32>
    %459 = arith.mulf %415, %430 : vector<8x1xf32>
    %460 = arith.mulf %419, %430 : vector<8x1xf32>
    %461 = arith.mulf %415, %437 : vector<8x1xf32>
    %462 = arith.mulf %419, %437 : vector<8x1xf32>
    %463 = arith.mulf %415, %444 : vector<8x1xf32>
    %464 = arith.mulf %419, %444 : vector<8x1xf32>
    %465 = arith.mulf %415, %451 : vector<8x1xf32>
    %466 = arith.mulf %419, %451 : vector<8x1xf32>
    %467 = arith.mulf %415, %455 : vector<8x1xf32>
    %468 = arith.mulf %419, %455 : vector<8x1xf32>
    %469 = tpu.concatenate %456, %457, %458, %459, %460, %461, %462, %463, %464, %465, %466, %467, %468 in 1 : vector<8x1xf32>, vector<8x1xf32>, vector<8x1xf32>, vector<8x1xf32>, vector<8x1xf32>, vector<8x1xf32>, vector<8x1xf32>, vector<8x1xf32>, vector<8x1xf32>, vector<8x1xf32>, vector<8x1xf32>, vector<8x1xf32>, vector<8x1xf32> -> vector<8x13xf32>
    %cst_197 = arith.constant dense<0.000000e+00> : vector<13xf32>
    %470 = vector.multi_reduction <add>, %469, %cst_197 [0] : vector<8x13xf32> to vector<13xf32>
    %471 = vector.shape_cast %470 : vector<13xf32> to vector<1x13xf32>
    %c0_198 = arith.constant 0 : index
    %c41_199 = arith.constant 41 : index
    %c8_200 = arith.constant 8 : index
    %472 = vector.load %arg7[%c0_198, %c41_199, %c8_200] : memref<1x48x64xf32, #tpu.memory_space<vmem>>, vector<1x1x13xf32>
    %473 = vector.shape_cast %472 : vector<1x1x13xf32> to vector<1x13xf32>
    %474 = vector.shape_cast %471 : vector<1x13xf32> to vector<1x1x13xf32>
    tpu.vector_store %arg7[%c0_198, %c41_199, %c8_200], %474 {strides = array<i32>} : memref<1x48x64xf32, #tpu.memory_space<vmem>>, vector<1x1x13xf32>,
    return
  }
  func.func @transform_0(%arg0: i32) -> (i32, i32, i32) {
    %c0_i32 = arith.constant 0 : i32
    %c0_i32_0 = arith.constant 0 : i32
    %c0_i32_1 = arith.constant 0 : i32
    return %arg0, %c0_i32, %c0_i32_0 : i32, i32, i32
  }
  func.func @transform_1(%arg0: i32) -> (i32, i32, i32) {
    %c0_i32 = arith.constant 0 : i32
    %c0_i32_0 = arith.constant 0 : i32
    %c0_i32_1 = arith.constant 0 : i32
    return %arg0, %c0_i32, %c0_i32_0 : i32, i32, i32
  }
  func.func @transform_2(%arg0: i32) -> (i32, i32, i32) {
    %c0_i32 = arith.constant 0 : i32
    %c0_i32_0 = arith.constant 0 : i32
    %c0_i32_1 = arith.constant 0 : i32
    return %arg0, %c0_i32, %c0_i32_0 : i32, i32, i32
  }
  func.func @transform_3(%arg0: i32) -> (i32, i32) {
    %c0_i32 = arith.constant 0 : i32
    %c0_i32_0 = arith.constant 0 : i32
    %c0_i32_1 = arith.constant 0 : i32
    return %c0_i32, %c0_i32_0 : i32, i32
  }
  func.func @transform_4(%arg0: i32) -> (i32, i32) {
    %c0_i32 = arith.constant 0 : i32
    %c0_i32_0 = arith.constant 0 : i32
    %c0_i32_1 = arith.constant 0 : i32
    return %c0_i32, %c0_i32_0 : i32, i32
  }
  func.func @transform_5(%arg0: i32) -> (i32, i32, i32) {
    %c0_i32 = arith.constant 0 : i32
    %c0_i32_0 = arith.constant 0 : i32
    %c0_i32_1 = arith.constant 0 : i32
    return %arg0, %c0_i32, %c0_i32_0 : i32, i32, i32
  }
  func.func @transform_6(%arg0: i32) -> (i32, i32, i32) {
    %c0_i32 = arith.constant 0 : i32
    %c0_i32_0 = arith.constant 0 : i32
    %c0_i32_1 = arith.constant 0 : i32
    return %arg0, %c0_i32, %c0_i32_0 : i32, i32, i32
  }
}

</mosaic_0001>

<bundles_post_ra>
// kernel: mpnn_forward.1
= control target key start
LH: loop header
LB: loop body
LE: loop exit
PB: predicated region body
PF: predicated region fallthrough
CT: control target
= control target key end

     0   :  { %s6519_s21 = smov 0   ;;  %s8326_s0 = inlined_call_operand.vmem [shape: f32[8,64,32], index: 0, kind: input, shape index: {}]   ;;  %s8327_s1 = inlined_call_operand.vmem [shape: f32[8,16,16], index: 1, kind: input, shape index: {}]   ;;  %s8328_s2 = inlined_call_operand.vmem [shape: f32[8,24,128], index: 2, kind: input, shape index: {}]   ;;  %s8329_s3 = inlined_call_operand.vmem [shape: f32[592,64], index: 3, kind: input, shape index: {}]   ;;  %s8330_s4 = inlined_call_operand.vmem [shape: f32[16,64], index: 4, kind: input, shape index: {}]   ;;  %s8331_s5 = inlined_call_operand.vmem [shape: f32[8,64,64], index: 5, kind: output, shape index: {0}]   ;;  %s8332_s6 = inlined_call_operand.vmem [shape: f32[8,48,64], index: 6, kind: output, shape index: {1}]  }
   0x1 LB: > { %s5081_s22 = sadd.s32 4294967295, %s6447_s21   ;;  %p5085_p0 = scmp.ge.s32.totalorder %s6447_s21, 1  ;;  %s6447_s21 = sphi %s6519_s21, %s17_s21  }
   0x2   : > { %p235_p1 = scmp.lt.s32.totalorder %s6447_s21, 9 }
   0x4   : > { %p236_p2 = pnand %p5085_p0, %p235_p1 }
   0x6   : > { %239 = sbr.rel (%p236_p2) target bundleno = 4997 (0x1385), region = 40 }
   0xd   : > { %v333_v0 = vld [vmem:[%s8329_s3] sm:$0xff]  ;;  %p280_p3 = scmp.lt.s32.totalorder %s5081_s22, 7  ;;  %vm8375_vm0 = vcmask 64512   ;;  %v503_v9 = vld [vmem:[%s8329_s3 + $0x8] sm:$0xff]  ;;  %v504_v10 = vld [vmem:[%s8329_s3 + $0x10] sm:$0xff]  ;;  %vm512_vm1 = vcmask 261120  }
   0xe   : > { %5459 = vmatprep.subr.mxu0 %v333_v0  ;;  %v5883_v11 = vpack.c.bf16 %v504_v10, %v503_v9  ;;  %v505_v12 = vld [vmem:[%s8329_s3 + $0x18] sm:$0xff]  ;;  %v506_v13 = vld [vmem:[%s8329_s3 + $0x20] sm:$0xff]  ;;  %v788_v15 = vld [vmem:[%s8329_s3 + $0x48] sm:$0xff]  ;;  %vm305_vm2 = vcmask 523264   ;;  %s6450_s9 = smov 64   ;;  %vm1210_vm3 = vcmask 130048  }
   0xf   : > { %5460 = vmatpush3.msra.mxu0 %v333_v0  ;;  %s8446_s22 = smov (!%p280_p3, %s5081_s22), 7  ;;  %v5887_v14 = vpack.c.bf16 %v506_v13, %v505_v12  ;;  %v650_v16 = vld [vmem:[%s8329_s3 + $0x28] sm:$0xff]  ;;  %v651_v17 = vld [vmem:[%s8329_s3 + $0x30] sm:$0xff]  ;;  %v5094_v19 = vld [vmem:[%s8330_s4] ss:$0 sm:$0xff]  ;;  %s6451_s14 = smov 48  }
  0x10   : > { %s5232_s25 = sshll.u32 %s8446_s22, 6  ;;  %5884 = vmatprep.subr.bf16.mxu1 %v5883_v11  ;;  %v5891_v18 = vpack.c.bf16 %v651_v17, %v650_v16  ;;  %v5103_v23 = vld [vmem:[%s8330_s4 + $0x1] ss:$0 sm:$0xff]  ;;  %v5104_v29 = vld [vmem:[%s8330_s4 + $0x2] ss:$0 sm:$0xff]  ;;  %s5233_s29 = sshll.u32 %s8446_s22, 4 }
  0x11   : > { %s6538_s28 = scalar_lea.vmem %s8326_s0, %s5232_s25  ;;  %5886 = vmatpush3.bf16.msra.mxu1 %v5883_v11  ;;  %s6619_s8 = scalar_lea.vmem %s8327_s1, %s5233_s29  ;;  %v652_v0 = vld [vmem:[%s8329_s3 + $0x38] sm:$0xff]  ;;  %v653_v9 = vld [vmem:[%s8329_s3 + $0x40] sm:$0xff]  ;;  %v891_v11 = vld [vmem:[%s8329_s3 + $0x50] sm:$0xff]  ;;  %vm6453_vm4 = vmmov 0  }
  0x12   : > { %v6541_v1 = vld [vmem:[%s6538_s28] sm:$0xff]  ;;  %v6544_v2 = vld [vmem:[%s6538_s28 + $0x8] sm:$0xff]  ;;  %v6547_v3 = vld [vmem:[%s6538_s28 + $0x10] sm:$0xff]  ;;  %5888 = vmatprep.subr.bf16.mxu1 %v5887_v14  ;;  %5892 = vmatprep.subr.bf16.mxu0 %v5891_v18  ;;  %v5895_v10 = vpack.c.bf16 %v653_v9, %v652_v0  ;;  %s6169_s10 = smul.u32 48, %s8446_s22  ;;  %s6674_s13 = scalar_lea.vmem %s8331_s5, %s5232_s25 }
  0x13   : > { %5461 = vmatprep.mubr.msk.f32.mxu0 %vm8375_vm0, %v6541_v1  ;;  %v6556_v4 = vld [vmem:[%s6538_s28 + $0x18] sm:$0xff]  ;;  %v6559_v5 = vld [vmem:[%s6538_s28 + $0x20] sm:$0xff]  ;;  %v6566_v6 = vld [vmem:[%s6538_s28 + $0x28] sm:$0xff]  ;;  %s6168_s27 = smul.u32 24, %s8446_s22  ;;  %s6455_s15 = smov 127  }
  0x14   : > { %5462 = vmatmul.mubr.msk.f32.vlgmr.msra.gmra.mrb[0].mxu0 %vm8375_vm0, %v6544_v2  ;;  %v6569_v7 = vld [vmem:[%s6538_s28 + $0x30] sm:$0xff]  ;;  %v6576_v8 = vld [vmem:[%s6538_s28 + $0x38] sm:$0xff]  ;;  %v328_v62 = vld [vmem:[%s6619_s8] sm:$0xff]  ;;  %s6679_s16 = scalar_lea.vmem %s8332_s6, %s6169_s10  ;;  %s6458_s10 = smov 126  }
  0x15   : > { %5464 = vmatprep.mubr.msk.f32.mxu0 %vm8375_vm0, %v6547_v3  ;;  %5890 = vmatpush3.bf16.msra.mxu1 %v5887_v14  ;;  %v329_v63 = vld [vmem:[%s6619_s8 + $0x8] sm:$0xff]  ;;  %v892_v12 = vld [vmem:[%s8329_s3 + $0x58] sm:$0xff]  ;;  %v893_v14 = vld [vmem:[%s8329_s3 + $0x60] sm:$0xff]  ;;  %s6739_s7 = scalar_lea.vmem %s8328_s2, %s6168_s27  ;;  %s6461_s11 = smov 112  }
  0x16   : > { %5513 = vmatprep.subr.mxu1 %v788_v15  ;;  %5894 = vmatpush3.bf16.msra.mxu0 %v5891_v18  ;;  %v5899_v13 = vpack.c.bf16 %v892_v12, %v891_v11  ;;  %v5105_v17 = vld [vmem:[%s8330_s4 + $0x3] ss:$0 sm:$0xff]  ;;  %v5114_v0 = vld [vmem:[%s8330_s4 + $0x4] ss:$0 sm:$0xff]  ;;  %s6462_s25 = smov 125   ;;  %s6463_s19 = smov 120  }
  0x17   : > { %5896 = vmatprep.subr.bf16.mxu0 %v5895_v10  ;;  %s6466_s24 = smov 1   ;;  %s6467_s26 = smov 3  }
  0x18   : > { %5465 = vmatmul.mubr.msk.f32.gmra.mrb[2].mxu0 %vm8375_vm0, %v6556_v4  ;;  %s6471_s27 = smov 5   ;;  %s6472_s29 = smov 7  }
  0x19   : > { %5467 = vmatprep.mubr.msk.f32.mxu0 %vm8375_vm0, %v6559_v5  ;;  %s6473_s30 = smov 32   ;;  %s6475_s22 = smov 106  }
  0x1a   : > { %5898 = vmatpush3.bf16.msra.mxu0 %v5895_v10  ;;  %s6480_s12 = smov 47   ;;  %s6481_s17 = smov 24  }
  0x1b   : > { %s6482_s18 = smov 50  }
  0x1c   : > { %5468 = vmatmul.mubr.msk.f32.gmra.mrb[4].mxu0 %vm8375_vm0, %v6566_v6 }
  0x1d   : > { %5470 = vmatprep.mubr.msk.f32.mxu0 %vm8375_vm0, %v6569_v7 }
  0x20   : > { %5471 = vmatmul.mubr.msk.f32.gmra.mrb[6].mxu0 %vm8375_vm0, %v6576_v8 }
  0xe7   : > { %v5463_v20 = vpop.f32.mrb[0].mxu0 }
  0xe8   : > { %v436_v21 = vadd.f32 %v5463_v20, %v5094_v19  ;;  %v430_v22 = vpop.f32.mrb[1].mxu0 }
  0xe9   : > { %v431_v24 = vadd.f32 %v5094_v19, %v430_v22 }
  0xea   : > { %v470_v25 = vmax.f32 %v436_v21, 0.0 }
  0xeb   : > { %v469_v26 = vmax.f32 %v431_v24, 0.0  ;;  %v5466_v27 = vpop.f32.mrb[2].mxu0 }
  0xec   : > { %v483_v28 = vmul.f32 %v5103_v23, %v470_v25  ;;  %v446_v30 = vadd.f32 %v5466_v27, %v5094_v19  ;;  %v440_v31 = vpop.f32.mrb[3].mxu0 }
  0xed   : > { %v482_v32 = vmul.f32 %v5103_v23, %v469_v26  ;;  %v441_v33 = vadd.f32 %v5094_v19, %v440_v31 }
  0xee   : > { %v472_v34 = vmax.f32 %v446_v30, 0.0  ;;  %v496_v38 = vadd.f32 %v5104_v29, %v483_v28 }
  0xef   : > { %v471_v35 = vmax.f32 %v441_v33, 0.0  ;;  %v5469_v36 = vpop.f32.mrb[4].mxu0  ;;  %v495_v37 = vadd.f32 %v5104_v29, %v482_v32 }
  0xf0   : > { %v485_v39 = vmul.f32 %v5103_v23, %v472_v34  ;;  %v456_v40 = vadd.f32 %v5469_v36, %v5094_v19  ;;  %v450_v41 = vpop.f32.mrb[5].mxu0 }
  0xf1   : > { %v484_v42 = vmul.f32 %v5103_v23, %v471_v35  ;;  %v451_v43 = vadd.f32 %v5094_v19, %v450_v41  ;;  %5481 = vmatprep.mubr.msk.f32.mxu1 %vm512_vm1, %v495_v37 }
  0xf2   : > { %v474_v44 = vmax.f32 %v456_v40, 0.0  ;;  %5482 = vmatmul.mubr.msk.f32.vlgmr.msra.gmra.mrb[0].mxu1 %vm512_vm1, %v496_v38  ;;  %v498_v48 = vadd.f32 %v5104_v29, %v485_v39  ;;  %v5123_v40 = vld [vmem:[%s8330_s4 + $0x5] ss:$0 sm:$0xff] }
  0xf3   : > { %v497_v45 = vadd.f32 %v5104_v29, %v484_v42  ;;  %v473_v46 = vmax.f32 %v451_v43, 0.0  ;;  %v5472_v47 = vpop.f32.mrb[6].mxu0  ;;  %5514 = vmatpush3.msra.mxu1 %v788_v15  ;;  %v894_v15 = vld [vmem:[%s8329_s3 + $0x68] sm:$0xff] }
  0xf4   : > { %v487_v49 = vmul.f32 %v5103_v23, %v474_v44  ;;  %v466_v50 = vadd.f32 %v5472_v47, %v5094_v19  ;;  %v460_v51 = vpop.f32.mrb[7].mxu0  ;;  %5900 = vmatprep.subr.bf16.mxu1 %v5899_v13  ;;  %v5903_v16 = vpack.c.bf16 %v894_v15, %v893_v14 }
  0xf5   : > { %v486_v52 = vmul.f32 %v5103_v23, %v473_v46  ;;  %v461_v53 = vadd.f32 %v5094_v19, %v460_v51  ;;  %5484 = vmatprep.mubr.msk.f32.mxu1 %vm512_vm1, %v497_v45  ;;  %v5126_v46 = vld [vmem:[%s8330_s4 + $0x6] ss:$0 sm:$0xff]  ;;  %v5127_v51 = vld [vmem:[%s8330_s4 + $0x7] ss:$0 sm:$0xff] }
  0xf6   : > { %v476_v54 = vmax.f32 %v466_v50, 0.0  ;;  %5485 = vmatmul.mubr.msk.f32.gmra.mrb[2].mxu1 %vm512_vm1, %v498_v48  ;;  %v500_v57 = vadd.f32 %v5104_v29, %v487_v49 }
  0xf7   : > { %v499_v55 = vadd.f32 %v5104_v29, %v486_v52  ;;  %v475_v56 = vmax.f32 %v461_v53, 0.0 }
  0xf8   : > { %v489_v58 = vmul.f32 %v5103_v23, %v476_v54 }
  0xf9   : > { %v488_v59 = vmul.f32 %v5103_v23, %v475_v56  ;;  %5487 = vmatprep.mubr.msk.f32.mxu1 %vm512_vm1, %v499_v55  ;;  %v8338_v55 = vmov 0.0   ;;  %v983_v56 = vld [vmem:[%s8329_s3 + $0x70] sm:$0xff] }
  0xfa   : > { %5488 = vmatmul.mubr.msk.f32.gmra.mrb[4].mxu1 %vm512_vm1, %v500_v57  ;;  %v502_v61 = vadd.f32 %v5104_v29, %v489_v58  ;;  %306 = vst.msk [vmem:[%s6674_s13] sm:$0xff] %vm305_vm2, %v8338_v55  ;;  %307 = vst.msk [vmem:[%s6674_s13 + $0x8] sm:$0xff] %vm305_vm2, %v8338_v55  ;;  %v984_v57 = vld [vmem:[%s8329_s3 + $0x78] sm:$0xff] }
  0xfb   : > { %v501_v60 = vadd.f32 %v5104_v29, %v488_v59  ;;  %308 = vst.msk [vmem:[%s6674_s13 + $0x10] sm:$0xff] %vm305_vm2, %v8338_v55  ;;  %309 = vst.msk [vmem:[%s6674_s13 + $0x18] sm:$0xff] %vm305_vm2, %v8338_v55  ;;  %v5907_v58 = vpack.c.bf16 %v984_v57, %v983_v56  ;;  %v985_v59 = vld [vmem:[%s8329_s3 + $0x80] sm:$0xff] }
  0xfc   : > { %310 = vst.msk [vmem:[%s6674_s13 + $0x20] sm:$0xff] %vm305_vm2, %v8338_v55  ;;  %311 = vst.msk [vmem:[%s6674_s13 + $0x28] sm:$0xff] %vm305_vm2, %v8338_v55 }
  0xfd   : > { %5490 = vmatprep.mubr.msk.f32.mxu1 %vm512_vm1, %v501_v60  ;;  %312 = vst.msk [vmem:[%s6674_s13 + $0x30] sm:$0xff] %vm305_vm2, %v8338_v55  ;;  %313 = vst.msk [vmem:[%s6674_s13 + $0x38] sm:$0xff] %vm305_vm2, %v8338_v55  ;;  %5908 = vmatprep.subr.bf16.mxu0 %v5907_v58  ;;  %v986_v60 = vld [vmem:[%s8329_s3 + $0x88] sm:$0xff] }
  0xfe   : > { %5491 = vmatmul.mubr.msk.f32.gmra.mrb[6].mxu1 %vm512_vm1, %v502_v61  ;;  %314 = vst.msk [vmem:[%s6679_s16] sm:$0xff] %vm305_vm2, %v8338_v55  ;;  %315 = vst.msk [vmem:[%s6679_s16 + $0x8] sm:$0xff] %vm305_vm2, %v8338_v55  ;;  %v5911_v61 = vpack.c.bf16 %v986_v60, %v985_v59 }
  0xff   : > { %5515 = vmatprep.mubr.msk.f32.mxu1 %vm8375_vm0, %v328_v62  ;;  %316 = vst.msk [vmem:[%s6679_s16 + $0x10] sm:$0xff] %vm305_vm2, %v8338_v55  ;;  %317 = vst.msk [vmem:[%s6679_s16 + $0x18] sm:$0xff] %vm305_vm2, %v8338_v55  ;;  %v6742_v62 = vld [vmem:[%s6739_s7] sm:$0xff] }
 0x100   : > { %318 = vst.msk [vmem:[%s6679_s16 + $0x20] sm:$0xff] %vm305_vm2, %v8338_v55  ;;  %319 = vst.msk [vmem:[%s6679_s16 + $0x28] sm:$0xff] %vm305_vm2, %v8338_v55  ;;  %1206 = vrot.lane.b32.xlu0 %v6742_v62, %s6450_s9  ;;  %1409 = vrot.lane.b32.xlu1 %v6742_v62, %s6451_s14 }
 0x102   : > { %5516 = vmatmul.mubr.msk.f32.vlgmr.msra.gmra.mrb[8].mxu1 %vm8375_vm0, %v329_v63  ;;  %v6747_v63 = vld [vmem:[%s6739_s7 + $0x8] sm:$0xff] }
 0x103   : > { %5902 = vmatpush3.bf16.msra.mxu1 %v5899_v13 }
 0x104   : > { %5904 = vmatprep.subr.bf16.mxu1 %v5903_v16  ;;  %1208 = vrot.lane.b32.xlu0 %v6747_v63, %s6450_s9 }
 0x105   : > { %1411 = vrot.lane.b32.xlu1 %v6747_v63, %s6451_s14 }
 0x107   : > { %5906 = vmatpush3.bf16.msra.mxu1 %v5903_v16 }
 0x1c5   : > { %v5483_v18 = vpop.f32.mrb[0].mxu1 }
 0x1c6   : > { %v609_v19 = vadd.f32 %v5483_v18, %v5105_v17  ;;  %v603_v20 = vpop.f32.mrb[1].mxu1 }
 0x1c7   : > { %v604_v21 = vadd.f32 %v5105_v17, %v603_v20 }
 0x1c8   : > { %v643_v24 = vmax.f32 %v609_v19, 0.0 }
 0x1c9   : > { %v642_v22 = vmax.f32 %v604_v21, 0.0  ;;  %v5486_v23 = vpop.f32.mrb[2].mxu1 }
 0x1ca   : > { %v619_v25 = vadd.f32 %v5486_v23, %v5105_v17  ;;  %v613_v26 = vpop.f32.mrb[3].mxu1 }
 0x1cb   : > { %v614_v27 = vadd.f32 %v5105_v17, %v613_v26  ;;  %5501 = vmatprep.mubr.msk.f32.mxu0 %vm512_vm1, %v642_v22 }
 0x1cc   : > { %5502 = vmatmul.mubr.msk.f32.vlgmr.msra.gmra.mrb[8].mxu0 %vm512_vm1, %v643_v24  ;;  %v645_v30 = vmax.f32 %v619_v25, 0.0 }
 0x1cd   : > { %v644_v28 = vmax.f32 %v614_v27, 0.0  ;;  %v5489_v29 = vpop.f32.mrb[4].mxu1  ;;  %5910 = vmatpush3.bf16.msra.mxu0 %v5907_v58 }
 0x1ce   : > { %v629_v31 = vadd.f32 %v5489_v29, %v5105_v17  ;;  %v623_v32 = vpop.f32.mrb[5].mxu1  ;;  %5912 = vmatprep.subr.bf16.mxu0 %v5911_v61  ;;  %v5128_v29 = vld [vmem:[%s8330_s4 + $0x8] ss:$0 sm:$0xff] }
 0x1cf   : > { %v624_v33 = vadd.f32 %v5105_v17, %v623_v32  ;;  %5504 = vmatprep.mubr.msk.f32.mxu0 %vm512_vm1, %v644_v28 }
 0x1d0   : > { %5505 = vmatmul.mubr.msk.f32.gmra.mrb[10].mxu0 %vm512_vm1, %v645_v30  ;;  %v647_v36 = vmax.f32 %v629_v31, 0.0 }
 0x1d1   : > { %v646_v34 = vmax.f32 %v624_v33, 0.0  ;;  %v5492_v35 = vpop.f32.mrb[6].mxu1  ;;  %5914 = vmatpush3.bf16.msra.mxu0 %v5911_v61 }
 0x1d2   : > { %v639_v37 = vadd.f32 %v5492_v35, %v5105_v17  ;;  %v633_v38 = vpop.f32.mrb[7].mxu1 }
 0x1d3   : > { %v634_v39 = vadd.f32 %v5105_v17, %v633_v38  ;;  %5507 = vmatprep.mubr.msk.f32.mxu0 %vm512_vm1, %v646_v34 }
 0x1d4   : > { %5508 = vmatmul.mubr.msk.f32.gmra.mrb[12].mxu0 %vm512_vm1, %v647_v36  ;;  %v649_v43 = vmax.f32 %v639_v37, 0.0  ;;  %v1207_v36 = vpop.permute.xlu0 %1206  ;;  %v5131_v37 = vld [vmem:[%s8330_s4 + $0x9] ss:$0 sm:$0xff] }
 0x1d5   : > { %v648_v41 = vmax.f32 %v634_v39, 0.0  ;;  %v5517_v42 = vpop.f32.mrb[8].mxu1 }
 0x1d6   : > { %v872_v44 = vadd.f32 %v5517_v42, %v5123_v40  ;;  %v866_v45 = vpop.f32.mrb[9].mxu1 }
 0x1d7   : > { %v867_v47 = vadd.f32 %v5123_v40, %v866_v45  ;;  %5510 = vmatprep.mubr.msk.f32.mxu0 %vm512_vm1, %v648_v41  ;;  %v1386_v45 = vld [vmem:[%s8329_s3 + $0xd0] sm:$0xff] }
 0x1d8   : > { %v876_v48 = vmax.f32 %v872_v44, 0.0  ;;  %5511 = vmatmul.mubr.msk.f32.gmra.mrb[14].mxu0 %vm512_vm1, %v649_v43  ;;  %v1209_v43 = vpop.permute.xlu0 %1208  ;;  %v6792_v44 = vpop.permute.xlu1 %1409 }
 0x1d9   : > { %v875_v49 = vmax.f32 %v867_v47, 0.0 }
 0x1da   : > { %v883_v50 = vmul.f32 %v5126_v46, %v876_v48  ;;  %v8336_v48 = vmov 0.0|0.0  }
 0x1db   : > { %v882_v52 = vmul.f32 %v5126_v46, %v875_v49  ;;  %v1387_v46 = vld [vmem:[%s8329_s3 + $0xd8] sm:$0xff]  ;;  %v1388_v49 = vld [vmem:[%s8329_s3 + $0xe0] sm:$0xff] }
 0x1dc   : > { %v890_v54 = vadd.f32 %v5127_v51, %v883_v50  ;;  %v6802_v47 = vpack.c.bf16 %v1387_v46, %v1386_v45  ;;  %v1389_v50 = vld [vmem:[%s8329_s3 + $0xe8] sm:$0xff]  ;;  %v1402_v45 = vld [vmem:[%s8329_s3 + $0x150] sm:$0xff]  ;;  %v1403_v46 = vld [vmem:[%s8329_s3 + $0x158] sm:$0xff] }
 0x1dd   : > { %v889_v53 = vadd.f32 %v5127_v51, %v882_v52  ;;  %v6813_v51 = vpack.c.bf16 %v1389_v50, %v1388_v49  ;;  %v1382_v52 = vld [vmem:[%s8329_s3 + $0xb0] sm:$0xff]  ;;  %v6934_v49 = vpack.c.bf16 %v1403_v46, %v1402_v45  ;;  %v1081_v50 = vlaneseq }
 0x1df   : > { %5526 = vmatprep.mubr.msk.f32.mxu1 %vm512_vm1, %v889_v53  ;;  %v1383_v53 = vld [vmem:[%s8329_s3 + $0xb8] sm:$0xff] }
 0x1e0   : > { %5527 = vmatmul.mubr.msk.f32.vlgmr.msra.gmra.mrb[10].mxu1 %vm512_vm1, %v890_v54  ;;  %v6826_v60 = vpack.c.bf16 %v1383_v53, %v1382_v52  ;;  %v6940_v52 = vshrl.u32 %v1081_v50, 7 }
 0x1e1   : > { %5544 = vmatprep.mubr.msk.f32.mxu1 %vm1210_vm3, %v1207_v36  ;;  %v1397_v36 = vld [vmem:[%s8329_s3 + $0x128] sm:$0xff] }
 0x1e2   : > { %v6943_v53 = vsub.s32 0, %v6940_v52 }
 0x29f   : > { %v5503_v9 = vpop.f32.mrb[8].mxu0 }
 0x2a0   : > { %v755_v10 = vadd.f32 %v5503_v9, %v5114_v0  ;;  %v749_v11 = vpop.f32.mrb[9].mxu0  ;;  %v6834_v9 = vpop.permute.xlu1 %1411 }
 0x2a1   : > { %v750_v12 = vadd.f32 %v5114_v0, %v749_v11 }
 0x2a2   : > { %1074 = vst.msk [vmem:[%s6674_s13 + $0x8] sm:$0xff] %vm512_vm1, %v755_v10 }
 0x2a3   : > { %v5919_v13 = vpack.c.bf16 %v755_v10, %v750_v12  ;;  %v5506_v14 = vpop.f32.mrb[10].mxu0  ;;  %1073 = vst.msk [vmem:[%s6674_s13] sm:$0xff] %vm512_vm1, %v750_v12  ;;  %v1378_v12 = vld [vmem:[%s8329_s3 + $0x90] sm:$0xff] }
 0x2a4   : > { %v765_v15 = vadd.f32 %v5506_v14, %v5114_v0  ;;  %v759_v16 = vpop.f32.mrb[11].mxu0 }
 0x2a5   : > { %v760_v17 = vadd.f32 %v5114_v0, %v759_v16 }
 0x2a6   : > { %1076 = vst.msk [vmem:[%s6674_s13 + $0x18] sm:$0xff] %vm512_vm1, %v765_v15 }
 0x2a7   : > { %v5923_v18 = vpack.c.bf16 %v765_v15, %v760_v17  ;;  %v5509_v19 = vpop.f32.mrb[12].mxu0  ;;  %1075 = vst.msk [vmem:[%s6674_s13 + $0x10] sm:$0xff] %vm512_vm1, %v760_v17  ;;  %v1380_v17 = vld [vmem:[%s8329_s3 + $0xa0] sm:$0xff] }
 0x2a8   : > { %v775_v20 = vadd.f32 %v5509_v19, %v5114_v0  ;;  %v769_v21 = vpop.f32.mrb[13].mxu0 }
 0x2a9   : > { %v770_v22 = vadd.f32 %v5114_v0, %v769_v21 }
 0x2aa   : > { %1078 = vst.msk [vmem:[%s6674_s13 + $0x28] sm:$0xff] %vm512_vm1, %v775_v20 }
 0x2ab   : > { %v5927_v23 = vpack.c.bf16 %v775_v20, %v770_v22  ;;  %v5512_v24 = vpop.f32.mrb[14].mxu0  ;;  %1077 = vst.msk [vmem:[%s6674_s13 + $0x20] sm:$0xff] %vm512_vm1, %v770_v22  ;;  %v1390_v22 = vld [vmem:[%s8329_s3 + $0xf0] sm:$0xff] }
 0x2ac   : > { %v785_v25 = vadd.f32 %v5512_v24, %v5114_v0  ;;  %v779_v26 = vpop.f32.mrb[15].mxu0 }
 0x2ad   : > { %v780_v27 = vadd.f32 %v5114_v0, %v779_v26  ;;  %v1393_v26 = vld [vmem:[%s8329_s3 + $0x108] sm:$0xff] }
 0x2ae   : > { %1080 = vst.msk [vmem:[%s6674_s13 + $0x38] sm:$0xff] %vm512_vm1, %v785_v25 }
 0x2af   : > { %v5931_v28 = vpack.c.bf16 %v785_v25, %v780_v27  ;;  %1079 = vst.msk [vmem:[%s6674_s13 + $0x30] sm:$0xff] %vm512_vm1, %v780_v27  ;;  %v1392_v25 = vld [vmem:[%s8329_s3 + $0x100] sm:$0xff] }
 0x2b3   : > { %v5528_v30 = vpop.f32.mrb[10].mxu1 }
 0x2b4   : > { %v978_v31 = vadd.f32 %v5528_v30, %v5128_v29  ;;  %v972_v32 = vpop.f32.mrb[11].mxu1 }
 0x2b5   : > { %v973_v33 = vadd.f32 %v5128_v29, %v972_v32  ;;  %v6882_v29 = vpack.c.bf16 %v1393_v26, %v1392_v25  ;;  %v1394_v32 = vld [vmem:[%s8329_s3 + $0x110] sm:$0xff]  ;;  %v6986_v25 = vld [vmem:[%s8330_s4 + $0xc] ss:$0 sm:$0xff] }
 0x2b6   : > { %v982_v35 = vmax.f32 %v978_v31, 0.0 }
 0x2b7   : > { %v981_v34 = vmax.f32 %v973_v33, 0.0  ;;  %v1395_v33 = vld [vmem:[%s8329_s3 + $0x118] sm:$0xff] }
 0x2b9   : > { %5537 = vmatprep.mubr.msk.f32.mxu0 %vm512_vm1, %v981_v34  ;;  %v6895_v34 = vpack.c.bf16 %v1395_v33, %v1394_v32 }
 0x2ba   : > { %5538 = vmatmul.mubr.msk.f32.vlgmr.msra.gmra.mrb[16].mxu0 %vm512_vm1, %v982_v35  ;;  %v1396_v35 = vld [vmem:[%s8329_s3 + $0x120] sm:$0xff] }
 0x2bb   : > { %5570 = vmatprep.mubr.msk.f32.mxu0 %vm1210_vm3, %v6792_v44 }
 0x38d   : > { %v5539_v38 = vpop.f32.mrb[16].mxu0 }
 0x38e   : > { %v1070_v39 = vadd.f32 %v5539_v38, %v5131_v37  ;;  %v1064_v40 = vpop.f32.mrb[17].mxu0  ;;  %v1398_v38 = vld [vmem:[%s8329_s3 + $0x130] sm:$0xff] }
 0x38f   : > { %v1065_v41 = vadd.f32 %v5131_v37, %v1064_v40  ;;  %v6905_v37 = vpack.c.bf16 %v1397_v36, %v1396_v35  ;;  %v1400_v40 = vld [vmem:[%s8329_s3 + $0x140] sm:$0xff] }
 0x390   : > { %3074 = vst.msk [vmem:[%s6679_s16 + $0x10] sm:$0xff] %vm512_vm1, %v1070_v39 }
 0x391   : > { %v5915_v42 = vpack.c.bf16 %v1070_v39, %v1065_v41  ;;  %3073 = vst.msk [vmem:[%s6679_s16 + $0x8] sm:$0xff] %vm512_vm1, %v1065_v41  ;;  %v1399_v39 = vld [vmem:[%s8329_s3 + $0x138] sm:$0xff] }
 0x392   : > { %v6918_v41 = vpack.c.bf16 %v1399_v39, %v1398_v38 }
 0x393   : > { %5916 = vmatprep.subr.bf16.mxu1 %v5915_v42 }
 0x394   : > { %5918 = vmatpush3.bf16.msra.mxu1 %v5915_v42  ;;  %v1401_v42 = vld [vmem:[%s8329_s3 + $0x148] sm:$0xff] }
 0x395   : > { %5920 = vmatprep.subr.bf16.mxu1 %v5919_v13 }
 0x397   : > { %5545 = vmatmul.mubr.msk.f32.vlgmr.msra.gmra.mrb[12].mxu1 %vm1210_vm3, %v1209_v43  ;;  %v6923_v43 = vpack.c.bf16 %v1401_v42, %v1400_v40 }
 0x398   : > { %5922 = vmatpush3.bf16.msra.mxu1 %v5919_v13  ;;  %5563 = vmatprep.mubr.msk.f32.mxu1 %vm305_vm2, %v6742_v62  ;;  %v1384_v62 = vld [vmem:[%s8329_s3 + $0xc0] sm:$0xff]  ;;  %v1379_v13 = vld [vmem:[%s8329_s3 + $0x98] sm:$0xff] }
 0x399   : > { %5924 = vmatprep.subr.bf16.mxu1 %v5923_v18  ;;  %v6850_v15 = vpack.c.bf16 %v1379_v13, %v1378_v12  ;;  %v1404_v12 = vld [vmem:[%s8329_s3 + $0x160] sm:$0xff]  ;;  %v1405_v13 = vld [vmem:[%s8329_s3 + $0x168] sm:$0xff] }
 0x39c   : > { %5926 = vmatpush3.bf16.msra.mxu1 %v5923_v18  ;;  %v1381_v18 = vld [vmem:[%s8329_s3 + $0xa8] sm:$0xff] }
 0x39d   : > { %5928 = vmatprep.subr.bf16.mxu1 %v5927_v23  ;;  %v6860_v20 = vpack.c.bf16 %v1381_v18, %v1380_v17 }
 0x3a0   : > { %5930 = vmatpush3.bf16.msra.mxu1 %v5927_v23  ;;  %v1391_v23 = vld [vmem:[%s8329_s3 + $0xf8] sm:$0xff] }
 0x3a1   : > { %5932 = vmatprep.subr.bf16.mxu1 %v5931_v28  ;;  %v6873_v24 = vpack.c.bf16 %v1391_v23, %v1390_v22 }
 0x3a4   : > { %5934 = vmatpush3.bf16.msra.mxu1 %v5931_v28 }
 0x3a5   : > { %5955 = vmatprep.subr.bf16.mxu1 %v8336_v48 }
 0x3a7   : > { %5564 = vmatmul.mubr.msk.f32.vlgmr.msra.gmra.mrb[12].mxu1 %vm305_vm2, %v6747_v63  ;;  %v1385_v63 = vld [vmem:[%s8329_s3 + $0xc8] sm:$0xff] }
 0x3a8   : > { %5957 = vmatpush3.bf16.msra.mxu1 %v6802_v47  ;;  %5603 = vmatprep.mubr.msk.f32.mxu1 %vm6453_vm4, %v8338_v55  ;;  %v6837_v10 = vpack.c.bf16 %v1385_v63, %v1384_v62 }
 0x3a9   : > { %5958 = vmatprep.subr.bf16.mxu1 %v8336_v48 }
 0x3ac   : > { %5960 = vmatpush3.bf16.msra.mxu1 %v6813_v51 }
 0x3ad   : > { %5978 = vmatprep.subr.bf16.mxu1 %v6918_v41 }
 0x47a   : > { %v5565_v54 = vpop.f32.mrb[12].mxu1 }
 0x47b   : > { %v1370_v56 = vsel %vm512_vm1, %v5565_v54, 0.0  ;;  %v1360_v57 = vpop.f32.mrb[13].mxu1 }
 0x47c   : > { %v1369_v58 = vsel %vm512_vm1, %v1360_v57, 0.0  ;;  %v5935_v59 = vpack.c.bf16 %v5565_v54, %v1360_v57 }
 0x47d   : > { %v1371_v61 = vadd.f32 %v1370_v56, %v1369_v58  ;;  %v6949_v56 = vld [vmem:[%s8330_s4 + $0xa] ss:$0 sm:$0xff] }
 0x47e   : > { %5936 = vmatprep.subr.bf16.mxu0 %v5935_v59 }
 0x47f   : > { %v1372_v0 = vrot.slane %v1371_v61, 4  ;;  %5938 = vmatpush3.bf16.msra.mxu0 %v5935_v59 }
 0x480   : > { %5940 = vmatprep.subr.bf16.mxu0 %v6826_v60 }
 0x481   : > { %v1373_v11 = vadd.f32 %v1372_v0, %v1371_v61 }
 0x482   : > { %5571 = vmatmul.mubr.msk.f32.vlgmr.msra.gmra.mrb[18].mxu0 %vm1210_vm3, %v6834_v9 }
 0x483   : > { %v1374_v14 = vrot.slane %v1373_v11, 2  ;;  %5942 = vmatpush3.bf16.msra.mxu0 %v6826_v60  ;;  %5581 = vmatprep.mubr.msk.f32.mxu0 %vm512_vm1, %v1360_v57 }
 0x484   : > { %5944 = vmatprep.subr.bf16.mxu0 %v6837_v10 }
 0x485   : > { %v1375_v16 = vadd.f32 %v1374_v14, %v1373_v11  ;;  %v6963_v14 = vpack.c.bf16 %v1405_v13, %v1404_v12 }
 0x487   : > { %v1376_v19 = vrot.slane %v1375_v16, 1  ;;  %5946 = vmatpush3.bf16.msra.mxu0 %v6837_v10 }
 0x488   : > { %5948 = vmatprep.subr.bf16.mxu0 %v6850_v15 }
 0x489   : > { %v1377_v21 = vadd.f32 %v1376_v19, %v1375_v16  ;;  %v6971_v16 = vld [vmem:[%s8330_s4 + $0xb] ss:$0 sm:$0xff] }
 0x48a   : > { %5582 = vmatmul.mubr.msk.f32.vlgmr.msra.gmra.mrb[20].mxu0 %vm512_vm1, %v5565_v54 }
 0x48b   : > { %5604 = vmatmul.mubr.msk.f32.vlgmr.msra.gmra.mrb[14].mxu1 %vm512_vm1, %v1377_v21  ;;  %5950 = vmatpush3.bf16.msra.mxu0 %v6850_v15 }
 0x48c   : > { %5952 = vmatprep.subr.bf16.mxu0 %v6860_v20  ;;  %5980 = vmatpush3.bf16.msra.mxu1 %v6918_v41 }
 0x48d   : > { %5982 = vmatprep.subr.bf16.mxu1 %v6923_v43 }
 0x48f   : > { %5954 = vmatpush3.bf16.msra.mxu0 %v6860_v20 }
 0x490   : > { %5962 = vmatprep.subr.bf16.mxu0 %v6873_v24  ;;  %5984 = vmatpush3.bf16.msra.mxu1 %v6923_v43 }
 0x491   : > { %5986 = vmatprep.subr.bf16.mxu1 %v6934_v49 }
 0x494   : > { %5988 = vmatpush3.bf16.msra.mxu1 %v6934_v49 }
 0x495   : > { %5990 = vmatprep.subr.bf16.mxu1 %v6963_v14 }
 0x498   : > { %5992 = vmatpush3.bf16.msra.mxu1 %v6963_v14 }
 0x499   : > { %6013 = vmatprep.subr.bf16.mxu1 %v8336_v48 }
 0x555   : > { %v5572_v27 = vpop.f32.mrb[18].mxu0 }
 0x556   : > { %v1483_v28 = vpop.f32.mrb[19].mxu0 }
 0x557   : > { %5592 = vmatprep.mubr.msk.f32.mxu0 %vm512_vm1, %v1483_v28 }
 0x558   : > { %5593 = vmatmul.mubr.msk.f32.vlgmr.msra.gmra.mrb[20].mxu0 %vm512_vm1, %v5572_v27 }
 0x559   : > { %5964 = vmatpush3.bf16.msra.mxu0 %v6873_v24 }
 0x55a   : > { %5966 = vmatprep.subr.bf16.mxu0 %v6882_v29 }
 0x55d   : > { %5968 = vmatpush3.bf16.msra.mxu0 %v6882_v29 }
 0x55e   : > { %v1723_v30 = vpop.f32.mrb[14].mxu1  ;;  %5970 = vmatprep.subr.bf16.mxu0 %v6895_v34 }
 0x55f   : > { %v5605_v31 = vpop.f32.mrb[15].mxu1  ;;  %v1730_v54 = vrot.slane %v1723_v30, %v6943_v53 }
 0x561   : > { %5972 = vmatpush3.bf16.msra.mxu0 %v6895_v34 }
 0x562   : > { %5974 = vmatprep.subr.bf16.mxu0 %v6905_v37 }
 0x565   : > { %5976 = vmatpush3.bf16.msra.mxu0 %v6905_v37 }
 0x62b   : > { %v5594_v57 = vpop.f32.mrb[20].mxu0 }
 0x62c   : > { %v1732_v58 = vadd.f32 %v5594_v57, %v1730_v54  ;;  %v1645_v59 = vpop.f32.mrb[21].mxu0 }
 0x62d   : > { %v1731_v61 = vadd.f32 %v1730_v54, %v1645_v59 }
 0x62e   : > { %v1738_v62 = vadd.f32 %v6949_v56, %v1732_v58 }
 0x62f   : > { %v1737_v63 = vadd.f32 %v6949_v56, %v1731_v61 }
 0x630   : > { %v1740_v11 = vmax.f32 %v1738_v62, 0.0 }
 0x631   : > { %v1739_v0 = vmax.f32 %v1737_v63, 0.0 }
 0x633   : > { %5622 = vmatprep.mubr.msk.f32.mxu0 %vm305_vm2, %v1739_v0 }
 0x634   : > { %5623 = vmatmul.mubr.msk.f32.vlgmr.msra.gmra.mrb[22].mxu0 %vm305_vm2, %v1740_v11 }
 0x635   : > { %5648 = vmatprep.mubr.msk.f32.mxu0 %vm1210_vm3, %v6792_v44 }
 0x707   : > { %v5624_v17 = vpop.f32.mrb[22].mxu0 }
 0x708   : > { %v1823_v18 = vadd.f32 %v5624_v17, %v6971_v16  ;;  %v1817_v19 = vpop.f32.mrb[23].mxu0 }
 0x709   : > { %v1818_v21 = vadd.f32 %v6971_v16, %v1817_v19 }
 0x70a   : > { %v1827_v23 = vmax.f32 %v1823_v18, 0.0 }
 0x70b   : > { %v1826_v22 = vmax.f32 %v1818_v21, 0.0 }
 0x70d   : > { %5641 = vmatprep.mubr.msk.f32.mxu1 %vm305_vm2, %v1826_v22 }
 0x70e   : > { %5642 = vmatmul.mubr.msk.f32.vlgmr.msra.gmra.mrb[16].mxu1 %vm305_vm2, %v1827_v23 }
 0x70f   : > { %6015 = vmatpush3.bf16.msra.mxu1 %v6802_v47  ;;  %5681 = vmatprep.mubr.msk.f32.mxu1 %vm6453_vm4, %v8338_v55 }
 0x710   : > { %6016 = vmatprep.subr.bf16.mxu1 %v8336_v48 }
 0x713   : > { %6018 = vmatpush3.bf16.msra.mxu1 %v6813_v51 }
 0x714   : > { %6020 = vmatprep.subr.bf16.mxu1 %v6873_v24 }
 0x7e1   : > { %v5643_v26 = vpop.f32.mrb[16].mxu1 }
 0x7e2   : > { %v1910_v27 = vadd.f32 %v5643_v26, %v6986_v25  ;;  %v1904_v28 = vpop.f32.mrb[17].mxu1 }
 0x7e3   : > { %v1905_v47 = vadd.f32 %v6986_v25, %v1904_v28  ;;  %v1082_v28 = vand.u32 127, %v1081_v50 }
 0x7e4   : > { %v1914_v30 = vmul.f32 %v1910_v27, %v1910_v27 }
 0x7e5   : > { %v1913_v31 = vmul.f32 %v1905_v47, %v1905_v47 }
 0x7e6   : > { %v1918_v32 = vsel %vm512_vm1, %v1914_v30, 0.0 }
 0x7e7   : > { %1919 = vadd.xlane.f32.xlu1 %v1918_v32  ;;  %v1915_v51 = vsel %vm512_vm1, %v1913_v31, 0.0 }
 0x7e8   : > { %1916 = vadd.xlane.f32.xlu0 %v1915_v51 }
 0x874   : > { %v1920_v33 = vpop.xlane.xlu1 %1919 }
 0x875   : > { %v1922_v35 = vadd.f32 1e-12, %v1920_v33  ;;  %v1917_v36 = vpop.xlane.xlu0 %1916 }
 0x876   : > { %v1921_v38 = vadd.f32 1e-12, %v1917_v36 }
 0x877   : > { %6368 = vrsqrt.f32 %v1922_v35 }
 0x878   : > { %6370 = vrsqrt.f32 %v1921_v38 }
 0x881   : > { %v6369_v39 = vpop.eup %6368 }
 0x882   : > { %v6371_v40 = vpop.eup %6370  ;;  %v1926_v42 = vmul.f32 %v6369_v39, %v1910_v27 }
 0x883   : > { %v1925_v45 = vmul.f32 %v6371_v40, %v1905_v47  ;;  %v2451_v40 = vld [vmem:[%s8329_s3 + $0x1b0] sm:$0xff] }
 0x884   : > { %v1928_v46 = vsel %vm512_vm1, %v1926_v42, 0.0 }
 0x885   : > { %v1927_v54 = vsel %vm512_vm1, %v1925_v45, 0.0  ;;  %v5993_v57 = vpack.c.bf16 %v1926_v42, %v1925_v45 }
 0x886   : > { %v1929_v58 = vadd.f32 %v1928_v46, %v1927_v54  ;;  %v2453_v46 = vld [vmem:[%s8329_s3 + $0x1c0] sm:$0xff]  ;;  %v2454_v54 = vld [vmem:[%s8329_s3 + $0x1c8] sm:$0xff] }
 0x887   : > { %5994 = vmatprep.subr.bf16.mxu0 %v5993_v57 }
 0x888   : > { %v1930_v59 = vrot.slane %v1929_v58, 4  ;;  %5996 = vmatpush3.bf16.msra.mxu0 %v5993_v57  ;;  %v6075_v57 = vpack.c.bf16 %v2454_v54, %v2453_v46 }
 0x889   : > { %5998 = vmatprep.subr.bf16.mxu0 %v6826_v60 }
 0x88a   : > { %v1931_v61 = vadd.f32 %v1930_v59, %v1929_v58  ;;  %v8334_v58 = vmov 9   ;;  %v7113_v59 = vld [vmem:[%s6538_s28] sm:$0xff] }
 0x88b   : > { %5649 = vmatmul.mubr.msk.f32.vlgmr.msra.gmra.mrb[24].mxu0 %vm1210_vm3, %v6834_v9 }
 0x88c   : > { %6000 = vmatpush3.bf16.msra.mxu0 %v6826_v60  ;;  %5659 = vmatprep.mubr.msk.f32.mxu0 %vm512_vm1, %v1925_v45  ;;  %v1932_v62 = vrot.slane %v1931_v61, 2 }
 0x88d   : > { %6002 = vmatprep.subr.bf16.mxu0 %v6837_v10 }
 0x88e   : > { %v1933_v63 = vadd.f32 %v1932_v62, %v1931_v61  ;;  %v7117_v61 = vld [vmem:[%s6538_s28 + $0x18] sm:$0xff]  ;;  %v7121_v62 = vld [vmem:[%s6538_s28 + $0x30] sm:$0xff] }
 0x890   : > { %6004 = vmatpush3.bf16.msra.mxu0 %v6837_v10  ;;  %v1934_v0 = vrot.slane %v1933_v63, 1 }
 0x891   : > { %6006 = vmatprep.subr.bf16.mxu0 %v6850_v15 }
 0x892   : > { %v1935_v11 = vadd.f32 %v1934_v0, %v1933_v63 }
 0x893   : > { %5660 = vmatmul.mubr.msk.f32.vlgmr.msra.gmra.mrb[26].mxu0 %vm512_vm1, %v1926_v42  ;;  %v2452_v42 = vld [vmem:[%s8329_s3 + $0x1b8] sm:$0xff] }
 0x894   : > { %5682 = vmatmul.mubr.msk.f32.vlgmr.msra.gmra.mrb[18].mxu1 %vm512_vm1, %v1935_v11  ;;  %6008 = vmatpush3.bf16.msra.mxu0 %v6850_v15  ;;  %v6072_v45 = vpack.c.bf16 %v2452_v42, %v2451_v40 }
 0x895   : > { %6010 = vmatprep.subr.bf16.mxu0 %v6860_v20  ;;  %6022 = vmatpush3.bf16.msra.mxu1 %v6873_v24 }
 0x896   : > { %6024 = vmatprep.subr.bf16.mxu1 %v6882_v29 }
 0x898   : > { %6012 = vmatpush3.bf16.msra.mxu0 %v6860_v20 }
 0x899   : > { %6026 = vmatpush3.bf16.msra.mxu1 %v6882_v29  ;;  %6036 = vmatprep.subr.bf16.mxu0 %v6918_v41 }
 0x89a   : > { %6028 = vmatprep.subr.bf16.mxu1 %v6895_v34 }
 0x89d   : > { %6030 = vmatpush3.bf16.msra.mxu1 %v6895_v34 }
 0x89e   : > { %6032 = vmatprep.subr.bf16.mxu1 %v6905_v37 }
 0x8a1   : > { %6034 = vmatpush3.bf16.msra.mxu1 %v6905_v37 }
 0x95e   : > { %v5650_v60 = vpop.f32.mrb[24].mxu0 }
 0x95f   : > { %v2002_v10 = vpop.f32.mrb[25].mxu0 }
 0x960   : > { %5670 = vmatprep.mubr.msk.f32.mxu0 %vm512_vm1, %v2002_v10  ;;  %v6457_v10 = vmov 0  }
 0x961   : > { %5671 = vmatmul.mubr.msk.f32.vlgmr.msra.gmra.mrb[26].mxu0 %vm512_vm1, %v5650_v60 }
 0x962   : > { %6038 = vmatpush3.bf16.msra.mxu0 %v6918_v41 }
 0x963   : > { %6040 = vmatprep.subr.bf16.mxu0 %v6923_v43 }
 0x966   : > { %6042 = vmatpush3.bf16.msra.mxu0 %v6923_v43 }
 0x967   : > { %v2242_v15 = vpop.f32.mrb[18].mxu1  ;;  %6044 = vmatprep.subr.bf16.mxu0 %v6934_v49 }
 0x968   : > { %v5683_v20 = vpop.f32.mrb[19].mxu1  ;;  %v2249_v24 = vrot.slane %v2242_v15, %v6943_v53 }
 0x96a   : > { %6046 = vmatpush3.bf16.msra.mxu0 %v6934_v49  ;;  %v6454_v49 = vmov 10  }
 0x96b   : > { %6048 = vmatprep.subr.bf16.mxu0 %v6963_v14  ;;  %6213 = vset.pattern.permute.xlu1 %v6454_v49 }
 0x96c   : > { %6214 = vset.pattern.permute.xlu0 %v6454_v49  ;;  %1085 = vperm.xlu1 %6213, %v6541_v1  }
 0x96e   : > { %6050 = vmatpush3.bf16.msra.mxu0 %v6963_v14 }
 0x96f   : > { %6071 = vmatprep.subr.bf16.mxu0 %v8336_v48 }
 0x970   : > { %1093 = vperm.xlu1 %6213, %v6547_v3  }
 0x974   : > { %1097 = vperm.xlu1 %6213, %v6556_v4  }
 0x978   : > { %1101 = vperm.xlu1 %6213, %v6559_v5  }
 0x97c   : > { %1105 = vperm.xlu1 %6213, %v6566_v6  }
 0x980   : > { %1109 = vperm.xlu1 %6213, %v6569_v7  }
 0x984   : > { %1113 = vperm.xlu1 %6213, %v6576_v8  }
 0x988   : > { %6256 = vset.pattern.permute.xlu1 %v8334_v58 }
 0x9eb   : > { %v7045_v3 = vpop.permute.xlu1 %1085 }
 0x9ef   : > { %v1094_v8 = vpop.permute.xlu1 %1093 }
 0x9f3   : > { %v1098_v23 = vpop.permute.xlu1 %1097 }
 0x9f7   : > { %v1102_v27 = vpop.permute.xlu1 %1101 }
 0x9fb   : > { %v1106_v47 = vpop.permute.xlu1 %1105 }
 0x9ff   : > { %v1110_v30 = vpop.permute.xlu1 %1109 }
 0xa03   : > { %v1114_v51 = vpop.permute.xlu1 %1113 }
 0xa34   : > { %v5672_v29 = vpop.f32.mrb[26].mxu0 }
 0xa35   : > { %v2251_v34 = vadd.f32 %v5672_v29, %v2249_v24  ;;  %v2164_v37 = vpop.f32.mrb[27].mxu0 }
 0xa36   : > { %v2250_v41 = vadd.f32 %v2249_v24, %v2164_v37 }
 0xa37   : > { %v2253_v43 = vadd.f32 %v6949_v56, %v2251_v34 }
 0xa38   : > { %v2252_v12 = vadd.f32 %v6949_v56, %v2250_v41 }
 0xa39   : > { %v2255_v17 = vmax.f32 %v2253_v43, 0.0  ;;  %v2447_v43 = vld [vmem:[%s8329_s3 + $0x190] sm:$0xff] }
 0xa3a   : > { %v2254_v13 = vmax.f32 %v2252_v12, 0.0  ;;  %v2448_v12 = vld [vmem:[%s8329_s3 + $0x198] sm:$0xff] }
 0xa3c   : > { %5700 = vmatprep.mubr.msk.f32.mxu1 %vm305_vm2, %v2254_v13 }
 0xa3d   : > { %5701 = vmatmul.mubr.msk.f32.vlgmr.msra.gmra.mrb[20].mxu1 %vm305_vm2, %v2255_v17 }
 0xa3e   : > { %5726 = vmatprep.mubr.msk.f32.mxu1 %vm1210_vm3, %v6792_v44 }
 0xb10   : > { %v5702_v56 = vpop.f32.mrb[20].mxu1 }
 0xb11   : > { %v2334_v44 = vadd.f32 %v5702_v56, %v6971_v16  ;;  %v2328_v14 = vpop.f32.mrb[21].mxu1 }
 0xb12   : > { %v2329_v18 = vadd.f32 %v6971_v16, %v2328_v14 }
 0xb13   : > { %v2338_v1 = vmax.f32 %v2334_v44, 0.0  ;;  %v6055_v44 = vpack.c.bf16 %v2448_v12, %v2447_v43  ;;  %v7219_v12 = vmul.f32 1.5, %v7121_v62 }
 0xb14   : > { %v2337_v19 = vmax.f32 %v2329_v18, 0.0  ;;  %v2449_v18 = vld [vmem:[%s8329_s3 + $0x1a0] sm:$0xff] }
 0xb16   : > { %5719 = vmatprep.mubr.msk.f32.mxu0 %vm305_vm2, %v2337_v19  ;;  %v2450_v19 = vld [vmem:[%s8329_s3 + $0x1a8] sm:$0xff] }
 0xb17   : > { %5720 = vmatmul.mubr.msk.f32.vlgmr.msra.gmra.mrb[28].mxu0 %vm305_vm2, %v2338_v1 }
 0xb18   : > { %5759 = vmatprep.mubr.msk.f32.mxu0 %vm6453_vm4, %v8338_v55  ;;  %6073 = vmatpush3.bf16.msra.mxu0 %v6072_v45 }
 0xb19   : > { %6074 = vmatprep.subr.bf16.mxu0 %v8336_v48 }
 0xb1c   : > { %6076 = vmatpush3.bf16.msra.mxu0 %v6075_v57 }
 0xbea   : > { %v5721_v4 = vpop.f32.mrb[28].mxu0 }
 0xbeb   : > { %v2411_v5 = vpop.f32.mrb[29].mxu0  ;;  %v7048_v6 = vadd.f32 %v5721_v4, %v6986_v25 }
 0xbec   : > { %v7051_v7 = vadd.f32 %v6986_v25, %v2411_v5  ;;  %v1083_v25 = vcvt.s32.f32 %v1082_v28  ;;  %v2443_v28 = vld [vmem:[%s8329_s3 + $0x170] sm:$0xff] }
 0xbed   : > { %v2421_v22 = vmul.f32 %v7048_v6, %v7048_v6 }
 0xbee   : > { %v2420_v16 = vmul.f32 %v7051_v7, %v7051_v7  ;;  %vm1118_vm5 = vcmp.eq.f32.partialorder %v1094_v8, %v1083_v25  ;;  %vm1119_vm6 = vcmp.eq.f32.partialorder %v1098_v23, %v1083_v25  ;;  %vm1120_vm7 = vcmp.eq.f32.partialorder %v1102_v27, %v1083_v25  ;;  %v7178_v23 = vld [vmem:[%s6538_s28 + $0x20] sm:$0xff] }
 0xbef   : > { %v2425_v26 = vsel %vm512_vm1, %v2421_v22, 0.0  ;;  %v7061_v31 = vsel %vm1118_vm5, 1.0, %v8338_v55  ;;  %v7064_v32 = vsel %vm1119_vm6, 1.0, %v8338_v55  ;;  %vm1121_vm8 = vcmp.eq.f32.partialorder %v1106_v47, %v1083_v25  ;;  %v2444_v47 = vld [vmem:[%s8329_s3 + $0x178] sm:$0xff] }
 0xbf0   : > { %v2422_v21 = vsel %vm512_vm1, %v2420_v16, 0.0  ;;  %8379 = vst [vmem:[#allocation2_spill] sm:$0xff] %v7061_v31  ;;  %8380 = vst [vmem:[#allocation3_spill] sm:$0xff] %v7064_v32  ;;  %v7069_v33 = vpack.i.bf16 %v7064_v32, %v7061_v31  ;;  %v7072_v50 = vsel %vm1120_vm7, 1.0, %v8338_v55  ;;  %v7075_v35 = vsel %vm1121_vm8, 1.0, %v8338_v55  ;;  %v7168_v16 = vld [vmem:[%s6538_s28 + $0x10] sm:$0xff] }
 0xbf1   : > { %2423 = vadd.xlane.f32.xlu0 %v2422_v21  ;;  %8381 = vst [vmem:[#allocation4_spill] sm:$0xff] %v7072_v50  ;;  %8382 = vst [vmem:[#allocation5_spill] sm:$0xff] %v7075_v35  ;;  %vm1122_vm9 = vcmp.eq.f32.partialorder %v1110_v30, %v1083_v25  ;;  %vm1123_vm10 = vcmp.eq.f32.partialorder %v1114_v51, %v1083_v25  ;;  %v7081_v36 = vpack.i.bf16 %v7075_v35, %v7072_v50  ;;  %v6459_v22 = vmov 8   ;;  %v7201_v30 = vld [vmem:[%s6538_s28 + $0x38] sm:$0xff] }
 0xbf2   : > { %v7087_v38 = vsel %vm1123_vm10, 1.0, %v8338_v55  ;;  %vm1116_vm11 = vcmp.eq.f32.partialorder %v7045_v3, %v1083_v25  ;;  %v6059_v3 = vpack.c.bf16 %v2450_v19, %v2449_v18  ;;  %v7172_v21 = vmul.f32 1.5, %v7113_v59 }
 0xbf3   : > { %8384 = vst [vmem:[#allocation7_spill] sm:$0xff] %v7087_v38  ;;  %v7127_v15 = vsel %vm1116_vm11, 1.0, %v8338_v55  ;;  %v7186_v27 = vmul.f32 1.5, %v7117_v61  ;;  %v6063_v51 = vpack.c.bf16 %v2444_v47, %v2443_v28 }
 0xbf4   : > { %8385 = vst [vmem:[#allocation8_spill] sm:$0xff] %v7127_v15 }
 0xbf5   : > { %2426 = vadd.xlane.f32.xlu0 %v2425_v26  ;;  %v7182_v26 = vld [vmem:[%s6538_s28 + $0x28] sm:$0xff] }
 0xbf6   : > { %v7240_v19 = vmul.f32 1.5, %v7182_v26 }
 0xc0b   : > { %1089 = vperm.xlu0 %6214, %v6544_v2   ;;  %v7084_v2 = vsel %vm1122_vm9, 1.0, %v8338_v55 }
 0xc0c   : > { %8383 = vst [vmem:[#allocation6_spill] sm:$0xff] %v7084_v2  ;;  %v7093_v39 = vpack.i.bf16 %v7087_v38, %v7084_v2 }
 0xc0f   : > { %6226 = vrot.lane.b32.xlu0 %v7069_v33, %s6455_s15 }
 0xc10   : > { %6255 = vset.pattern.permute.xlu0 %v8334_v58 }
 0xc13   : > { %6236 = vrot.lane.b32.xlu0 %v7081_v36, %s6455_s15 }
 0xc17   : > { %6246 = vrot.lane.b32.xlu0 %v7093_v39, %s6455_s15 }
 0xc1b   : > { %3229 = vperm.xlu0 %6255, %v7113_v59  }
 0xc1f   : > { %3241 = vperm.xlu0 %6255, %v7117_v61  }
 0xc23   : > { %3253 = vperm.xlu0 %6255, %v7121_v62  }
 0xc27   : > { %6268 = vset.pattern.permute.xlu0 %v6457_v10 }
 0xc7e   : > { %v2424_v63 = vpop.xlane.xlu0 %2423 }
 0xc7f   : > { %v2428_v0 = vadd.f32 1e-12, %v2424_v63 }
 0xc81   : > { %6372 = vrsqrt.f32 %v2428_v0 }
 0xc82   : > { %v2427_v11 = vpop.xlane.xlu0 %2426 }
 0xc83   : > { %v2429_v60 = vadd.f32 1e-12, %v2427_v11 }
 0xc85   : > { %6374 = vrsqrt.f32 %v2429_v60 }
 0xc8a   : > { %v1090_v20 = vpop.permute.xlu0 %1089 }
 0xc8b   : > { %v6373_v24 = vpop.eup %6372  ;;  %vm1117_vm12 = vcmp.eq.f32.partialorder %v1090_v20, %v1083_v25  ;;  %v2445_v25 = vld [vmem:[%s8329_s3 + $0x180] sm:$0xff] }
 0xc8c   : > { %v7130_v29 = vsel %vm1117_vm12, 1.0, %v8338_v55  ;;  %v2432_v37 = vmul.f32 %v6373_v24, %v7051_v7 }
 0xc8d   : > { %8386 = vst [vmem:[#allocation9_spill] sm:$0xff] %v7130_v29  ;;  %v6215_v34 = vpack.i.bf16 %v7130_v29, %v7127_v15 }
 0xc8e   : > { %v2434_v17 = vsel %vm512_vm1, %v2432_v37, 0.0  ;;  %v6227_v40 = vpop.permute.xlu0 %6226 }
 0xc8f   : > { %v6375_v41 = vpop.eup %6374  ;;  %6216 = vrot.lane.b32.xlu1 %v6215_v34, %s6455_s15 }
 0xc90   : > { %v2433_v13 = vmul.f32 %v6375_v41, %v7048_v6  ;;  %v8333_v41 = vmov 3  }
 0xc92   : > { %v2435_v49 = vsel %vm512_vm1, %v2433_v13, 0.0  ;;  %v6051_v56 = vpack.c.bf16 %v2433_v13, %v2432_v37  ;;  %v6237_v45 = vpop.permute.xlu0 %6236 }
 0xc93   : > { %6221 = vrot.lane.b32.xlu1 %v6215_v34, %s6458_s10  ;;  %v2436_v14 = vadd.f32 %v2435_v49, %v2434_v17  ;;  %v6429_v20 = vadd.high.f32.bf16 %v7075_v35, %v6237_v45  ;;  %v6435_v49 = vadd.high.f32.bf16 %v7064_v32, %v6227_v40 }
 0xc94   : > { %6052 = vmatprep.subr.bf16.mxu1 %v6051_v56 }
 0xc95   : > { %v2437_v1 = vrot.slane %v2436_v14, 4  ;;  %6054 = vmatpush3.bf16.msra.mxu1 %v6051_v56 }
 0xc96   : > { %6056 = vmatprep.subr.bf16.mxu1 %v6055_v44  ;;  %v6247_v0 = vpop.permute.xlu0 %6246 }
 0xc97   : > { %6231 = vrot.lane.b32.xlu1 %v7069_v33, %s6458_s10  ;;  %v2438_v4 = vadd.f32 %v2437_v1, %v2436_v14  ;;  %v2446_v33 = vld [vmem:[%s8329_s3 + $0x188] sm:$0xff]  ;;  %v7235_v14 = vmul.f32 1.5, %v7168_v16  ;;  %v7245_v1 = vmul.f32 1.5, %v7201_v30 }
 0xc98   : > { %5727 = vmatmul.mubr.msk.f32.vlgmr.msra.gmra.mrb[22].mxu1 %vm1210_vm3, %v6834_v9  ;;  %v7164_v9 = vld [vmem:[%s6538_s28 + $0x8] sm:$0xff] }
 0xc99   : > { %6058 = vmatpush3.bf16.msra.mxu1 %v6055_v44  ;;  %5737 = vmatprep.mubr.msk.f32.mxu1 %vm512_vm1, %v2432_v37  ;;  %v2439_v5 = vrot.slane %v2438_v4, 2  ;;  %v6431_v37 = vadd.low.f32.bf16 %v7084_v2, %v6247_v0  ;;  %v7228_v62 = vmul.f32 1.5, %v7164_v9  ;;  %v6437_v44 = vadd.low.f32.bf16 %v7072_v50, %v6237_v45 }
 0xc9a   : > { %6060 = vmatprep.subr.bf16.mxu1 %v6059_v3  ;;  %v3230_v47 = vpop.permute.xlu0 %3229 }
 0xc9b   : > { %6241 = vrot.lane.b32.xlu1 %v7081_v36, %s6458_s10  ;;  %v2440_v6 = vadd.f32 %v2439_v5, %v2438_v4  ;;  %v7208_v36 = vmul.f32 1.5, %v7178_v23 }
 0xc9d   : > { %6062 = vmatpush3.bf16.msra.mxu1 %v6059_v3  ;;  %v2441_v7 = vrot.slane %v2440_v6, 1  ;;  %v6439_v3 = vadd.high.f32.bf16 %v7087_v38, %v6247_v0 }
 0xc9e   : > { %6064 = vmatprep.subr.bf16.mxu1 %v6063_v51 }
 0xc9f   : > { %6251 = vrot.lane.b32.xlu1 %v7093_v39, %s6458_s10  ;;  %v2442_v8 = vadd.f32 %v2441_v7, %v2440_v6  ;;  %v6067_v39 = vpack.c.bf16 %v2446_v33, %v2445_v25  ;;  %v3262_v7 = vsub.s32 1, %v6940_v52 }
 0xca0   : > { %5738 = vmatmul.mubr.msk.f32.vlgmr.msra.gmra.mrb[24].mxu1 %vm512_vm1, %v2433_v13  ;;  %v6433_v13 = vadd.low.f32.bf16 %v7061_v31, %v6227_v40  ;;  %v3430_v40 = vsub.s32 3, %v6940_v52 }
 0xca1   : > { %5760 = vmatmul.mubr.msk.f32.vlgmr.msra.gmra.mrb[30].mxu0 %vm512_vm1, %v2442_v8  ;;  %6066 = vmatpush3.bf16.msra.mxu1 %v6063_v51  ;;  %v332_v8 = vld [vmem:[%s6739_s7 + $0x10] sm:$0xff] }
 0xca2   : > { %6068 = vmatprep.subr.bf16.mxu1 %v6067_v39  ;;  %v7256_v28 = vrot.slane %v332_v8, %v3262_v7 }
 0xca3   : > { %3233 = vperm.xlu1 %6256, %v7164_v9  }
 0xca4   : > { %v3264_v25 = vsub.f32 %v3230_v47, %v7256_v28 }
 0xca5   : > { %6070 = vmatpush3.bf16.msra.mxu1 %v6067_v39 }
 0xca6   : > { %vm3272_vm13 = vcmp.gt.f32.partialorder %v3264_v25, 3.1415927 }
 0xca7   : > { %3237 = vperm.xlu1 %6256, %v7168_v16  }
 0xcab   : > { %6257 = vset.pattern.permute.xlu1 %v6459_v22 }
 0xcac   : > { %3178 = vperm.xlu1 %6257, %v7172_v21  }
 0xcb0   : > { %6258 = vset.pattern.permute.xlu1 %v8334_v58 }
 0xcb1   : > { %3245 = vperm.xlu1 %6258, %v7178_v23  }
 0xcb5   : > { %3249 = vperm.xlu1 %6258, %v7182_v26  }
 0xcb9   : > { %6259 = vset.pattern.permute.xlu1 %v6459_v22 }
 0xcba   : > { %3193 = vperm.xlu1 %6259, %v7186_v27  }
 0xcbe   : > { %6260 = vset.pattern.permute.xlu1 %v8334_v58 }
 0xcbf   : > { %3257 = vperm.xlu1 %6260, %v7201_v30  }
 0xcc3   : > { %6261 = vset.pattern.permute.xlu1 %v6459_v22 }
 0xcc4   : > { %3198 = vperm.xlu1 %6261, %v7208_v36  }
 0xcc8   : > { %6262 = vset.pattern.permute.xlu1 %v6457_v10 }
 0xd01   : > { %v6217_v42 = vpop.permute.xlu1 %6216 }
 0xd02   : > { %v6425_v54 = vadd.low.f32.bf16 %v7127_v15, %v6217_v42  ;;  %v6427_v63 = vadd.high.f32.bf16 %v7130_v29, %v6217_v42  ;;  %v7267_v42 = vrot.slane %v332_v8, %v6943_v53 }
 0xd05   : > { %v6222_v46 = vpop.permute.xlu1 %6221 }
 0xd06   : > { %v6426_v57 = vadd.low.f32.bf16 %v6425_v54, %v6222_v46  ;;  %v6428_v11 = vadd.high.f32.bf16 %v6427_v63, %v6222_v46 }
 0xd08   : > { %3370 = vperm.xlu1 %6262, %v6426_v57  }
 0xd09   : > { %v6232_v61 = vpop.permute.xlu1 %6231 }
 0xd0a   : > { %v6434_v17 = vadd.low.f32.bf16 %v6433_v13, %v6232_v61  ;;  %v6436_v56 = vadd.high.f32.bf16 %v6435_v49, %v6232_v61 }
 0xd0c   : > { %3375 = vperm.xlu1 %6262, %v6428_v11  }
 0xd0d   : > { %v6242_v60 = vpop.permute.xlu1 %6241 }
 0xd0e   : > { %v6430_v24 = vadd.high.f32.bf16 %v6429_v20, %v6242_v60  ;;  %v6438_v18 = vadd.low.f32.bf16 %v6437_v44, %v6242_v60  ;;  %v3674_v44 = vsub.s32 4, %v6940_v52 }
 0xd10   : > { %6263 = vset.pattern.permute.xlu1 %v8333_v41  ;;  %3395 = vperm.xlu0 %6268, %v6430_v24  }
 0xd11   : > { %v6252_v34 = vpop.permute.xlu1 %6251  ;;  %3541 = vperm.xlu1 %6263, %v6428_v11  }
 0xd12   : > { %v6432_v43 = vadd.low.f32.bf16 %v6431_v37, %v6252_v34  ;;  %v6440_v4 = vadd.high.f32.bf16 %v6439_v3, %v6252_v34 }
 0xd14   : > { %3400 = vperm.xlu0 %6268, %v6432_v43  }
 0xd15   : > { %6264 = vset.pattern.permute.xlu1 %v6459_v22 }
 0xd16   : > { %3208 = vperm.xlu1 %6264, %v7219_v12  }
 0xd18   : > { %6270 = vset.pattern.permute.xlu0 %v8333_v41 }
 0xd19   : > { %3537 = vperm.xlu0 %6270, %v6426_v57   ;;  %v7271_v57 = vrot.slane %v332_v8, %v3430_v40 }
 0xd1a   : > { %6265 = vset.pattern.permute.xlu1 %v6457_v10 }
 0xd1b   : > { %3380 = vperm.xlu1 %6265, %v6434_v17   ;;  %v3432_v11 = vsub.f32 %v3230_v47, %v7271_v57  ;;  %v7287_v47 = vrot.slane %v332_v8, %v3674_v44 }
 0xd1d   : > { %3545 = vperm.xlu0 %6270, %v6434_v17   ;;  %v5202_v34 = vadd.f32 -6.2831855, %v3432_v11  ;;  %vm3440_vm15 = vcmp.gt.f32.partialorder %v3432_v11, 3.1415927 }
 0xd1f   : > { %3385 = vperm.xlu1 %6265, %v6436_v56   ;;  %v3456_v13 = vsel %vm3440_vm15, %v5202_v34, %v3432_v11 }
 0xd20   : > { %vm3464_vm6 = vcmp.lt.f32.partialorder %v3456_v13, -3.1415927 }
 0xd21   : > { %3561 = vperm.xlu0 %6270, %v6432_v43   ;;  %v3418_v43 = vsub.s32 2, %v6940_v52 }
 0xd22   : > { %v3234_v5 = vpop.permute.xlu1 %3233 }
 0xd23   : > { %6266 = vset.pattern.permute.xlu1 %v8333_v41  ;;  %v7282_v49 = vrot.slane %v332_v8, %v3418_v43  ;;  %v3433_v8 = vsub.f32 %v3234_v5, %v7271_v57 }
 0xd24   : > { %3549 = vperm.xlu1 %6266, %v6436_v56   ;;  %v3242_v56 = vpop.permute.xlu0 %3241 }
 0xd25   : > { %6272 = vset.pattern.permute.xlu0 %v6459_v22  ;;  %v5203_v34 = vadd.f32 -6.2831855, %v3433_v8  ;;  %vm3441_vm9 = vcmp.gt.f32.partialorder %v3433_v8, 3.1415927 }
 0xd26   : > { %3183 = vperm.xlu0 %6272, %v7228_v62   ;;  %v7252_v6 = vpop.permute.xlu1 %3237 }
 0xd27   : > { %v3266_v11 = vsub.f32 %v7252_v6, %v7256_v28 }
 0xd28   : > { %6267 = vset.pattern.permute.xlu1 %v6457_v10 }
 0xd29   : > { %3390 = vperm.xlu1 %6267, %v6438_v18   ;;  %v5188_v43 = vadd.f32 -6.2831855, %v3266_v11  ;;  %vm3274_vm10 = vcmp.gt.f32.partialorder %v3266_v11, 3.1415927 }
 0xd2a   : > { %3188 = vperm.xlu0 %6272, %v7235_v14  }
 0xd2b   : > { %v3179_v26 = vpop.permute.xlu1 %3178 }
 0xd2c   : > { %v3220_v63 = vsub.f32 %v3179_v26, %v7267_v42 }
 0xd2d   : > { %6269 = vset.pattern.permute.xlu1 %v8333_v41 }
 0xd2e   : > { %3203 = vperm.xlu0 %6272, %v7240_v19   ;;  %3553 = vperm.xlu1 %6269, %v6438_v18   ;;  %v3320_v60 = vmul.f32 %v3220_v63, %v3220_v63  ;;  %v3472_v18 = vadd.f32 6.2831855, %v3456_v13 }
 0xd32   : > { %3213 = vperm.xlu0 %6272, %v7245_v1   ;;  %3557 = vperm.xlu1 %6269, %v6430_v24  }
 0xd36   : > { %6271 = vset.pattern.permute.xlu1 %v6457_v10  ;;  %v7259_v10 = vpop.permute.xlu1 %3245 }
 0xd37   : > { %3405 = vperm.xlu1 %6271, %v6440_v4  }
 0xd3a   : > { %v7263_v33 = vpop.permute.xlu1 %3249 }
 0xd3b   : > { %6273 = vset.pattern.permute.xlu1 %v8333_v41  ;;  %v3269_v50 = vsub.f32 %v7263_v33, %v7256_v28 }
 0xd3c   : > { %3565 = vperm.xlu1 %6273, %v6440_v4   ;;  %v3420_v4 = vsub.f32 %v3179_v26, %v7282_v49  ;;  %v3265_v26 = vsub.f32 %v3234_v5, %v7256_v28  ;;  %v3267_v5 = vsub.f32 %v3242_v56, %v7256_v28 }
 0xd3e   : > { %v7273_v61 = vpop.permute.xlu1 %3193  ;;  %vm3273_vm8 = vcmp.gt.f32.partialorder %v3265_v26, 3.1415927 }
 0xd40   : > { %6354 = vset.pattern.permute.xlu1 %v6459_v22  ;;  %v5186_v22 = vadd.f32 -6.2831855, %v3264_v25 }
 0xd42   : > { %v3288_v39 = vsel %vm3272_vm13, %v5186_v22, %v3264_v25  ;;  %v7277_v24 = vpop.permute.xlu1 %3257  ;;  %v3488_v22 = vmul.f32 %v3420_v4, %v3420_v4  ;;  %vm3275_vm13 = vcmp.gt.f32.partialorder %v3267_v5, 3.1415927 }
 0xd43   : > { %v3304_v54 = vadd.f32 6.2831855, %v3288_v39  ;;  %vm3296_vm14 = vcmp.lt.f32.partialorder %v3288_v39, -3.1415927 }
 0xd45   : > { %v3312_v0 = vsel %vm3296_vm14, %v3304_v54, %v3288_v39 }
 0xd46   : > { %v3328_v20 = vmul.f32 %v3312_v0, %v3312_v0  ;;  %v7280_v17 = vpop.permute.xlu1 %3198  ;;  %v5187_v0 = vadd.f32 -6.2831855, %v3265_v26 }
 0xd48   : > { %v3336_v37 = vadd.f32 %v3328_v20, %v3320_v60 }
 0xd4a   : > { %vm3344_vm5 = vcmp.lt.f32.partialorder %v3336_v37, 0.001225  ;;  %v3289_v37 = vsel %vm3273_vm8, %v5187_v0, %v3265_v26  ;;  %v3268_v0 = vsub.f32 %v7259_v10, %v7256_v28 }
 0xd4b   : > { %v5194_v3 = vsel %vm3344_vm5, 1.0, %v8338_v55  ;;  %v3305_v4 = vadd.f32 6.2831855, %v3289_v37  ;;  %vm3297_vm11 = vcmp.lt.f32.partialorder %v3289_v37, -3.1415927 }
 0xd4c   : > { %v5190_v48 = vadd.f32 -6.2831855, %v3268_v0 }
 0xd6b   : > { %v5728_v30 = vpop.f32.mrb[22].mxu1 }
 0xd6c   : > { %v2540_v51 = vpop.f32.mrb[23].mxu1 }
 0xd6d   : > { %5748 = vmatprep.mubr.msk.f32.mxu1 %vm512_vm1, %v2540_v51  ;;  %v7289_v51 = vpop.permute.xlu0 %3253 }
 0xd6e   : > { %5749 = vmatmul.mubr.msk.f32.vlgmr.msra.gmra.mrb[24].mxu1 %vm512_vm1, %v5728_v30  ;;  %v3480_v30 = vsel %vm3464_vm6, %v3472_v18, %v3456_v13  ;;  %v3434_v13 = vsub.f32 %v7252_v6, %v7271_v57  ;;  %v5189_v6 = vadd.f32 -6.2831855, %v3267_v5 }
 0xd6f   : > { %v3496_v39 = vmul.f32 %v3480_v30, %v3480_v30 }
 0xd70   : > { %v5204_v30 = vadd.f32 -6.2831855, %v3434_v13  ;;  %vm3442_vm12 = vcmp.gt.f32.partialorder %v3434_v13, 3.1415927 }
 0xd74   : > { %v7269_v45 = vpop.f32.mrb[30].mxu0 }
 0xd75   : > { %v5761_v46 = vpop.f32.mrb[31].mxu0 }
 0xd76   : > { %v3504_v46 = vadd.f32 %v3496_v39, %v3488_v22 }
 0xd78   : > { %vm3512_vm7 = vcmp.lt.f32.partialorder %v3504_v46, 0.0225 }
 0xd79   : > { %v5210_v63 = vsel %vm3512_vm7, 1.0, %v8338_v55  ;;  %vm3276_vm7 = vcmp.gt.f32.partialorder %v3268_v0, 3.1415927 }
 0xd7a   : > { %v3292_v38 = vsel %vm3276_vm7, %v5190_v48, %v3268_v0 }
 0xd87   : > { %v3371_v7 = vpop.permute.xlu1 %3370 }
 0xd88   : > { %v3408_v25 = vmul.f32 %v5194_v3, %v3371_v7  ;;  %v3457_v7 = vsel %vm3441_vm9, %v5203_v34, %v3433_v8  ;;  %v3458_v8 = vsel %vm3442_vm12, %v5204_v30, %v3434_v13  ;;  %vm3300_vm12 = vcmp.lt.f32.partialorder %v3292_v38, -3.1415927 }
 0xd89   : > { %v3473_v39 = vadd.f32 6.2831855, %v3457_v7  ;;  %vm3465_vm14 = vcmp.lt.f32.partialorder %v3457_v7, -3.1415927  ;;  %vm3466_vm6 = vcmp.lt.f32.partialorder %v3458_v8, -3.1415927 }
 0xd8a   : > { %3584 = vrot.lane.b32.xlu1 %v3408_v25, %s6451_s14  ;;  %v3676_v40 = vmul.f32 %v7287_v47, %v3408_v25  ;;  %v3290_v25 = vsel %vm3274_vm10, %v5188_v43, %v3266_v11  ;;  %v3291_v11 = vsel %vm3275_vm13, %v5189_v6, %v3267_v5  ;;  %v7326_v5 = vsub.f32 %v7289_v51, %v7256_v28 }
 0xd8b   : > { %v7307_v44 = vpop.permute.xlu1 %3375  ;;  %v3306_v46 = vadd.f32 6.2831855, %v3290_v25  ;;  %vm3298_vm15 = vcmp.lt.f32.partialorder %v3290_v25, -3.1415927  ;;  %v3481_v34 = vsel %vm3465_vm14, %v3473_v39, %v3457_v7  ;;  %v3307_v13 = vadd.f32 6.2831855, %v3291_v11 }
 0xd8c   : > { %vm3299_vm8 = vcmp.lt.f32.partialorder %v3291_v11, -3.1415927  ;;  %v3497_v6 = vmul.f32 %v3481_v34, %v3481_v34  ;;  %vm3277_vm13 = vcmp.gt.f32.partialorder %v3269_v50, 3.1415927 }
 0xd8d   : > { %v3314_v58 = vsel %vm3298_vm15, %v3306_v46, %v3290_v25  ;;  %v3315_v35 = vsel %vm3299_vm8, %v3307_v13, %v3291_v11 }
 0xd8e   : > { %3692 = vrot.lane.b32.xlu1 %v3676_v40, %s6451_s14  ;;  %v3435_v40 = vsub.f32 %v3242_v56, %v7271_v57  ;;  %v3330_v25 = vmul.f32 %v3314_v58, %v3314_v58  ;;  %v3331_v48 = vmul.f32 %v3315_v35, %v3315_v35  ;;  %v3437_v35 = vsub.f32 %v7263_v33, %v7271_v57 }
 0xd8f   : > { %v7294_v52 = vpop.permute.xlu0 %3395 }
 0xd90   : > { %v7316_v26 = vpop.permute.xlu1 %3541  ;;  %vm3443_vm5 = vcmp.gt.f32.partialorder %v3435_v40, 3.1415927  ;;  %vm3445_vm8 = vcmp.gt.f32.partialorder %v3437_v35, 3.1415927 }
 0xd93   : > { %v7297_v54 = vpop.permute.xlu0 %3400 }
 0xd98   : > { %v3538_v60 = vpop.permute.xlu0 %3537 }
 0xd99   : > { %v3568_v20 = vmul.f32 %v5210_v63, %v3538_v60  ;;  %v3313_v63 = vsel %vm3297_vm11, %v3305_v4, %v3289_v37  ;;  %v5205_v60 = vadd.f32 -6.2831855, %v3435_v40  ;;  %v3436_v37 = vsub.f32 %v7259_v10, %v7271_v57  ;;  %v7328_v4 = vpop.permute.xlu1 %3208 }
 0xd9b   : > { %3788 = vrot.lane.b32.xlu1 %v3568_v20, %s6451_s14  ;;  %v3876_v3 = vmul.f32 %v7287_v47, %v3568_v20  ;;  %v3329_v20 = vmul.f32 %v3313_v63, %v3313_v63  ;;  %v3459_v30 = vsel %vm3443_vm5, %v5205_v60, %v3435_v40  ;;  %vm3444_vm9 = vcmp.gt.f32.partialorder %v3436_v37, 3.1415927 }
 0xd9c   : > { %v7309_v18 = vpop.permute.xlu0 %3545  ;;  %v5206_v2 = vadd.f32 -6.2831855, %v3436_v37  ;;  %vm3467_vm11 = vcmp.lt.f32.partialorder %v3459_v30, -3.1415927  ;;  %vm3278_vm5 = vcmp.gt.f32.partialorder %v7326_v5, 3.1415927 }
 0xd9e   : > { %v3460_v11 = vsel %vm3444_vm9, %v5206_v2, %v3436_v37  ;;  %v5192_v2 = vadd.f32 -6.2831855, %v7326_v5 }
 0xd9f   : > { %3892 = vrot.lane.b32.xlu1 %v3876_v3, %s6451_s14  ;;  %v3474_v3 = vadd.f32 6.2831855, %v3458_v8  ;;  %v3476_v37 = vadd.f32 6.2831855, %v3460_v11 }
 0xda0   : > { %v7313_v22 = vpop.permute.xlu0 %3561 }
 0xda5   : > { %v3184_v43 = vpop.permute.xlu0 %3183 }
 0xda6   : > { %v3221_v41 = vsub.f32 %v3184_v43, %v7267_v42  ;;  %v3421_v56 = vsub.f32 %v3184_v43, %v7282_v49  ;;  %v3482_v43 = vsel %vm3466_vm6, %v3474_v3, %v3458_v8  ;;  %v8387_v8 = vmov 0.0  }
 0xda7   : > { %v3498_v60 = vmul.f32 %v3482_v43, %v3482_v43  ;;  %v3308_v3 = vadd.f32 6.2831855, %v3292_v38  ;;  %vm3468_vm6 = vcmp.lt.f32.partialorder %v3460_v11, -3.1415927 }
 0xda8   : > { %v3321_v7 = vmul.f32 %v3221_v41, %v3221_v41  ;;  %v3489_v39 = vmul.f32 %v3421_v56, %v3421_v56  ;;  %v3223_v41 = vsub.f32 %v7273_v61, %v7267_v42  ;;  %v3475_v56 = vadd.f32 6.2831855, %v3459_v30 }
 0xda9   : > { %v3189_v46 = vpop.permute.xlu0 %3188 }
 0xdaa   : > { %v3337_v63 = vadd.f32 %v3329_v20, %v3321_v7  ;;  %v3222_v10 = vsub.f32 %v3189_v46, %v7267_v42  ;;  %v3422_v55 = vsub.f32 %v3189_v46, %v7282_v49  ;;  %v3505_v58 = vadd.f32 %v3497_v6, %v3489_v39  ;;  %v3381_v7 = vpop.permute.xlu1 %3380 }
 0xdab   : > { %v5191_v46 = vadd.f32 -6.2831855, %v3269_v50 }
 0xdac   : > { %v3322_v40 = vmul.f32 %v3222_v10, %v3222_v10  ;;  %vm3345_vm10 = vcmp.lt.f32.partialorder %v3337_v63, 0.001225  ;;  %v3490_v20 = vmul.f32 %v3422_v55, %v3422_v55  ;;  %v3323_v10 = vmul.f32 %v3223_v41, %v3223_v41 }
 0xdad   : > { %v5195_v34 = vsel %vm3345_vm10, 1.0, %v8387_v8  ;;  %v3224_v55 = vsub.f32 %v7280_v17, %v7267_v42  ;;  %vm3513_vm15 = vcmp.lt.f32.partialorder %v3505_v58, 0.0225  ;;  %v3293_v41 = vsel %vm3277_vm13, %v5191_v46, %v3269_v50 }
 0xdae   : > { %v3338_v0 = vadd.f32 %v3330_v25, %v3322_v40  ;;  %v3409_v13 = vmul.f32 %v5195_v34, %v7307_v44  ;;  %v3506_v6 = vadd.f32 %v3498_v60, %v3490_v20  ;;  %v3316_v44 = vsel %vm3300_vm12, %v3308_v3, %v3292_v38  ;;  %v3386_v58 = vpop.permute.xlu1 %3385 }
 0xdaf   : > { %v3483_v25 = vsel %vm3467_vm11, %v3475_v56, %v3459_v30  ;;  %v3423_v40 = vsub.f32 %v7273_v61, %v7282_v49  ;;  %v5211_v33 = vsel %vm3513_vm15, 1.0, %v8387_v8  ;;  %v3324_v60 = vmul.f32 %v3224_v55, %v3224_v55 }
 0xdb0   : > { %vm3346_vm14 = vcmp.lt.f32.partialorder %v3338_v0, 0.001225  ;;  %3586 = vrot.lane.b32.xlu0 %v3409_v13, %s6451_s14  ;;  %v3677_v63 = vmul.f32 %v7287_v47, %v3409_v13  ;;  %v3339_v20 = vadd.f32 %v3331_v48, %v3323_v10  ;;  %v3332_v34 = vmul.f32 %v3316_v44, %v3316_v44  ;;  %v2455_v48 = vld [vmem:[%s8329_s3 + $0x1d0] sm:$0xff]  ;;  %v2456_v0 = vld [vmem:[%s8329_s3 + $0x1d8] sm:$0xff] }
 0xdb1   : > { %v5196_v39 = vsel %vm3346_vm14, 1.0, %v8387_v8  ;;  %vm3514_vm7 = vcmp.lt.f32.partialorder %v3506_v6, 0.0225  ;;  %v3294_v50 = vsel %vm3278_vm5, %v5192_v2, %v7326_v5  ;;  %v3438_v38 = vsub.f32 %v7289_v51, %v7271_v57 }
 0xdb2   : > { %v3410_v43 = vmul.f32 %v5196_v39, %v3381_v7  ;;  %v3499_v61 = vmul.f32 %v3483_v25, %v3483_v25  ;;  %v5207_v30 = vadd.f32 -6.2831855, %v3437_v35  ;;  %v3484_v3 = vsel %vm3468_vm6, %v3476_v37, %v3460_v11  ;;  %v7374_v6 = vpop.permute.xlu1 %3549  ;;  %v3204_v39 = vpop.permute.xlu0 %3203  ;;  %v2457_v37 = vld [vmem:[%s8329_s3 + $0x1e0] sm:$0xff]  ;;  %v2458_v25 = vld [vmem:[%s8329_s3 + $0x1e8] sm:$0xff] }
 0xdb3   : > { %v3569_v56 = vmul.f32 %v5211_v33, %v7316_v26  ;;  %vm3301_vm9 = vcmp.lt.f32.partialorder %v3293_v41, -3.1415927  ;;  %v3309_v5 = vadd.f32 6.2831855, %v3293_v41  ;;  %v3491_v13 = vmul.f32 %v3423_v40, %v3423_v40 }
 0xdb4   : > { %3694 = vrot.lane.b32.xlu0 %v3677_v63, %s6451_s14  ;;  %3588 = vrot.lane.b32.xlu1 %v3410_v43, %s6451_s14  ;;  %v3678_v7 = vmul.f32 %v7287_v47, %v3410_v43  ;;  %v5212_v51 = vsel %vm3514_vm7, 1.0, %v8387_v8  ;;  %v3424_v11 = vsub.f32 %v7280_v17, %v7282_v49  ;;  %vm3347_vm10 = vcmp.lt.f32.partialorder %v3339_v20, 0.001225 }
 0xdb5   : > { %v3340_v26 = vadd.f32 %v3332_v34, %v3324_v60  ;;  %v6077_v46 = vpack.c.bf16 %v2456_v0, %v2455_v48  ;;  %v3310_v10 = vadd.f32 6.2831855, %v3294_v50  ;;  %vm3446_vm11 = vcmp.gt.f32.partialorder %v3438_v38, 3.1415927 }
 0xdb6   : > { %v5208_v55 = vadd.f32 -6.2831855, %v3438_v38  ;;  %v3461_v2 = vsel %vm3445_vm8, %v5207_v30, %v3437_v35  ;;  %vm3302_vm12 = vcmp.lt.f32.partialorder %v3294_v50, -3.1415927  ;;  %v3877_v44 = vmul.f32 %v7287_v47, %v3569_v56  ;;  %v3391_v48 = vpop.permute.xlu1 %3390 }
 0xdb7   : > { %v3570_v17 = vmul.f32 %v5212_v51, %v7309_v18  ;;  %6078 = vmatprep.subr.bf16.mxu0 %v6077_v46  ;;  %v5197_v63 = vsel %vm3347_vm10, 1.0, %v8387_v8  ;;  %v3317_v43 = vsel %vm3301_vm9, %v3309_v5, %v3293_v41  ;;  %v3500_v35 = vmul.f32 %v3484_v3, %v3484_v3 }
 0xdb8   : > { %3790 = vrot.lane.b32.xlu0 %v3569_v56, %s6451_s14  ;;  %3696 = vrot.lane.b32.xlu1 %v3678_v7, %s6451_s14  ;;  %v6081_v40 = vpack.c.bf16 %v2458_v25, %v2457_v37  ;;  %v3492_v33 = vmul.f32 %v3424_v11, %v3424_v11  ;;  %v3507_v60 = vadd.f32 %v3499_v61, %v3491_v13  ;;  %vm3348_vm13 = vcmp.lt.f32.partialorder %v3340_v26, 0.001225  ;;  %v2459_v61 = vld [vmem:[%s8329_s3 + $0x1f0] sm:$0xff]  ;;  %v2460_v7 = vld [vmem:[%s8329_s3 + $0x1f8] sm:$0xff] }
 0xdb9   : > { %6080 = vmatpush3.bf16.msra.mxu0 %v6077_v46  ;;  %v3225_v18 = vsub.f32 %v3204_v39, %v7267_v42  ;;  %v3462_v34 = vsel %vm3446_vm11, %v5208_v55, %v3438_v38  ;;  %v3318_v30 = vsel %vm3302_vm12, %v3310_v10, %v3294_v50  ;;  %v3477_v20 = vadd.f32 6.2831855, %v3461_v2  ;;  %v2461_v10 = vld [vmem:[%s8329_s3 + $0x200] sm:$0xff]  ;;  %v2462_v55 = vld [vmem:[%s8329_s3 + $0x208] sm:$0xff] }
 0xdba   : > { %6082 = vmatprep.subr.bf16.mxu0 %v6081_v40  ;;  %v3271_v41 = vsub.f32 %v7277_v24, %v7256_v28  ;;  %v3411_v3 = vmul.f32 %v5197_v63, %v3386_v58  ;;  %v3878_v56 = vmul.f32 %v7287_v47, %v3570_v17  ;;  %v5198_v38 = vsel %vm3348_vm13, 1.0, %v8387_v8 }
 0xdbb   : > { %v3333_v50 = vmul.f32 %v3317_v43, %v3317_v43  ;;  %vm3469_vm14 = vcmp.lt.f32.partialorder %v3461_v2, -3.1415927  ;;  %v6085_v0 = vpack.c.bf16 %v2460_v7, %v2459_v61  ;;  %v3226_v28 = vsub.f32 %v7328_v4, %v7267_v42 }
 0xdbc   : > { %3894 = vrot.lane.b32.xlu0 %v3877_v44, %s6451_s14  ;;  %3792 = vrot.lane.b32.xlu1 %v3570_v17, %s6451_s14  ;;  %vm3515_vm15 = vcmp.lt.f32.partialorder %v3507_v60, 0.0225  ;;  %v3325_v58 = vmul.f32 %v3225_v18, %v3225_v18  ;;  %v3508_v5 = vadd.f32 %v3500_v35, %v3492_v33  ;;  %v3478_v13 = vadd.f32 6.2831855, %v3462_v34 }
 0xdbd   : > { %6084 = vmatpush3.bf16.msra.mxu0 %v6081_v40  ;;  %v3334_v51 = vmul.f32 %v3318_v30, %v3318_v30  ;;  %v5193_v11 = vadd.f32 -6.2831855, %v3271_v41  ;;  %v3679_v26 = vmul.f32 %v7287_v47, %v3411_v3  ;;  %vm3470_vm5 = vcmp.lt.f32.partialorder %v3462_v34, -3.1415927  ;;  %v3554_v30 = vpop.permute.xlu1 %3553 }
 0xdbe   : > { %6086 = vmatprep.subr.bf16.mxu0 %v6085_v0  ;;  %v3412_v46 = vmul.f32 %v5198_v38, %v3391_v48  ;;  %vm3279_vm6 = vcmp.gt.f32.partialorder %v3271_v41, 3.1415927  ;;  %v5213_v44 = vsel %vm3515_vm15, 1.0, %v8387_v8  ;;  %v3485_v17 = vsel %vm3469_vm14, %v3477_v20, %v3461_v2 }
 0xdbf   : > { %v6089_v37 = vpack.c.bf16 %v2462_v55, %v2461_v10  ;;  %v3326_v25 = vmul.f32 %v3226_v28, %v3226_v28  ;;  %v3341_v63 = vadd.f32 %v3333_v50, %v3325_v58  ;;  %v3425_v43 = vsub.f32 %v3204_v39, %v7282_v49 }
 0xdc0   : > { %3896 = vrot.lane.b32.xlu1 %v3878_v56, %s6451_s14  ;;  %3590 = vrot.lane.b32.xlu0 %v3411_v3, %s6451_s14  ;;  %vm3516_vm7 = vcmp.lt.f32.partialorder %v3508_v5, 0.0225  ;;  %v3295_v35 = vsel %vm3279_vm6, %v5193_v11, %v3271_v41  ;;  %v3439_v40 = vsub.f32 %v7277_v24, %v7271_v57  ;;  %v3571_v33 = vmul.f32 %v5213_v44, %v7374_v6  ;;  %v3214_v24 = vpop.permute.xlu0 %3213 }
 0xdc1   : > { %6088 = vmatpush3.bf16.msra.mxu0 %v6085_v0  ;;  %v3680_v2 = vmul.f32 %v7287_v47, %v3412_v46  ;;  %v3486_v60 = vsel %vm3470_vm5, %v3478_v13, %v3462_v34  ;;  %v5214_v18 = vsel %vm3516_vm7, 1.0, %v8387_v8  ;;  %v3501_v39 = vmul.f32 %v3485_v17, %v3485_v17  ;;  %v3558_v17 = vpop.permute.xlu1 %3557 }
 0xdc2   : > { %6090 = vmatprep.subr.bf16.mxu0 %v6089_v37  ;;  %v3342_v20 = vadd.f32 %v3334_v51, %v3326_v25  ;;  %v3426_v3 = vsub.f32 %v7328_v4, %v7282_v49  ;;  %v3493_v56 = vmul.f32 %v3425_v43, %v3425_v43  ;;  %vm3349_vm8 = vcmp.lt.f32.partialorder %v3341_v63, 0.001225 }
 0xdc3   : > { %v3311_v57 = vadd.f32 6.2831855, %v3295_v35  ;;  %v8388_v6 = vmov 0.0|0.0   ;;  %v5209_v34 = vadd.f32 -6.2831855, %v3439_v40  ;;  %v3879_v41 = vmul.f32 %v7287_v47, %v3571_v33 }
 0xdc4   : > { %3698 = vrot.lane.b32.xlu0 %v3679_v26, %s6451_s14  ;;  %3592 = vrot.lane.b32.xlu1 %v3412_v46, %s6451_s14  ;;  %v3572_v61 = vmul.f32 %v5214_v18, %v3554_v30  ;;  %vm3303_vm9 = vcmp.lt.f32.partialorder %v3295_v35, -3.1415927  ;;  %vm3447_vm10 = vcmp.gt.f32.partialorder %v3439_v40, 3.1415927  ;;  %v3502_v7 = vmul.f32 %v3486_v60, %v3486_v60 }
 0xdc5   : > { %6092 = vmatpush3.bf16.msra.mxu0 %v6089_v37  ;;  %v5199_v38 = vsel %vm3349_vm8, 1.0, %v8387_v8  ;;  %v3494_v4 = vmul.f32 %v3426_v3, %v3426_v3  ;;  %v3227_v48 = vsub.f32 %v3214_v24, %v7267_v42  ;;  %v3509_v50 = vadd.f32 %v3501_v39, %v3493_v56  ;;  %v3406_v60 = vpop.permute.xlu1 %3405 }
 0xdc6   : > { %6109 = vmatprep.subr.bf16.mxu0 %v8388_v6  ;;  %vm3350_vm11 = vcmp.lt.f32.partialorder %v3342_v20, 0.001225  ;;  %v3319_v0 = vsel %vm3303_vm9, %v3311_v57, %v3295_v35  ;;  %v3463_v28 = vsel %vm3447_vm10, %v5209_v34, %v3439_v40  ;;  %v3880_v58 = vmul.f32 %v7287_v47, %v3572_v61 }
 0xdc7   : > { %v3413_v5 = vmul.f32 %v5199_v38, %v7294_v52  ;;  %v5200_v13 = vsel %vm3350_vm11, 1.0, %v8387_v8  ;;  %v3510_v51 = vadd.f32 %v3502_v7, %v3494_v4  ;;  %v3327_v11 = vmul.f32 %v3227_v48, %v3227_v48  ;;  %v7469_v7 = vld [vmem:[%s6538_s28] sm:$0xff] }
 0xdc8   : > { %3794 = vrot.lane.b32.xlu0 %v3571_v33, %s6451_s14  ;;  %3700 = vrot.lane.b32.xlu1 %v3680_v2, %s6451_s14  ;;  %vm3517_vm12 = vcmp.lt.f32.partialorder %v3509_v50, 0.0225  ;;  %v3335_v26 = vmul.f32 %v3319_v0, %v3319_v0  ;;  %v3479_v42 = vadd.f32 6.2831855, %v3463_v28  ;;  %vm3471_vm13 = vcmp.lt.f32.partialorder %v3463_v28, -3.1415927 }
 0xdc9   : > { %v3681_v46 = vmul.f32 %v7287_v47, %v3413_v5  ;;  %v3414_v10 = vmul.f32 %v5200_v13, %v7297_v54  ;;  %v5215_v55 = vsel %vm3517_vm12, 1.0, %v8387_v8  ;;  %vm3518_vm14 = vcmp.lt.f32.partialorder %v3510_v51, 0.0225  ;;  %v3566_v20 = vpop.permute.xlu1 %3565 }
 0xdca   : > { %v3427_v52 = vsub.f32 %v3214_v24, %v7282_v49  ;;  %v3343_v44 = vadd.f32 %v3335_v26, %v3327_v11  ;;  %v3487_v37 = vsel %vm3471_vm13, %v3479_v42, %v3463_v28  ;;  %v3573_v25 = vmul.f32 %v5215_v55, %v3558_v17  ;;  %v7491_v17 = vld [vmem:[%s6538_s28 + $0x18] sm:$0xff] }
 0xdcb   : > { %v3682_v63 = vmul.f32 %v7287_v47, %v3414_v10  ;;  %v5216_v43 = vsel %vm3518_vm14, 1.0, %v8387_v8  ;;  %v3503_v54 = vmul.f32 %v3487_v37, %v3487_v37  ;;  %v4016_v55 = vadd.f32 0.5, %v7469_v7 }
 0xdcc   : > { %3898 = vrot.lane.b32.xlu0 %v3879_v41, %s6451_s14  ;;  %3796 = vrot.lane.b32.xlu1 %v3572_v61, %s6451_s14  ;;  %v3495_v35 = vmul.f32 %v3427_v52, %v3427_v52  ;;  %vm3351_vm15 = vcmp.lt.f32.partialorder %v3343_v44, 0.001225  ;;  %v3574_v49 = vmul.f32 %v5216_v43, %v7313_v22  ;;  %v3881_v40 = vmul.f32 %v7287_v47, %v3573_v25 }
 0xdcd   : > { %v5201_v33 = vsel %vm3351_vm15, 1.0, %v8387_v8  ;;  %vm8374_vm6 = vcmask 269568   ;;  %vm8373_vm7 = vcmask 277768   ;;  %vm3998_vm8 = vcmask 285968  }
 0xdce   : > { %v3511_v2 = vadd.f32 %v3503_v54, %v3495_v35  ;;  %v3882_v18 = vmul.f32 %v7287_v47, %v3574_v49  ;;  %v3415_v30 = vmul.f32 %v5201_v33, %v3406_v60  ;;  %v4017_v60 = vadd.f32 0.5, %v7164_v9 }
 0xdcf   : > { %vm4007_vm9 = vcmask 294168   ;;  %vm4264_vm10 = vcmask 7168   ;;  %vm4273_vm11 = vcmask 15360   ;;  %vm4282_vm12 = vcmask 23552  }
 0xdd0   : > { %3594 = vrot.lane.b32.xlu0 %v3413_v5, %s6451_s14  ;;  %3900 = vrot.lane.b32.xlu1 %v3880_v58, %s6451_s14  ;;  %vm3519_vm5 = vcmp.lt.f32.partialorder %v3511_v2, 0.0225  ;;  %v3683_v22 = vmul.f32 %v7287_v47, %v3415_v30  ;;  %vm4291_vm13 = vcmask 31744   ;;  %vm8378_vm14 = vcmask 39936  }
 0xdd1   : > { %v5217_v39 = vsel %vm3519_vm5, 1.0, %v8387_v8  ;;  %vm8377_vm15 = vcmask 48128   ;;  %vm8376_vm5 = vcmask 56320  }
 0xdd2   : > { %v3575_v3 = vmul.f32 %v5217_v39, %v3566_v20 }
 0xdd4   : > { %3702 = vrot.lane.b32.xlu0 %v3681_v46, %s6451_s14  ;;  %3596 = vrot.lane.b32.xlu1 %v3414_v10, %s6451_s14  ;;  %v3883_v56 = vmul.f32 %v7287_v47, %v3575_v3 }
 0xdd8   : > { %3704 = vrot.lane.b32.xlu1 %v3682_v63, %s6451_s14  ;;  %3798 = vrot.lane.b32.xlu0 %v3573_v25, %s6451_s14  ;;  %v4024_v63 = vmul.f32 1.442695, %v4016_v55  ;;  %v7550_v55 = vld [vmem:[%s6538_s28 + $0x30] sm:$0xff] }
 0xdda   : > { %6376 = vpow2.f32 %v4024_v63 }
 0xddc   : > { %3800 = vrot.lane.b32.xlu1 %v3574_v49, %s6451_s14  ;;  %3902 = vrot.lane.b32.xlu0 %v3881_v40, %s6451_s14 }
 0xde0   : > { %3904 = vrot.lane.b32.xlu1 %v3882_v18, %s6451_s14  ;;  %3598 = vrot.lane.b32.xlu0 %v3415_v30, %s6451_s14  ;;  %v2787_v18 = vrot.slane %v7269_v45, %v6943_v53 }
 0xde4   : > { %3706 = vrot.lane.b32.xlu0 %v3683_v22, %s6451_s14  ;;  %v7515_v53 = vpop.eup %6376 }
 0xde8   : > { %3802 = vrot.lane.b32.xlu0 %v3575_v3, %s6451_s14  ;;  %v5178_v3 = vld [vmem:[%s8330_s4 + $0xd] ss:$0 sm:$0xff] }
 0xdec   : > { %3906 = vrot.lane.b32.xlu0 %v3883_v56, %s6451_s14  ;;  %s6479_s14 = smov 41  }
 0xdfc   : > { %v3585_v57 = vpop.permute.xlu1 %3584 }
 0xdfd   : > { %v3608_v24 = vmul.f32 %v7113_v59, %v3585_v57 }
 0xdff   : > { %3624 = vrot.lane.b32.xlu1 %v3608_v24, %s6461_s11  ;;  %v4026_v24 = vmul.f32 1.442695, %v4017_v60 }
 0xe00   : > { %v3693_v34 = vpop.permute.xlu1 %3692 }
 0xe01   : > { %v3716_v41 = vmul.f32 %v7113_v59, %v3693_v34  ;;  %6378 = vpow2.f32 %v4026_v24 }
 0xe03   : > { %3732 = vrot.lane.b32.xlu1 %v3716_v41, %s6461_s11 }
 0xe0d   : > { %v3789_v61 = vpop.permute.xlu1 %3788 }
 0xe0e   : > { %v3812_v38 = vmul.f32 %v7469_v7, %v3789_v61 }
 0xe10   : > { %3828 = vrot.lane.b32.xlu1 %v3812_v38, %s6461_s11  ;;  %v7518_v38 = vld [vmem:[%s6538_s28 + $0x28] sm:$0xff] }
 0xe11   : > { %v3893_v47 = vpop.permute.xlu1 %3892 }
 0xe12   : > { %v3916_v4 = vmul.f32 %v7469_v7, %v3893_v47 }
 0xe14   : > { %3932 = vrot.lane.b32.xlu1 %v3916_v4, %s6461_s11 }
 0xe22   : > { %v3587_v48 = vpop.permute.xlu0 %3586 }
 0xe23   : > { %v3609_v50 = vmul.f32 %v7164_v9, %v3587_v48 }
 0xe25   : > { %3626 = vrot.lane.b32.xlu0 %v3609_v50, %s6461_s11 }
 0xe26   : > { %v3695_v59 = vpop.permute.xlu0 %3694  ;;  %v3589_v0 = vpop.permute.xlu1 %3588 }
 0xe27   : > { %v3717_v28 = vmul.f32 %v7164_v9, %v3695_v59  ;;  %v3610_v58 = vmul.f32 %v7168_v16, %v3589_v0 }
 0xe29   : > { %3734 = vrot.lane.b32.xlu0 %v3717_v28, %s6461_s11  ;;  %3628 = vrot.lane.b32.xlu1 %v3610_v58, %s6461_s11  ;;  %v7533_v28 = vld [vmem:[%s6538_s28 + $0x20] sm:$0xff] }
 0xe2a   : > { %v3791_v5 = vpop.permute.xlu0 %3790  ;;  %v3697_v13 = vpop.permute.xlu1 %3696 }
 0xe2b   : > { %v3813_v51 = vmul.f32 %v7164_v9, %v3791_v5  ;;  %v3718_v11 = vmul.f32 %v7168_v16, %v3697_v13 }
 0xe2d   : > { %3830 = vrot.lane.b32.xlu0 %v3813_v51, %s6461_s11  ;;  %3736 = vrot.lane.b32.xlu1 %v3718_v11, %s6461_s11  ;;  %v7538_v51 = vld [vmem:[%s6538_s28 + $0x10] sm:$0xff] }
 0xe2e   : > { %v3895_v26 = vpop.permute.xlu0 %3894  ;;  %v3793_v42 = vpop.permute.xlu1 %3792  ;;  %v4018_v11 = vadd.f32 0.5, %v7538_v51 }
 0xe2f   : > { %v3917_v46 = vmul.f32 %v7164_v9, %v3895_v26  ;;  %v3814_v10 = vmul.f32 %v7168_v16, %v3793_v42  ;;  %v7543_v26 = vpop.eup %6378 }
 0xe30   : > { %v4028_v42 = vmul.f32 1.442695, %v4018_v11  ;;  %v2467_v11 = vld [vmem:[%s8329_s3 + $0x230] sm:$0xff] }
 0xe31   : > { %3934 = vrot.lane.b32.xlu0 %v3917_v46, %s6461_s11  ;;  %3832 = vrot.lane.b32.xlu1 %v3814_v10, %s6461_s11 }
 0xe32   : > { %v3591_v52 = vpop.permute.xlu0 %3590  ;;  %v3897_v44 = vpop.permute.xlu1 %3896  ;;  %6380 = vpow2.f32 %v4028_v42 }
 0xe33   : > { %v3611_v37 = vmul.f32 %v7491_v17, %v3591_v52  ;;  %v3918_v25 = vmul.f32 %v7168_v16, %v3897_v44 }
 0xe35   : > { %3630 = vrot.lane.b32.xlu0 %v3611_v37, %s6461_s11  ;;  %3936 = vrot.lane.b32.xlu1 %v3918_v25, %s6461_s11 }
 0xe36   : > { %v3699_v43 = vpop.permute.xlu0 %3698  ;;  %v3593_v35 = vpop.permute.xlu1 %3592 }
 0xe37   : > { %v3719_v54 = vmul.f32 %v7491_v17, %v3699_v43  ;;  %v3612_v49 = vmul.f32 %v7178_v23, %v3593_v35  ;;  %v4019_v43 = vadd.f32 0.5, %v7491_v17 }
 0xe39   : > { %3738 = vrot.lane.b32.xlu0 %v3719_v54, %s6461_s11  ;;  %3632 = vrot.lane.b32.xlu1 %v3612_v49, %s6461_s11  ;;  %v4030_v54 = vmul.f32 1.442695, %v4019_v43  ;;  %v4020_v49 = vadd.f32 0.5, %v7533_v28  ;;  %v2470_v43 = vld [vmem:[%s8329_s3 + $0x248] sm:$0xff] }
 0xe3a   : > { %v3795_v40 = vpop.permute.xlu0 %3794  ;;  %v3701_v33 = vpop.permute.xlu1 %3700 }
 0xe3b   : > { %v3815_v16 = vmul.f32 %v7491_v17, %v3795_v40  ;;  %v3720_v2 = vmul.f32 %v7178_v23, %v3701_v33  ;;  %6382 = vpow2.f32 %v4030_v54  ;;  %v4032_v60 = vmul.f32 1.442695, %v4020_v49 }
 0xe3c   : > { %v7566_v40 = vpop.eup %6380 }
 0xe3d   : > { %3834 = vrot.lane.b32.xlu0 %v3815_v16, %s6461_s11  ;;  %3740 = vrot.lane.b32.xlu1 %v3720_v2, %s6461_s11  ;;  %v7569_v16 = vld [vmem:[%s6538_s28 + $0x38] sm:$0xff]  ;;  %6384 = vpow2.f32 %v4032_v60 }
 0xe3e   : > { %v3899_v30 = vpop.permute.xlu0 %3898  ;;  %v3797_v22 = vpop.permute.xlu1 %3796 }
 0xe3f   : > { %v3919_v39 = vmul.f32 %v7491_v17, %v3899_v30  ;;  %v3816_v20 = vmul.f32 %v7178_v23, %v3797_v22 }
 0xe41   : > { %v5750_v56 = vpop.f32.mrb[24].mxu1  ;;  %3938 = vrot.lane.b32.xlu0 %v3919_v39, %s6461_s11  ;;  %3836 = vrot.lane.b32.xlu1 %v3816_v20, %s6461_s11 }
 0xe42   : > { %v2789_v9 = vadd.f32 %v5750_v56, %v2787_v18  ;;  %v2702_v57 = vpop.f32.mrb[25].mxu1  ;;  %v3595_v41 = vpop.permute.xlu0 %3594  ;;  %v4022_v56 = vadd.f32 0.5, %v7550_v55 }
 0xe43   : > { %v2788_v34 = vadd.f32 %v2787_v18, %v2702_v57  ;;  %v3613_v23 = vmul.f32 %v7518_v38, %v3595_v41  ;;  %v3901_v48 = vpop.permute.xlu1 %3900 }
 0xe44   : > { %v2795_v45 = vadd.f32 %v5178_v3, %v2789_v9  ;;  %v3920_v58 = vmul.f32 %v7533_v28, %v3901_v48  ;;  %v4036_v24 = vmul.f32 1.442695, %v4022_v56 }
 0xe45   : > { %v2794_v61 = vadd.f32 %v5178_v3, %v2788_v34  ;;  %3634 = vrot.lane.b32.xlu0 %v3613_v23, %s6461_s11  ;;  %4048 = vrot.lane.b32.xlu1 %v7515_v53, %s6462_s25  ;;  %v4021_v3 = vadd.f32 0.5, %v7518_v38  ;;  %v7585_v9 = vpop.eup %6382 }
 0xe46   : > { %v2797_v4 = vmax.f32 %v2795_v45, 0.0  ;;  %v3703_v50 = vpop.permute.xlu0 %3702 }
 0xe47   : > { %v2796_v47 = vmax.f32 %v2794_v61, 0.0  ;;  %v3721_v59 = vmul.f32 %v7518_v38, %v3703_v50  ;;  %v3597_v13 = vpop.permute.xlu1 %3596  ;;  %v4034_v57 = vmul.f32 1.442695, %v4021_v3  ;;  %v7591_v34 = vpop.eup %6384  ;;  %v4023_v61 = vadd.f32 0.5, %v7569_v16 }
 0xe48   : > { %v3614_v52 = vmul.f32 %v7550_v55, %v3597_v13  ;;  %v2466_v13 = vld [vmem:[%s8329_s3 + $0x228] sm:$0xff] }
 0xe49   : > { %5778 = vmatprep.mubr.msk.f32.mxu0 %vm305_vm2, %v2796_v47  ;;  %3742 = vrot.lane.b32.xlu0 %v3721_v59, %s6461_s11  ;;  %6386 = vpow2.f32 %v4034_v57  ;;  %v4038_v23 = vmul.f32 1.442695, %v4023_v61  ;;  %v2463_v59 = vld [vmem:[%s8329_s3 + $0x210] sm:$0xff] }
 0xe4a   : > { %5779 = vmatmul.mubr.msk.f32.vlgmr.msra.gmra.mrb[32].mxu0 %vm305_vm2, %v2797_v4  ;;  %4080 = vrot.lane.b32.xlu1 %v7515_v53, %s6458_s10  ;;  %v3799_v0 = vpop.permute.xlu0 %3798  ;;  %6388 = vpow2.f32 %v4036_v24 }
 0xe4b   : > { %5804 = vmatprep.mubr.msk.f32.mxu0 %vm6453_vm4, %v8387_v8  ;;  %v3817_v5 = vmul.f32 %v7518_v38, %v3799_v0  ;;  %v3705_v46 = vpop.permute.xlu1 %3704  ;;  %6390 = vpow2.f32 %v4038_v23  ;;  %v2464_v0 = vld [vmem:[%s8329_s3 + $0x218] sm:$0xff] }
 0xe4c   : > { %v3722_v44 = vmul.f32 %v7550_v55, %v3705_v46  ;;  %v2468_v46 = vld [vmem:[%s8329_s3 + $0x238] sm:$0xff] }
 0xe4d   : > { %3838 = vrot.lane.b32.xlu0 %v3817_v5, %s6461_s11  ;;  %v2465_v5 = vld [vmem:[%s8329_s3 + $0x220] sm:$0xff] }
 0xe4e   : > { %3940 = vrot.lane.b32.xlu1 %v3920_v58, %s6461_s11  ;;  %v3903_v10 = vpop.permute.xlu0 %3902  ;;  %v6093_v58 = vpack.c.bf16 %v2464_v0, %v2463_v59  ;;  %v6097_v42 = vpack.c.bf16 %v2466_v13, %v2465_v5 }
 0xe4f   : > { %v3921_v37 = vmul.f32 %v7518_v38, %v3903_v10  ;;  %v3801_v25 = vpop.permute.xlu1 %3800 }
 0xe50   : > { %v3818_v35 = vmul.f32 %v7550_v55, %v3801_v25  ;;  %6094 = vmatprep.subr.bf16.mxu1 %v6093_v58 }
 0xe51   : > { %4050 = vrot.lane.b32.xlu0 %v7543_v26, %s6462_s25  ;;  %6096 = vmatpush3.bf16.msra.mxu1 %v6093_v58 }
 0xe52   : > { %4112 = vrot.lane.b32.xlu1 %v7515_v53, %s6455_s15  ;;  %v3599_v63 = vpop.permute.xlu0 %3598  ;;  %6098 = vmatprep.subr.bf16.mxu1 %v6097_v42 }
 0xe53   : > { %v3615_v2 = vmul.f32 %v7569_v16, %v3599_v63  ;;  %v3905_v30 = vpop.permute.xlu1 %3904  ;;  %v7602_v47 = vpop.eup %6386  ;;  %v2469_v63 = vld [vmem:[%s8329_s3 + $0x240] sm:$0xff] }
 0xe54   : > { %v3922_v39 = vmul.f32 %v7550_v55, %v3905_v30  ;;  %v7608_v4 = vpop.eup %6388 }
 0xe55   : > { %4082 = vrot.lane.b32.xlu0 %v7543_v26, %s6458_s10  ;;  %v7622_v48 = vpop.eup %6390  ;;  %6100 = vmatpush3.bf16.msra.mxu1 %v6097_v42 }
 0xe56   : > { %3636 = vrot.lane.b32.xlu1 %v3614_v52, %s6461_s11  ;;  %v3707_v33 = vpop.permute.xlu0 %3706  ;;  %v6101_v52 = vpack.c.bf16 %v2468_v46, %v2467_v11 }
 0xe57   : > { %v3723_v18 = vmul.f32 %v7569_v16, %v3707_v33 }
 0xe58   : > { %6102 = vmatprep.subr.bf16.mxu1 %v6101_v52 }
 0xe59   : > { %3942 = vrot.lane.b32.xlu0 %v3921_v37, %s6461_s11  ;;  %6104 = vmatpush3.bf16.msra.mxu1 %v6101_v52 }
 0xe5a   : > { %3744 = vrot.lane.b32.xlu1 %v3722_v44, %s6461_s11  ;;  %v3803_v22 = vpop.permute.xlu0 %3802 }
 0xe5b   : > { %v3819_v20 = vmul.f32 %v7569_v16, %v3803_v22 }
 0xe5d   : > { %4114 = vrot.lane.b32.xlu0 %v7543_v26, %s6455_s15 }
 0xe5e   : > { %3840 = vrot.lane.b32.xlu1 %v3818_v35, %s6461_s11  ;;  %v3907_v45 = vpop.permute.xlu0 %3906  ;;  %v6105_v35 = vpack.c.bf16 %v2470_v43, %v2469_v63 }
 0xe5f   : > { %v3923_v41 = vmul.f32 %v7569_v16, %v3907_v45 }
 0xe60   : > { %6106 = vmatprep.subr.bf16.mxu1 %v6105_v35 }
 0xe61   : > { %3638 = vrot.lane.b32.xlu0 %v3615_v2, %s6461_s11  ;;  %6108 = vmatpush3.bf16.msra.mxu1 %v6105_v35 }
 0xe62   : > { %4052 = vrot.lane.b32.xlu1 %v7566_v40, %s6462_s25  ;;  %6124 = vmatprep.subr.bf16.mxu1 %v8388_v6 }
 0xe65   : > { %3746 = vrot.lane.b32.xlu0 %v3723_v18, %s6461_s11 }
 0xe66   : > { %4084 = vrot.lane.b32.xlu1 %v7566_v40, %s6458_s10 }
 0xe69   : > { %3842 = vrot.lane.b32.xlu0 %v3819_v20, %s6461_s11 }
 0xe6a   : > { %3944 = vrot.lane.b32.xlu1 %v3922_v39, %s6461_s11 }
 0xe6d   : > { %4054 = vrot.lane.b32.xlu0 %v7585_v9, %s6462_s25 }
 0xe6e   : > { %4116 = vrot.lane.b32.xlu1 %v7566_v40, %s6455_s15 }
 0xe71   : > { %4086 = vrot.lane.b32.xlu0 %v7585_v9, %s6458_s10  ;;  %v3625_v50 = vpop.permute.xlu1 %3624 }
 0xe72   : > { %4056 = vrot.lane.b32.xlu1 %v7591_v34, %s6462_s25  ;;  %v3648_v56 = vsel %vm1210_vm3, %v3625_v50, 0.0 }
 0xe75   : > { %3946 = vrot.lane.b32.xlu0 %v3923_v41, %s6461_s11  ;;  %v3733_v10 = vpop.permute.xlu1 %3732  ;;  %s6476_s11 = smov 38  }
 0xe76   : > { %4088 = vrot.lane.b32.xlu1 %v7591_v34, %s6458_s10  ;;  %v3756_v45 = vsel %vm1210_vm3, %v3733_v10, 0.0 }
 0xe79   : > { %4118 = vrot.lane.b32.xlu0 %v7585_v9, %s6455_s15 }
 0xe7a   : > { %4120 = vrot.lane.b32.xlu1 %v7591_v34, %s6455_s15 }
 0xe7d   : > { %4058 = vrot.lane.b32.xlu0 %v7602_v47, %s6462_s25 }
 0xe7e   : > { %4060 = vrot.lane.b32.xlu1 %v7608_v4, %s6462_s25 }
 0xe81   : > { %4090 = vrot.lane.b32.xlu0 %v7602_v47, %s6458_s10 }
 0xe82   : > { %4092 = vrot.lane.b32.xlu1 %v7608_v4, %s6458_s10  ;;  %v3829_v37 = vpop.permute.xlu1 %3828 }
 0xe83   : > { %v3852_v59 = vsel %vm1210_vm3, %v3829_v37, 0.0 }
 0xe85   : > { %4122 = vrot.lane.b32.xlu0 %v7602_v47, %s6455_s15 }
 0xe86   : > { %4124 = vrot.lane.b32.xlu1 %v7608_v4, %s6455_s15  ;;  %v3933_v54 = vpop.permute.xlu1 %3932 }
 0xe87   : > { %v3956_v5 = vsel %vm1210_vm3, %v3933_v54, 0.0 }
 0xe89   : > { %4062 = vrot.lane.b32.xlu0 %v7622_v48, %s6462_s25 }
 0xe8d   : > { %4094 = vrot.lane.b32.xlu0 %v7622_v48, %s6458_s10 }
 0xe91   : > { %4126 = vrot.lane.b32.xlu0 %v7622_v48, %s6455_s15 }
 0xe97   : > { %v3627_v44 = vpop.permute.xlu0 %3626 }
 0xe98   : > { %v3651_v30 = vsel %vm1210_vm3, %v3627_v44, 0.0 }
 0xe9b   : > { %v3735_v25 = vpop.permute.xlu0 %3734  ;;  %v3629_v33 = vpop.permute.xlu1 %3628 }
 0xe9c   : > { %v3759_v39 = vsel %vm1210_vm3, %v3735_v25, 0.0  ;;  %v3654_v42 = vsel %vm1210_vm3, %v3629_v33, 0.0 }
 0xe9f   : > { %v3831_v49 = vpop.permute.xlu0 %3830  ;;  %v3737_v18 = vpop.permute.xlu1 %3736 }
 0xea0   : > { %v3855_v57 = vsel %vm1210_vm3, %v3831_v49, 0.0  ;;  %v3762_v52 = vsel %vm1210_vm3, %v3737_v18, 0.0 }
 0xea3   : > { %v3935_v2 = vpop.permute.xlu0 %3934  ;;  %v3833_v20 = vpop.permute.xlu1 %3832 }
 0xea4   : > { %v3959_v61 = vsel %vm1210_vm3, %v3935_v2, 0.0  ;;  %v3858_v63 = vsel %vm1210_vm3, %v3833_v20, 0.0 }
 0xea7   : > { %v3631_v60 = vpop.permute.xlu0 %3630  ;;  %v3937_v41 = vpop.permute.xlu1 %3936 }
 0xea8   : > { %v3657_v0 = vsel %vm1210_vm3, %v3631_v60, 0.0  ;;  %v3962_v54 = vsel %vm1210_vm3, %v3937_v41, 0.0 }
 0xeaa   : > { %3652 = vadd.xlane.f32.xlu1 %v3651_v30 }
 0xeab   : > { %v3739_v22 = vpop.permute.xlu0 %3738  ;;  %v3633_v50 = vpop.permute.xlu1 %3632 }
 0xeac   : > { %v3765_v13 = vsel %vm1210_vm3, %v3739_v22, 0.0  ;;  %v3660_v2 = vsel %vm1210_vm3, %v3633_v50, 0.0 }
 0xeae   : > { %3760 = vadd.xlane.f32.xlu1 %v3759_v39 }
 0xeaf   : > { %v3835_v3 = vpop.permute.xlu0 %3834  ;;  %v3741_v46 = vpop.permute.xlu1 %3740 }
 0xeb0   : > { %3649 = vadd.xlane.f32.xlu0 %v3648_v56  ;;  %v3861_v10 = vsel %vm1210_vm3, %v3835_v3, 0.0  ;;  %v3768_v22 = vsel %vm1210_vm3, %v3741_v46, 0.0 }
 0xeb2   : > { %3856 = vadd.xlane.f32.xlu1 %v3855_v57 }
 0xeb3   : > { %v3939_v24 = vpop.permute.xlu0 %3938  ;;  %v3837_v25 = vpop.permute.xlu1 %3836 }
 0xeb4   : > { %3757 = vadd.xlane.f32.xlu0 %v3756_v45  ;;  %v3965_v44 = vsel %vm1210_vm3, %v3939_v24, 0.0  ;;  %v3864_v20 = vsel %vm1210_vm3, %v3837_v25, 0.0  ;;  %v6413_v24 = vld [vmem:[%s6538_s28 + $0x8] sm:$0xff] }
 0xeb6   : > { %3960 = vadd.xlane.f32.xlu1 %v3959_v61 }
 0xeb7   : > { %v3635_v23 = vpop.permute.xlu0 %3634  ;;  %v4049_v49 = vpop.permute.xlu1 %4048 }
 0xeb8   : > { %3853 = vadd.xlane.f32.xlu0 %v3852_v59  ;;  %v3663_v43 = vsel %vm1210_vm3, %v3635_v23, 0.0  ;;  %v7689_v23 = vmul.f32 %v4049_v49, %v7172_v21 }
 0xeba   : > { %3658 = vadd.xlane.f32.xlu1 %v3657_v0 }
 0xebb   : > { %v3743_v58 = vpop.permute.xlu0 %3742 }
 0xebc   : > { %3957 = vadd.xlane.f32.xlu0 %v3956_v5  ;;  %v3771_v33 = vsel %vm1210_vm3, %v3743_v58, 0.0  ;;  %v4081_v30 = vpop.permute.xlu1 %4080 }
 0xebd   : > { %v7680_v57 = vmul.f32 %v7469_v7, %v4081_v30 }
 0xebe   : > { %3766 = vadd.xlane.f32.xlu1 %v3765_v13 }
 0xebf   : > { %v3839_v11 = vpop.permute.xlu0 %3838 }
 0xec0   : > { %3655 = vadd.xlane.f32.xlu0 %v3654_v42  ;;  %v3867_v60 = vsel %vm1210_vm3, %v3839_v11, 0.0  ;;  %v3941_v3 = vpop.permute.xlu1 %3940 }
 0xec1   : > { %v3968_v56 = vsel %vm1210_vm3, %v3941_v3, 0.0 }
 0xec2   : > { %3862 = vadd.xlane.f32.xlu1 %v3861_v10 }
 0xec3   : > { %v4051_v37 = vpop.permute.xlu0 %4050 }
 0xec4   : > { %3763 = vadd.xlane.f32.xlu0 %v3762_v52  ;;  %v4113_v61 = vpop.permute.xlu1 %4112  ;;  %v7692_v59 = vmul.f32 %v4051_v37, %v7228_v62 }
 0xec6   : > { %3966 = vadd.xlane.f32.xlu1 %v3965_v44  ;;  %v6274_v58 = vpack.i.bf16 %v7692_v59, %v7689_v23 }
 0xec7   : > { %v4083_v35 = vpop.permute.xlu0 %4082 }
 0xec8   : > { %3859 = vadd.xlane.f32.xlu0 %v3858_v63  ;;  %v7683_v45 = vmul.f32 %v6413_v24, %v4083_v35  ;;  %v3637_v0 = vpop.permute.xlu1 %3636 }
 0xec9   : > { %v3666_v37 = vsel %vm1210_vm3, %v3637_v0, 0.0 }
 0xeca   : > { %3664 = vadd.xlane.f32.xlu1 %v3663_v43  ;;  %v6279_v41 = vpack.i.bf16 %v7683_v45, %v7680_v57 }
 0xecb   : > { %v3943_v18 = vpop.permute.xlu0 %3942 }
 0xecc   : > { %3963 = vadd.xlane.f32.xlu0 %v3962_v54  ;;  %v3971_v39 = vsel %vm1210_vm3, %v3943_v18, 0.0  ;;  %v3745_v5 = vpop.permute.xlu1 %3744 }
 0xecd   : > { %v3774_v63 = vsel %vm1210_vm3, %v3745_v5, 0.0 }
 0xece   : > { %3772 = vadd.xlane.f32.xlu1 %v3771_v33 }
 0xecf   : > { %v4115_v50 = vpop.permute.xlu0 %4114 }
 0xed0   : > { %3661 = vadd.xlane.f32.xlu0 %v3660_v2  ;;  %v7697_v11 = vpop.permute.xlu1 %3840 }
 0xed2   : > { %3868 = vadd.xlane.f32.xlu1 %v3867_v60  ;;  %v5179_v60 = vld [vmem:[%s8330_s4 + $0xe] ss:$0 sm:$0xff] }
 0xed3   : > { %v3639_v13 = vpop.permute.xlu0 %3638 }
 0xed4   : > { %3769 = vadd.xlane.f32.xlu0 %v3768_v22  ;;  %v7699_v46 = vpop.permute.xlu1 %4052  ;;  %v3669_v35 = vsel %vm1210_vm3, %v3639_v13, 0.0 }
 0xed6   : > { %3972 = vadd.xlane.f32.xlu1 %v3971_v39 }
 0xed7   : > { %v3747_v42 = vpop.permute.xlu0 %3746 }
 0xed8   : > { %3865 = vadd.xlane.f32.xlu0 %v3864_v20  ;;  %v7703_v21 = vpop.permute.xlu1 %4084  ;;  %v3777_v54 = vsel %vm1210_vm3, %v3747_v42, 0.0 }
 0xedb   : > { %v7701_v10 = vpop.permute.xlu0 %3842 }
 0xedc   : > { %3969 = vadd.xlane.f32.xlu0 %v3968_v56  ;;  %v7707_v52 = vpop.permute.xlu1 %3944  ;;  %v4136_v56 = vmul.f32 %v7469_v7, %v4113_v61 }
 0xedf   : > { %v7705_v62 = vpop.permute.xlu0 %4054 }
 0xee0   : > { %v7712_v25 = vpop.permute.xlu1 %4116 }
 0xee1   : > { %v4138_v31 = vmul.f32 %v7538_v51, %v7712_v25 }
 0xee3   : > { %v7709_v44 = vpop.permute.xlu0 %4086 }
 0xee4   : > { %v7719_v49 = vpop.permute.xlu1 %4056  ;;  %v7833_v32 = vmul.f32 %v7491_v17, %v7709_v44 }
 0xee7   : > { %6280 = vrot.lane.b32.xlu1 %v6279_v41, %s6463_s19  ;;  %v7715_v43 = vpop.permute.xlu0 %3946  ;;  %v4137_v41 = vmul.f32 %v6413_v24, %v4115_v50 }
 0xee8   : > { %v7723_v2 = vpop.permute.xlu1 %4088 }
 0xee9   : > { %v6284_v42 = vpack.i.bf16 %v4137_v41, %v4136_v56  ;;  %v3870_v41 = vsel %vm1210_vm3, %v7697_v11, 0.0  ;;  %v3974_v11 = vsel %vm1210_vm3, %v7707_v52, 0.0 }
 0xeeb   : > { %v7721_v33 = vpop.permute.xlu0 %4118 }
 0xeec   : > { %v7730_v3 = vpop.permute.xlu1 %4120  ;;  %v4139_v44 = vmul.f32 %v7491_v17, %v7721_v33 }
 0xeee   : > { %v6304_v25 = vpack.i.bf16 %v4139_v44, %v4138_v31  ;;  %v7883_v31 = vmul.f32 %v7699_v46, %v7235_v14  ;;  %v6329_v44 = vpack.i.bf16 %v7602_v47, %v7591_v34 }
 0xeef   : > { %v7728_v18 = vpop.permute.xlu0 %4058 }
 0xef0   : > { %v7742_v7 = vpop.permute.xlu1 %4060  ;;  %v7868_v17 = vmul.f32 %v7728_v18, %v7240_v19  ;;  %v7887_v19 = vmul.f32 %v7705_v62, %v7186_v27  ;;  %v6309_v62 = vpack.i.bf16 %v7585_v9, %v7566_v40 }
 0xef2   : > { %6275 = vrot.lane.b32.xlu0 %v6274_v58, %s6463_s19  ;;  %v6289_v58 = vpack.i.bf16 %v7543_v26, %v7515_v53  ;;  %v6294_v27 = vpack.i.bf16 %v7887_v19, %v7883_v31 }
 0xef3   : > { %v7735_v5 = vpop.permute.xlu0 %4090 }
 0xef4   : > { %v7747_v61 = vpop.permute.xlu1 %4092 }
 0xef7   : > { %v7744_v24 = vpop.permute.xlu0 %4122 }
 0xefb   : > { %v7749_v50 = vpop.permute.xlu0 %4062 }
 0xf0b   : > { %3667 = vadd.xlane.f32.xlu1 %v3666_v37  ;;  %v7751_v37 = vpop.permute.xlu1 %4124 }
 0xf0f   : > { %3775 = vadd.xlane.f32.xlu1 %v3774_v63  ;;  %v7753_v63 = vpop.permute.xlu0 %4094 }
 0xf11   : > { %3670 = vadd.xlane.f32.xlu0 %v3669_v35 }
 0xf13   : > { %3778 = vadd.xlane.f32.xlu1 %v3777_v54  ;;  %v7760_v54 = vpop.permute.xlu0 %4126 }
 0xf1d   : > { %v5780_v30 = vpop.f32.mrb[32].mxu0 }
 0xf1e   : > { %v2880_v22 = vadd.f32 %v5780_v30, %v5179_v60  ;;  %v2874_v39 = vpop.f32.mrb[33].mxu0 }
 0xf1f   : > { %v2875_v20 = vadd.f32 %v5179_v60, %v2874_v39 }
 0xf20   : > { %v2884_v13 = vmax.f32 %v2880_v22, 0.0 }
 0xf21   : > { %v2883_v0 = vmax.f32 %v2875_v20, 0.0 }
 0xf23   : > { %5797 = vmatprep.mubr.msk.f32.mxu1 %vm305_vm2, %v2883_v0 }
 0xf24   : > { %5798 = vmatmul.mubr.msk.f32.vlgmr.msra.gmra.mrb[26].mxu1 %vm305_vm2, %v2884_v13  ;;  %6290 = vrot.lane.b32.xlu1 %v6289_v58, %s6463_s19  ;;  %v3873_v58 = vsel %vm1210_vm3, %v7701_v10, 0.0 }
 0xf25   : > { %5842 = vmatprep.mubr.msk.f32.mxu1 %vm6453_vm4, %v8387_v8 }
 0xf27   : > { %6285 = vrot.lane.b32.xlu0 %v6284_v42, %s6463_s19 }
 0xf37   : > { %v7755_v35 = vpop.xlane.xlu1 %3652 }
 0xf38   : > { %3982 = vst.msk [vmem:[%s6674_s13 + $0x8] sm:$0xff] %vm8374_vm6, %v7755_v35 }
 0xf3b   : > { %v7762_v60 = vpop.xlane.xlu1 %3760 }
 0xf3c   : > { %3991 = vst.msk [vmem:[%s6674_s13 + $0x8] sm:$0xff] %vm8373_vm7, %v7762_v60 }
 0xf3d   : > { %v7767_v30 = vpop.xlane.xlu0 %3649 }
 0xf3e   : > { %3981 = vst.msk [vmem:[%s6674_s13] sm:$0xff] %vm8374_vm6, %v7767_v30 }
 0xf3f   : > { %v7772_v22 = vpop.xlane.xlu1 %3856 }
 0xf40   : > { %4000 = vst.msk [vmem:[%s6674_s13 + $0x8] sm:$0xff] %vm3998_vm8, %v7772_v22 }
 0xf41   : > { %v7777_v39 = vpop.xlane.xlu0 %3757 }
 0xf42   : > { %3990 = vst.msk [vmem:[%s6674_s13] sm:$0xff] %vm8373_vm7, %v7777_v39 }
 0xf43   : > { %v7782_v20 = vpop.xlane.xlu1 %3960 }
 0xf44   : > { %4009 = vst.msk [vmem:[%s6674_s13 + $0x8] sm:$0xff] %vm4007_vm9, %v7782_v20 }
 0xf45   : > { %v7787_v56 = vpop.xlane.xlu0 %3853 }
 0xf46   : > { %3999 = vst.msk [vmem:[%s6674_s13] sm:$0xff] %vm3998_vm8, %v7787_v56  ;;  %3871 = vadd.xlane.f32.xlu0 %v3870_v41  ;;  %v3977_v41 = vsel %vm1210_vm3, %v7715_v43, 0.0 }
 0xf47   : > { %v7794_v0 = vpop.xlane.xlu1 %3658 }
 0xf48   : > { %3984 = vst.msk [vmem:[%s6674_s13 + $0x18] sm:$0xff] %vm8374_vm6, %v7794_v0  ;;  %3874 = vadd.xlane.f32.xlu1 %v3873_v58 }
 0xf49   : > { %v7801_v13 = vpop.xlane.xlu0 %3957 }
 0xf4a   : > { %4008 = vst.msk [vmem:[%s6674_s13] sm:$0xff] %vm4007_vm9, %v7801_v13  ;;  %3975 = vadd.xlane.f32.xlu0 %v3974_v11  ;;  %v7829_v11 = vmul.f32 %v7538_v51, %v7703_v21  ;;  %v7864_v51 = vmul.f32 %v7719_v49, %v7208_v36 }
 0xf4b   : > { %v7808_v42 = vpop.xlane.xlu1 %3766 }
 0xf4c   : > { %3993 = vst.msk [vmem:[%s6674_s13 + $0x18] sm:$0xff] %vm8373_vm7, %v7808_v42  ;;  %v6299_v21 = vpack.i.bf16 %v7833_v32, %v7829_v11  ;;  %v6314_v49 = vpack.i.bf16 %v7868_v17, %v7864_v51 }
 0xf4d   : > { %v7813_v10 = vpop.xlane.xlu0 %3655 }
 0xf4e   : > { %3983 = vst.msk [vmem:[%s6674_s13 + $0x10] sm:$0xff] %vm8374_vm6, %v7813_v10  ;;  %3978 = vadd.xlane.f32.xlu0 %v3977_v41 }
 0xf4f   : > { %v7820_v52 = vpop.xlane.xlu1 %3862 }
 0xf50   : > { %8389 = vst [vmem:[#allocation10_spill] sm:$0xff] %v7820_v52  ;;  %4002 = vst.msk [vmem:[%s6674_s13 + $0x18] sm:$0xff] %vm3998_vm8, %v7820_v52 }
 0xf51   : > { %v7825_v58 = vpop.xlane.xlu0 %3763 }
 0xf52   : > { %3992 = vst.msk [vmem:[%s6674_s13 + $0x10] sm:$0xff] %vm8373_vm7, %v7825_v58 }
 0xf53   : > { %v7838_v43 = vpop.xlane.xlu1 %3966 }
 0xf54   : > { %8390 = vst [vmem:[#allocation11_spill] sm:$0xff] %v7838_v43  ;;  %4011 = vst.msk [vmem:[%s6674_s13 + $0x18] sm:$0xff] %vm4007_vm9, %v7838_v43 }
 0xf55   : > { %v7843_v41 = vpop.xlane.xlu0 %3859 }
 0xf56   : > { %4001 = vst.msk [vmem:[%s6674_s13 + $0x10] sm:$0xff] %vm3998_vm8, %v7843_v41 }
 0xf57   : > { %v7854_v8 = vpop.xlane.xlu1 %3664 }
 0xf58   : > { %3986 = vst.msk [vmem:[%s6674_s13 + $0x28] sm:$0xff] %vm8374_vm6, %v7854_v8 }
 0xf59   : > { %6300 = vrot.lane.b32.xlu1 %v6299_v21, %s6463_s19  ;;  %v7860_v43 = vpop.xlane.xlu0 %3963  ;;  %v7916_v21 = vld [vmem:[%s6739_s7 + $0x10] sm:$0xff] }
 0xf5a   : > { %8391 = vst [vmem:[#allocation12_spill] sm:$0xff] %v7860_v43  ;;  %4010 = vst.msk [vmem:[%s6674_s13 + $0x10] sm:$0xff] %vm4007_vm9, %v7860_v43 }
 0xf5b   : > { %v7873_v33 = vpop.xlane.xlu1 %3772  ;;  %8396 = vst [vmem:[#allocation17_spill] sm:$0xff] %v7916_v21 }
 0xf5c   : > { %8392 = vst [vmem:[#allocation13_spill] sm:$0xff] %v7873_v33  ;;  %3995 = vst.msk [vmem:[%s6674_s13 + $0x28] sm:$0xff] %vm8373_vm7, %v7873_v33 }
 0xf5d   : > { %6305 = vrot.lane.b32.xlu1 %v6304_v25, %s6463_s19  ;;  %v7879_v36 = vpop.xlane.xlu0 %3661 }
 0xf5e   : > { %3985 = vst.msk [vmem:[%s6674_s13 + $0x20] sm:$0xff] %vm8374_vm6, %v7879_v36 }
 0xf5f   : > { %v7894_v18 = vpop.xlane.xlu1 %3868 }
 0xf60   : > { %8393 = vst [vmem:[#allocation14_spill] sm:$0xff] %v7894_v18  ;;  %4004 = vst.msk [vmem:[%s6674_s13 + $0x28] sm:$0xff] %vm3998_vm8, %v7894_v18 }
 0xf61   : > { %6315 = vrot.lane.b32.xlu1 %v6314_v49, %s6463_s19  ;;  %v7900_v14 = vpop.xlane.xlu0 %3769  ;;  %v7926_v49 = vmul.f32 %v7533_v28, %v7723_v2 }
 0xf62   : > { %8394 = vst [vmem:[#allocation15_spill] sm:$0xff] %v7900_v14  ;;  %3994 = vst.msk [vmem:[%s6674_s13 + $0x20] sm:$0xff] %vm8373_vm7, %v7900_v14 }
 0xf63   : > { %v7907_v46 = vpop.xlane.xlu1 %3972 }
 0xf64   : > { %8395 = vst [vmem:[#allocation16_spill] sm:$0xff] %v7907_v46  ;;  %4013 = vst.msk [vmem:[%s6674_s13 + $0x28] sm:$0xff] %vm4007_vm9, %v7907_v46  ;;  %6295 = vrot.lane.b32.xlu0 %v6294_v27, %s6463_s19  ;;  %v7930_v27 = vmul.f32 %v7518_v38, %v7735_v5 }
 0xf65   : > { %2998 = vrot.lane.b32.xlu1 %v7916_v21, %s6450_s9  ;;  %v7922_v25 = vpop.xlane.xlu0 %3865 }
 0xf66   : > { %8397 = vst [vmem:[#allocation18_spill] sm:$0xff] %v7922_v25  ;;  %4003 = vst.msk [vmem:[%s6674_s13 + $0x20] sm:$0xff] %vm3998_vm8, %v7922_v25  ;;  %v6319_v46 = vpack.i.bf16 %v7930_v27, %v7926_v49 }
 0xf67   : > { %v6281_v2 = vpop.permute.xlu1 %6280 }
 0xf68   : > { %6310 = vrot.lane.b32.xlu0 %v6309_v62, %s6463_s19  ;;  %v6282_v25 = vunpack.i.l.bf16 %v6281_v2 }
 0xf69   : > { %6330 = vrot.lane.b32.xlu1 %v6329_v44, %s6463_s19  ;;  %v7937_v21 = vpop.xlane.xlu0 %3969 }
 0xf6a   : > { %8398 = vst [vmem:[#allocation19_spill] sm:$0xff] %v7937_v21  ;;  %4012 = vst.msk [vmem:[%s6674_s13 + $0x20] sm:$0xff] %vm4007_vm9, %v7937_v21 }
 0xf6c   : > { %6320 = vrot.lane.b32.xlu0 %v6319_v46, %s6463_s19  ;;  %v6283_v46 = vunpack.i.h.bf16 %v6281_v2 }
 0xf6d   : > { %v6276_v62 = vpop.permute.xlu0 %6275 }
 0xf6e   : > { %v6278_v43 = vunpack.i.h.bf16 %v6276_v62  ;;  %v6277_v15 = vunpack.i.l.bf16 %v6276_v62 }
 0xf70   : > { %v4265_v14 = vsel %vm4264_vm10, %v6277_v15, %v6282_v25 }
 0xf98   : > { %v7945_v5 = vpop.xlane.xlu1 %3667 }
 0xf99   : > { %8399 = vst [vmem:[#allocation20_spill] sm:$0xff] %v7945_v5  ;;  %3987 = vst.msk [vmem:[%s6674_s13 + $0x30] sm:$0xff] %vm8374_vm6, %v7945_v5 }
 0xf9c   : > { %v7950_v18 = vpop.xlane.xlu1 %3775 }
 0xf9d   : > { %8400 = vst [vmem:[#allocation21_spill] sm:$0xff] %v7950_v18  ;;  %3996 = vst.msk [vmem:[%s6674_s13 + $0x30] sm:$0xff] %vm8373_vm7, %v7950_v18 }
 0xf9e   : > { %v7955_v44 = vpop.xlane.xlu0 %3670 }
 0xf9f   : > { %8401 = vst [vmem:[#allocation22_spill] sm:$0xff] %v7955_v44  ;;  %3988 = vst.msk [vmem:[%s6674_s13 + $0x38] sm:$0xff] %vm8374_vm6, %v7955_v44  ;;  %v4266_v44 = vsel %vm4264_vm10, %v6278_v43, %v6283_v46 }
 0xfa0   : > { %v7960_v21 = vpop.xlane.xlu1 %3778 }
 0xfa1   : > { %8402 = vst [vmem:[#allocation23_spill] sm:$0xff] %v7960_v21  ;;  %3997 = vst.msk [vmem:[%s6674_s13 + $0x38] sm:$0xff] %vm8373_vm7, %v7960_v21 }
 0xfa2   : > { %v6286_v29 = vpop.permute.xlu0 %6285 }
 0xfa3   : > { %v6288_v5 = vunpack.i.h.bf16 %v6286_v29  ;;  %v6287_v33 = vunpack.i.l.bf16 %v6286_v29 }
 0xfa4   : > { %v6291_v18 = vpop.permute.xlu1 %6290 }
 0xfa5   : > { %v6293_v6 = vunpack.i.h.bf16 %v6291_v18  ;;  %v6292_v52 = vunpack.i.l.bf16 %v6291_v18  ;;  %v4274_v2 = vsel %vm4273_vm11, %v4265_v14, %v6287_v33  ;;  %v4275_v62 = vsel %vm4273_vm11, %v4266_v44, %v6288_v5 }
 0xfa7   : > { %v4283_v21 = vsel %vm4282_vm12, %v4274_v2, %v6292_v52  ;;  %v4284_v29 = vsel %vm4282_vm12, %v4275_v62, %v6293_v6 }
 0xfa8   : > { %v4292_v15 = vsel %vm4291_vm13, %v4283_v21, %v7767_v30  ;;  %v4293_v43 = vsel %vm4291_vm13, %v4284_v29, %v7755_v35  ;;  %v4110_v29 = vmul.f32 %v7550_v55, %v7747_v61  ;;  %v4079_v61 = vmul.f32 %v7749_v50, %v7245_v1 }
 0xfa9   : > { %v4301_v33 = vsel %vm8378_vm14, %v4292_v15, %v7777_v39  ;;  %v4302_v18 = vsel %vm8378_vm14, %v4293_v43, %v7762_v60  ;;  %v4111_v15 = vmul.f32 %v7569_v16, %v7753_v63  ;;  %v4140_v43 = vmul.f32 %v7533_v28, %v7730_v3 }
 0xfaa   : > { %v4309_v52 = vsel %vm8377_vm15, %v4301_v33, %v7787_v56  ;;  %v4310_v6 = vsel %vm8377_vm15, %v4302_v18, %v7772_v22  ;;  %v5182_v56 = vld [vmem:[%s8330_s4 + $0xf] ss:$0 sm:$0xff]  ;;  %v4141_v33 = vmul.f32 %v7518_v38, %v7744_v24  ;;  %v4142_v38 = vmul.f32 %v7550_v55, %v7751_v37 }
 0xfab   : > { %v7985_v30 = vsel %vm8376_vm5, %v4309_v52, %v7801_v13  ;;  %v7989_v35 = vsel %vm8376_vm5, %v4310_v6, %v7782_v20  ;;  %v6339_v18 = vpack.i.bf16 %v4111_v15, %v4110_v29  ;;  %v6349_v52 = vpack.i.bf16 %v7622_v48, %v7608_v4 }
 0xfac   : > { %v6113_v39 = vpack.c.bf16 %v7989_v35, %v7985_v30  ;;  %v4078_v6 = vmul.f32 %v7742_v7, %v7219_v12  ;;  %v4143_v3 = vmul.f32 %v7569_v16, %v7760_v54  ;;  %v8403_v1 = vmov 9   ;;  %v8420_v35 = vld [vmem:[#allocation2_spill] sm:$0xff] }
 0xfad   : > { %v6464_v55 = vmov 11  }
 0xfae   : > { %v6334_v28 = vpack.i.bf16 %v4079_v61, %v4078_v6  ;;  %v6344_v12 = vpack.i.bf16 %v4143_v3, %v4142_v38 }
 0xfd3   : > { %v7993_v14 = vpop.xlane.xlu0 %3871 }
 0xfd4   : > { %4005 = vst.msk [vmem:[%s6674_s13 + $0x30] sm:$0xff] %vm3998_vm8, %v7993_v14 }
 0xfd5   : > { %v7998_v60 = vpop.xlane.xlu1 %3874 }
 0xfd6   : > { %4006 = vst.msk [vmem:[%s6674_s13 + $0x38] sm:$0xff] %vm3998_vm8, %v7998_v60 }
 0xfd7   : > { %v8003_v22 = vpop.xlane.xlu0 %3975 }
 0xfd8   : > { %4014 = vst.msk [vmem:[%s6674_s13 + $0x30] sm:$0xff] %vm4007_vm9, %v8003_v22 }
 0xfdb   : > { %v8008_v20 = vpop.xlane.xlu0 %3978 }
 0xfdc   : > { %4015 = vst.msk [vmem:[%s6674_s13 + $0x38] sm:$0xff] %vm4007_vm9, %v8008_v20  ;;  %s6465_s13 = smov 2  }
 0xff7   : > { %v5799_v13 = vpop.f32.mrb[26].mxu1 }
 0xff8   : > { %v8016_v21 = vadd.f32 %v5799_v13, %v5182_v56  ;;  %v2961_v25 = vpop.f32.mrb[27].mxu1 }
 0xff9   : > { %v8018_v5 = vadd.f32 %v5182_v56, %v2961_v25  ;;  %v6324_v56 = vpack.i.bf16 %v4141_v33, %v4140_v43 }
 0xffa   : > { %v2971_v44 = vmul.f32 %v8016_v21, %v8016_v21 }
 0xffb   : > { %v2970_v46 = vmul.f32 %v8018_v5, %v8018_v5 }
 0xffc   : > { %v2975_v2 = vsel %vm512_vm1, %v2971_v44, 0.0 }
 0xffd   : > { %2976 = vadd.xlane.f32.xlu0 %v2975_v2  ;;  %v2972_v62 = vsel %vm512_vm1, %v2970_v46, 0.0 }
 0xffe   : > { %2973 = vadd.xlane.f32.xlu1 %v2972_v62 }
0x100f   : > { %6340 = vrot.lane.b32.xlu1 %v6339_v18, %s6463_s19 }
0x1013   : > { %6325 = vrot.lane.b32.xlu0 %v6324_v56, %s6463_s19  ;;  %6350 = vrot.lane.b32.xlu1 %v6349_v52, %s6463_s19 }
0x1017   : > { %6335 = vrot.lane.b32.xlu0 %v6334_v28, %s6463_s19  ;;  %4403 = vperm.xlu1 %6354, %v7692_v59  }
0x101b   : > { %4407 = vperm.xlu1 %6354, %v7883_v31   ;;  %6345 = vrot.lane.b32.xlu0 %v6344_v12, %s6463_s19  ;;  %s6483_s19 = smov 122  }
0x101f   : > { %4415 = vperm.xlu1 %6354, %v7864_v51   ;;  %4399 = vperm.xlu0 %6272, %v7689_v23  }
0x1023   : > { %4423 = vperm.xlu1 %6354, %v4078_v6   ;;  %4411 = vperm.xlu0 %6272, %v7887_v19  }
0x1027   : > { %6355 = vset.pattern.permute.xlu1 %v8403_v1  ;;  %4419 = vperm.xlu0 %6272, %v7868_v17  }
0x1028   : > { %4509 = vperm.xlu1 %6355, %v7680_v57  }
0x102b   : > { %4427 = vperm.xlu0 %6272, %v4079_v61  }
0x102c   : > { %4517 = vperm.xlu1 %6355, %v7829_v11  }
0x102f   : > { %6356 = vset.pattern.permute.xlu0 %v6464_v55 }
0x1030   : > { %4521 = vperm.xlu1 %6355, %v7833_v32   ;;  %4619 = vperm.xlu0 %6356, %v7515_v53   ;;  %v8404_v32 = vmov 3   ;;  %v6301_v53 = vpop.permute.xlu1 %6300 }
0x1031   : > { %v6302_v50 = vunpack.i.l.bf16 %v6301_v53  ;;  %v6303_v37 = vunpack.i.h.bf16 %v6301_v53 }
0x1034   : > { %6358 = vset.pattern.permute.xlu1 %v6464_v55  ;;  %6357 = vset.pattern.permute.xlu0 %v8403_v1 }
0x1035   : > { %4623 = vperm.xlu1 %6358, %v7543_v26   ;;  %4513 = vperm.xlu0 %6357, %v7683_v45   ;;  %v6306_v26 = vpop.permute.xlu1 %6305 }
0x1036   : > { %v6308_v13 = vunpack.i.h.bf16 %v6306_v26 }
0x1039   : > { %6359 = vset.pattern.permute.xlu1 %v8403_v1  ;;  %4529 = vperm.xlu0 %6357, %v7930_v27   ;;  %v6316_v16 = vpop.permute.xlu1 %6315 }
0x103a   : > { %4525 = vperm.xlu1 %6359, %v7926_v49   ;;  %v6317_v25 = vunpack.i.l.bf16 %v6316_v16  ;;  %v6318_v46 = vunpack.i.h.bf16 %v6316_v16 }
0x103d   : > { %4533 = vperm.xlu0 %6357, %v4110_v29   ;;  %v8079_v57 = vpop.permute.xlu1 %2998 }
0x103e   : > { %6360 = vset.pattern.permute.xlu1 %v6464_v55 }
0x103f   : > { %4627 = vperm.xlu1 %6360, %v7566_v40   ;;  %v6296_v40 = vpop.permute.xlu0 %6295 }
0x1040   : > { %v6297_v45 = vunpack.i.l.bf16 %v6296_v40  ;;  %v6298_v59 = vunpack.i.h.bf16 %v6296_v40 }
0x1041   : > { %6362 = vset.pattern.permute.xlu0 %v6464_v55 }
0x1042   : > { %4635 = vperm.xlu0 %6362, %v7591_v34   ;;  %v4267_v63 = vsel %vm4264_vm10, %v6297_v45, %v6302_v50  ;;  %v4268_v17 = vsel %vm4264_vm10, %v6298_v59, %v6303_v37 }
0x1043   : > { %4631 = vperm.xlu1 %6360, %v7585_v9   ;;  %v6311_v34 = vpop.permute.xlu0 %6310  ;;  %v4277_v62 = vsel %vm4273_vm11, %v4268_v17, %v6308_v13  ;;  %v8406_v13 = vmov 0.0|0.0  }
0x1044   : > { %v6312_v54 = vunpack.i.l.bf16 %v6311_v34  ;;  %v6313_v31 = vunpack.i.h.bf16 %v6311_v34 }
0x1046   : > { %4647 = vperm.xlu0 %6362, %v7622_v48   ;;  %v6331_v48 = vpop.permute.xlu1 %6330  ;;  %v4286_v33 = vsel %vm4282_vm12, %v4277_v62, %v6313_v31  ;;  %v8409_v62 = vld [vmem:[#allocation20_spill] sm:$0xff] }
0x1047   : > { %6361 = vset.pattern.permute.xlu1 %v8403_v1  ;;  %v6321_v9 = vpop.permute.xlu0 %6320  ;;  %v6332_v56 = vunpack.i.l.bf16 %v6331_v48  ;;  %v6333_v12 = vunpack.i.h.bf16 %v6331_v48  ;;  %v4295_v1 = vsel %vm4291_vm13, %v4286_v33, %v7794_v0 }
0x1048   : > { %4537 = vperm.xlu1 %6361, %v4111_v15   ;;  %v6322_v11 = vunpack.i.l.bf16 %v6321_v9  ;;  %v6323_v19 = vunpack.i.h.bf16 %v6321_v9 }
0x104a   : > { %v4269_v15 = vsel %vm4264_vm10, %v6317_v25, %v6322_v11  ;;  %v4270_v18 = vsel %vm4264_vm10, %v6318_v46, %v6323_v19  ;;  %v8407_v25 = vld [vmem:[#allocation15_spill] sm:$0xff]  ;;  %v8408_v46 = vld [vmem:[#allocation13_spill] sm:$0xff] }
0x104c   : > { %6363 = vset.pattern.permute.xlu1 %v6464_v55 }
0x104d   : > { %4639 = vperm.xlu1 %6363, %v7602_v47  }
0x1051   : > { %4643 = vperm.xlu1 %6363, %v7608_v4   ;;  %v6307_v4 = vunpack.i.l.bf16 %v6306_v26 }
0x1053   : > { %v4276_v2 = vsel %vm4273_vm11, %v4267_v63, %v6307_v4  ;;  %v4304_v63 = vsel %vm8378_vm14, %v4295_v1, %v7808_v42  ;;  %v8415_v1 = vld [vmem:[#allocation18_spill] sm:$0xff] }
0x1054   : > { %v4285_v29 = vsel %vm4282_vm12, %v4276_v2, %v6312_v54 }
0x1055   : > { %6364 = vset.pattern.permute.xlu1 %v8404_v32  ;;  %v4294_v3 = vsel %vm4291_vm13, %v4285_v29, %v7813_v10 }
0x1056   : > { %v4303_v4 = vsel %vm8378_vm14, %v4294_v3, %v7825_v58 }
0x1057   : > { %v4311_v19 = vsel %vm8377_vm15, %v4303_v4, %v7843_v41  ;;  %v8411_v41 = vld [vmem:[#allocation9_spill] sm:$0xff] }
0x108a   : > { %v2977_v23 = vpop.xlane.xlu0 %2976 }
0x108b   : > { %v2979_v7 = vadd.f32 1e-12, %v2977_v23  ;;  %v2974_v24 = vpop.xlane.xlu1 %2973 }
0x108c   : > { %v2978_v47 = vadd.f32 1e-12, %v2974_v24 }
0x108d   : > { %6392 = vrsqrt.f32 %v2979_v7 }
0x108e   : > { %6394 = vrsqrt.f32 %v2978_v47  ;;  %v6326_v51 = vpop.permute.xlu0 %6325 }
0x108f   : > { %v6327_v49 = vunpack.i.l.bf16 %v6326_v51  ;;  %v6341_v27 = vpop.permute.xlu1 %6340  ;;  %v6328_v44 = vunpack.i.h.bf16 %v6326_v51 }
0x1090   : > { %v6343_v53 = vunpack.i.h.bf16 %v6341_v27  ;;  %v6342_v26 = vunpack.i.l.bf16 %v6341_v27 }
0x1091   : > { %v4278_v52 = vsel %vm4273_vm11, %v4269_v15, %v6327_v49  ;;  %v4279_v61 = vsel %vm4273_vm11, %v4270_v18, %v6328_v44  ;;  %v8405_v49 = vld [vmem:[#allocation10_spill] sm:$0xff]  ;;  %v8412_v18 = vld [vmem:[#allocation8_spill] sm:$0xff] }
0x1092   : > { %v6336_v43 = vpop.permute.xlu0 %6335  ;;  %v4287_v32 = vsel %vm4282_vm12, %v4278_v52, %v6332_v56  ;;  %v4288_v34 = vsel %vm4282_vm12, %v4279_v61, %v6333_v12  ;;  %v8410_v15 = vld [vmem:[#allocation22_spill] sm:$0xff]  ;;  %v8413_v61 = vld [vmem:[#allocation12_spill] sm:$0xff] }
0x1093   : > { %v6351_v6 = vpop.permute.xlu1 %6350  ;;  %v6338_v28 = vunpack.i.h.bf16 %v6336_v43  ;;  %v6337_v38 = vunpack.i.l.bf16 %v6336_v43  ;;  %v4296_v11 = vsel %vm4291_vm13, %v4287_v32, %v7879_v36  ;;  %v4312_v36 = vsel %vm8377_vm15, %v4304_v63, %v8405_v49 }
0x1094   : > { %v6353_v9 = vunpack.i.h.bf16 %v6351_v6  ;;  %v6352_v0 = vunpack.i.l.bf16 %v6351_v6  ;;  %v4305_v44 = vsel %vm8378_vm14, %v4296_v11, %v8407_v25 }
0x1095   : > { %v4271_v10 = vsel %vm4264_vm10, %v6337_v38, %v6342_v26  ;;  %v4272_v48 = vsel %vm4264_vm10, %v6338_v28, %v6343_v53  ;;  %v4320_v28 = vsel %vm8376_vm5, %v4311_v19, %v8413_v61  ;;  %v8414_v38 = vld [vmem:[#allocation11_spill] sm:$0xff]  ;;  %v4313_v32 = vsel %vm8377_vm15, %v4305_v44, %v8415_v1  ;;  %v8416_v53 = vld [vmem:[#allocation14_spill] sm:$0xff] }
0x1096   : > { %v6346_v40 = vpop.permute.xlu0 %6345  ;;  %v4321_v3 = vsel %vm8376_vm5, %v4312_v36, %v8414_v38  ;;  %v8426_v36 = vld [vmem:[#allocation6_spill] sm:$0xff] }
0x1097   : > { %v6393_v16 = vpop.eup %6392  ;;  %v6348_v45 = vunpack.i.h.bf16 %v6346_v40  ;;  %v6347_v23 = vunpack.i.l.bf16 %v6346_v40  ;;  %v4404_v59 = vpop.permute.xlu1 %4403  ;;  %v8417_v40 = vmov 0.0  }
0x1098   : > { %v6395_v7 = vpop.eup %6394  ;;  %v2983_v24 = vmul.f32 %v6393_v16, %v8016_v21  ;;  %v4297_v21 = vsel %vm4291_vm13, %v4288_v34, %v7854_v8  ;;  %v4431_v33 = vmul.f32 %v8411_v41, %v4404_v59  ;;  %v8418_v34 = vld [vmem:[#allocation21_spill] sm:$0xff] }
0x1099   : > { %v4280_v50 = vsel %vm4273_vm11, %v4271_v10, %v6347_v23  ;;  %v4281_v47 = vsel %vm4273_vm11, %v4272_v48, %v6348_v45  ;;  %v2982_v37 = vmul.f32 %v6395_v7, %v8018_v5  ;;  %v4306_v2 = vsel %vm8378_vm14, %v4297_v21, %v8408_v46  ;;  %v8419_v45 = vld [vmem:[#allocation23_spill] sm:$0xff]  ;;  %v8424_v21 = vld [vmem:[#allocation4_spill] sm:$0xff] }
0x109a   : > { %v2985_v54 = vsel %vm512_vm1, %v2983_v24, 0.0  ;;  %2994 = vst.msk [vmem:[%s6679_s16 + $0x20] sm:$0xff] %vm512_vm1, %v2983_v24  ;;  %v4289_v58 = vsel %vm4282_vm12, %v4280_v50, %v6352_v0  ;;  %v4290_v42 = vsel %vm4282_vm12, %v4281_v47, %v6353_v9  ;;  %v4314_v26 = vsel %vm8377_vm15, %v4306_v2, %v8416_v53  ;;  %v8421_v23 = vld [vmem:[#allocation3_spill] sm:$0xff]  ;;  %v8423_v50 = vld [vmem:[#allocation16_spill] sm:$0xff] }
0x109b   : > { %v4408_v51 = vpop.permute.xlu1 %4407  ;;  %v2984_v17 = vsel %vm512_vm1, %v2982_v37, 0.0  ;;  %2993 = vst.msk [vmem:[%s6679_s16 + $0x18] sm:$0xff] %vm512_vm1, %v2982_v37  ;;  %v6110_v5 = vpack.c.bf16 %v2983_v24, %v2982_v37  ;;  %v4298_v29 = vsel %vm4291_vm13, %v4289_v58, %v8409_v62  ;;  %v4299_v43 = vsel %vm4291_vm13, %v4290_v42, %v8410_v15  ;;  %v8422_v0 = vld [vmem:[#allocation19_spill] sm:$0xff]  ;;  %v8428_v62 = vld [vmem:[#allocation17_spill] sm:$0xff] }
0x109c   : > { %v2986_v31 = vadd.f32 %v2985_v54, %v2984_v17  ;;  %v4307_v9 = vsel %vm8378_vm14, %v4298_v29, %v8418_v34  ;;  %v4308_v30 = vsel %vm8378_vm14, %v4299_v43, %v8419_v45  ;;  %v6116_v10 = vpack.c.bf16 %v4321_v3, %v4320_v28  ;;  %v8425_v17 = vld [vmem:[#allocation5_spill] sm:$0xff] }
0x109d   : > { %6111 = vmatpush3.bf16.msra.mxu0 %v6110_v5  ;;  %v4322_v24 = vsel %vm8376_vm5, %v4313_v32, %v8422_v0  ;;  %v4323_v47 = vsel %vm8376_vm5, %v4314_v26, %v8423_v50  ;;  %v4315_v4 = vsel %vm8377_vm15, %v4307_v9, %v7993_v14  ;;  %v4316_v63 = vsel %vm8377_vm15, %v4308_v30, %v7998_v60 }
0x109e   : > { %v2987_v27 = vrot.slane %v2986_v31, 4  ;;  %v4400_v8 = vpop.permute.xlu0 %4399  ;;  %6112 = vmatprep.subr.bf16.mxu0 %v8406_v13  ;;  %v6119_v42 = vpack.c.bf16 %v4323_v47, %v4322_v24  ;;  %v4324_v14 = vsel %vm8376_vm5, %v4315_v4, %v8003_v22  ;;  %v4325_v60 = vsel %vm8376_vm5, %v4316_v63, %v8008_v20 }
0x109f   : > { %v4430_v52 = vmul.f32 %v8412_v18, %v4400_v8  ;;  %v4416_v6 = vpop.permute.xlu1 %4415  ;;  %v8427_v8 = vld [vmem:[#allocation7_spill] sm:$0xff]  ;;  %v6122_v46 = vpack.c.bf16 %v4325_v60, %v4324_v14 }
0x10a0   : > { %v2988_v56 = vadd.f32 %v2987_v27, %v2986_v31  ;;  %5805 = vmatmul.mubr.msk.f32.vlgmr.msra.gmra.mrb[34].mxu0 %vm1210_vm3, %v8079_v57  ;;  %vm2995_vm3 = vcmask 253952  }
0x10a1   : > { %v6125_v12 = vpack.c.bf16 %v4431_v33, %v4430_v52  ;;  %6114 = vmatpush3.bf16.msra.mxu0 %v6113_v39  ;;  %5823 = vmatprep.mubr.msk.f32.mxu0 %vm6453_vm4, %v8417_v40  ;;  %v4432_v39 = vmul.f32 %v8420_v35, %v4408_v51  ;;  %v4434_v51 = vmul.f32 %v8424_v21, %v4416_v6 }
0x10a2   : > { %v2989_v57 = vrot.slane %v2988_v56, 2  ;;  %v4412_v16 = vpop.permute.xlu0 %4411  ;;  %6115 = vmatprep.subr.bf16.mxu0 %v8406_v13 }
0x10a3   : > { %v4433_v59 = vmul.f32 %v8421_v23, %v4412_v16  ;;  %6126 = vmatpush3.bf16.msra.mxu1 %v6125_v12  ;;  %v4424_v7 = vpop.permute.xlu1 %4423 }
0x10a4   : > { %v2990_v48 = vadd.f32 %v2989_v57, %v2988_v56  ;;  %6127 = vmatprep.subr.bf16.mxu1 %v8406_v13  ;;  %v4436_v27 = vmul.f32 %v8426_v36, %v4424_v7 }
0x10a5   : > { %v6128_v37 = vpack.c.bf16 %v4433_v59, %v4432_v39  ;;  %6117 = vmatpush3.bf16.msra.mxu0 %v6116_v10 }
0x10a6   : > { %v2991_v54 = vrot.slane %v2990_v48, 1  ;;  %v4420_v11 = vpop.permute.xlu0 %4419  ;;  %6118 = vmatprep.subr.bf16.mxu0 %v8406_v13 }
0x10a7   : > { %v4435_v5 = vmul.f32 %v8425_v17, %v4420_v11  ;;  %6129 = vmatpush3.bf16.msra.mxu1 %v6128_v37  ;;  %v4510_v58 = vpop.permute.xlu1 %4509 }
0x10a8   : > { %6130 = vmatprep.subr.bf16.mxu1 %v8406_v13  ;;  %v2992_v31 = vadd.f32 %v2991_v54, %v2990_v48  ;;  %v4540_v43 = vmul.f32 %v8412_v18, %v4510_v58 }
0x10a9   : > { %v6131_v19 = vpack.c.bf16 %v4435_v5, %v4434_v51  ;;  %6120 = vmatpush3.bf16.msra.mxu0 %v6119_v42 }
0x10aa   : > { %v4428_v49 = vpop.permute.xlu0 %4427  ;;  %6121 = vmatprep.subr.bf16.mxu0 %v8406_v13  ;;  %2996 = vst.msk [vmem:[%s6679_s16 + $0x28] sm:$0x1] %vm2995_vm3, %v2992_v31 }
0x10ab   : > { %v4437_v25 = vmul.f32 %v8427_v8, %v4428_v49  ;;  %6132 = vmatpush3.bf16.msra.mxu1 %v6131_v19  ;;  %v4518_v44 = vpop.permute.xlu1 %4517 }
0x10ac   : > { %6133 = vmatprep.subr.bf16.mxu1 %v8406_v13  ;;  %v4542_v3 = vmul.f32 %v8420_v35, %v4518_v44 }
0x10ad   : > { %v6134_v22 = vpack.c.bf16 %v4437_v25, %v4436_v27  ;;  %6123 = vmatpush3.bf16.msra.mxu0 %v6122_v46 }
0x10ae   : > { %6136 = vmatprep.subr.bf16.mxu0 %v8406_v13 }
0x10af   : > { %v4620_v20 = vpop.permute.xlu0 %4619  ;;  %6135 = vmatpush3.bf16.msra.mxu1 %v6134_v22  ;;  %v4522_v2 = vpop.permute.xlu1 %4521 }
0x10b0   : > { %5824 = vmatmul.mubr.msk.f32.vlgmr.msra.gmra.mrb[36].mxu0 %vm305_vm2, %v8428_v62  ;;  %6148 = vmatprep.subr.bf16.mxu1 %v8406_v13  ;;  %v4650_v33 = vmul.f32 %v8412_v18, %v4620_v20  ;;  %v4543_v56 = vmul.f32 %v8421_v23, %v4522_v2 }
0x10b1   : > { %5861 = vmatprep.mubr.msk.f32.mxu0 %vm6453_vm4, %v8417_v40 }
0x10b2   : > { %5843 = vmatmul.mubr.msk.f32.vlgmr.msra.gmra.mrb[28].mxu1 %vm305_vm2, %v8428_v62  ;;  %v6140_v1 = vpack.c.bf16 %v4543_v56, %v4542_v3 }
0x10b3   : > { %5880 = vmatprep.mubr.msk.f32.mxu1 %vm6453_vm4, %v8417_v40 }
0x10b4   : > { %v4514_v29 = vpop.permute.xlu0 %4513  ;;  %v4624_v15 = vpop.permute.xlu1 %4623 }
0x10b5   : > { %v4541_v52 = vmul.f32 %v8411_v41, %v4514_v29  ;;  %v4651_v6 = vmul.f32 %v8411_v41, %v4624_v15 }
0x10b7   : > { %v6137_v61 = vpack.c.bf16 %v4541_v52, %v4540_v43  ;;  %v6149_v28 = vpack.c.bf16 %v4651_v6, %v4650_v33 }
0x10b8   : > { %v4530_v38 = vpop.permute.xlu0 %4529 }
0x10b9   : > { %6150 = vmatpush3.bf16.msra.mxu1 %v6149_v28  ;;  %v4526_v12 = vpop.permute.xlu1 %4525  ;;  %6138 = vmatpush3.bf16.msra.mxu0 %v6137_v61  ;;  %v4545_v32 = vmul.f32 %v8425_v17, %v4530_v38 }
0x10ba   : > { %6139 = vmatprep.subr.bf16.mxu0 %v8406_v13  ;;  %6151 = vmatprep.subr.bf16.mxu1 %v8406_v13  ;;  %v4544_v53 = vmul.f32 %v8424_v21, %v4526_v12 }
0x10bc   : > { %v6143_v57 = vpack.c.bf16 %v4545_v32, %v4544_v53  ;;  %v4534_v16 = vpop.permute.xlu0 %4533 }
0x10bd   : > { %6141 = vmatpush3.bf16.msra.mxu0 %v6140_v1  ;;  %v4546_v59 = vmul.f32 %v8426_v36, %v4534_v16 }
0x10be   : > { %v4628_v26 = vpop.permute.xlu1 %4627  ;;  %6142 = vmatprep.subr.bf16.mxu0 %v8406_v13 }
0x10bf   : > { %v4652_v9 = vmul.f32 %v8420_v35, %v4628_v26 }
0x10c1   : > { %6144 = vmatpush3.bf16.msra.mxu0 %v6143_v57  ;;  %v4636_v7 = vpop.permute.xlu0 %4635 }
0x10c2   : > { %v4632_v34 = vpop.permute.xlu1 %4631  ;;  %6145 = vmatprep.subr.bf16.mxu0 %v8406_v13  ;;  %v4654_v24 = vmul.f32 %v8424_v21, %v4636_v7  ;;  %v6419_v7 = vld [vmem:[%s6538_s28 + $0x10] sm:$0xff] }
0x10c3   : > { %v4653_v45 = vmul.f32 %v8421_v23, %v4632_v34 }
0x10c5   : > { %v6152_v30 = vpack.c.bf16 %v4653_v45, %v4652_v9  ;;  %v4648_v47 = vpop.permute.xlu0 %4647  ;;  %v6415_v45 = vld [vmem:[%s6538_s28 + $0x8] sm:$0xff] }
0x10c6   : > { %v4657_v63 = vmul.f32 %v8427_v8, %v4648_v47  ;;  %v6474_v47 = vmov 14  }
0x10c7   : > { %6153 = vmatpush3.bf16.msra.mxu1 %v6152_v30  ;;  %v4538_v39 = vpop.permute.xlu1 %4537  ;;  %v6416_v30 = vld [vmem:[%s6538_s28 + $0x18] sm:$0xff] }
0x10c8   : > { %v4547_v10 = vmul.f32 %v8427_v8, %v4538_v39  ;;  %6154 = vmatprep.subr.bf16.mxu1 %v8406_v13  ;;  %v6417_v39 = vld [vmem:[%s6538_s28] sm:$0xff] }
0x10ca   : > { %v6146_v48 = vpack.c.bf16 %v4547_v10, %v4546_v59  ;;  %v6418_v59 = vld [vmem:[%s6538_s28 + $0x28] sm:$0xff] }
0x10cc   : > { %v4640_v0 = vpop.permute.xlu1 %4639  ;;  %6147 = vmatpush3.bf16.msra.mxu0 %v6146_v48  ;;  %v6420_v48 = vld [vmem:[%s6538_s28 + $0x38] sm:$0xff] }
0x10cd   : > { %v4655_v50 = vmul.f32 %v8425_v17, %v4640_v0  ;;  %v6421_v0 = vld [vmem:[%s6538_s28 + $0x20] sm:$0xff] }
0x10cf   : > { %v6155_v37 = vpack.c.bf16 %v4655_v50, %v4654_v24  ;;  %5862 = vmatmul.mubr.msk.f32.vlgmr.msra.gmra.mrb[38].mxu0 %vm305_vm2, %v8428_v62  ;;  %v6422_v50 = vld [vmem:[%s6538_s28 + $0x30] sm:$0xff]  ;;  %s6477_s28 = smov 35  }
0x10d0   : > { %v4644_v4 = vpop.permute.xlu1 %4643 }
0x10d1   : > { %v4656_v54 = vmul.f32 %v8426_v36, %v4644_v4  ;;  %6156 = vmatpush3.bf16.msra.mxu1 %v6155_v37  ;;  %v6423_v37 = vld [vmem:[%s6619_s8] sm:$0xff] }
0x10d2   : > { %6157 = vmatprep.subr.bf16.mxu1 %v8406_v13 }
0x10d3   : > { %v6158_v11 = vpack.c.bf16 %v4657_v63, %v4656_v54  ;;  %v6424_v63 = vld [vmem:[%s6619_s8 + $0x8] sm:$0xff]  ;;  %s6478_s8 = smov 43  }
0x10d5   : > { %6159 = vmatpush3.bf16.msra.mxu1 %v6158_v11 }
0x10d8   : > { %5881 = vmatmul.mubr.msk.f32.vlgmr.msra.gmra.mrb[30].mxu1 %vm305_vm2, %v8428_v62 }
0x1173   : > { %v3068_v51 = vpop.f32.mrb[34].mxu0 }
0x1174   : > { %3072 = vst.msk [vmem:[%s6679_s16] sm:$0xff] %vm512_vm1, %v3068_v51  ;;  %v5806_v5 = vpop.f32.mrb[35].mxu0 }
0x1183   : > { %v8216_v58 = vpop.f32.mrb[36].mxu0 }
0x1184   : > { %6396 = vrcp.f32 %v8216_v58  ;;  %v5825_v42 = vpop.f32.mrb[37].mxu0 }
0x1185   : > { %v8233_v46 = vpop.f32.mrb[28].mxu1 }
0x1186   : > { %v5844_v22 = vpop.f32.mrb[29].mxu1 }
0x118e   : > { %v6397_v14 = vpop.eup %6396 }
0x118f   : > { %4823 = vrot.lane.b32.xlu1 %v6397_v14, %s6455_s15 }
0x11a2   : > { %v8237_v29 = vpop.f32.mrb[38].mxu0 }
0x11a3   : > { %v5863_v15 = vpop.f32.mrb[39].mxu0 }
0x11ab   : > { %v8235_v20 = vpop.f32.mrb[30].mxu1 }
0x11ac   : > { %v5882_v2 = vpop.f32.mrb[31].mxu1 }
0x1201   : > { %v4824_v60 = vpop.permute.xlu1 %4823 }
0x1202   : > { %v4826_v13 = vmul.f32 %v4824_v60, %v8216_v58 }
0x1204   : > { %vm4833_vm4 = vcmp.lt.f32.partialorder %v4826_v13, 1.0  ;;  %vm4836_vm8 = vcmp.gt.f32.partialorder %v4826_v13, 1.0  ;;  %vm4837_vm9 = vcmp.lt.f32.partialorder %v4826_v13, 2.0  ;;  %vm4841_vm3 = vcmp.gt.f32.partialorder %v4826_v13, 2.0 }
0x1205   : > { %v5224_v31 = vsel %vm4833_vm4, 1.0, %v8417_v40  ;;  %vm4838_vm2 = vmand %vm4836_vm8, %vm4837_vm9  ;;  %vm4842_vm1 = vcmp.lt.f32.partialorder %v4826_v13, 3.0  ;;  %vm4846_vm7 = vcmp.gt.f32.partialorder %v4826_v13, 3.0  ;;  %vm4847_vm6 = vcmp.lt.f32.partialorder %v4826_v13, 4.0 }
0x1206   : > { %4860 = vrot.lane.b32.xlu0 %v5224_v31, %s6465_s13  ;;  %v5225_v19 = vsel %vm4838_vm2, 1.0, %v8417_v40  ;;  %vm4843_vm0 = vmand %vm4841_vm3, %vm4842_vm1  ;;  %vm4851_vm15 = vcmp.gt.f32.partialorder %v4826_v13, 4.0  ;;  %vm4852_vm14 = vcmp.lt.f32.partialorder %v4826_v13, 5.0  ;;  %vm4856_vm8 = vcmp.gt.f32.partialorder %v4826_v13, 5.0 }
0x1207   : > { %4866 = vrot.lane.b32.xlu1 %v5225_v19, %s6465_s13  ;;  %vm4848_vm5 = vmand %vm4846_vm7, %vm4847_vm6  ;;  %v5226_v49 = vsel %vm4843_vm0, 1.0, %v8417_v40  ;;  %v5229_v44 = vsel %vm4856_vm8, 1.0, %v8417_v40  ;;  %vm4827_vm0 = vcmp.gt.f32.partialorder %v8216_v58, 0.0  ;;  %vm4830_vm6 = vcmp.eq.f32.partialorder %v8216_v58, 0.0 }
0x1208   : > { %v5227_v27 = vsel %vm4848_vm5, 1.0, %v8417_v40  ;;  %vm4853_vm4 = vmand %vm4851_vm15, %vm4852_vm14  ;;  %v5222_v43 = vsel %vm4827_vm0, 1.0, %v8417_v40  ;;  %v5223_v33 = vsel %vm4830_vm6, 1.0, %v8417_v40  ;;  %vm4807_vm7 = vcmask 113760  }
0x1209   : > { %v5228_v25 = vsel %vm4853_vm4, 1.0, %v8417_v40  ;;  %v4808_v4 = vsel %vm4807_vm7, %v6423_v37, 0.0  ;;  %v4809_v54 = vsel %vm4807_vm7, %v6424_v63, 0.0  ;;  %vm8429_vm14 = vcmask 39936  }
0x120a   : > { %4872 = vrot.lane.b32.xlu0 %v5226_v49, %s6465_s13  ;;  %v4810_v11 = vadd.f32 %v4809_v54, %v4808_v4  ;;  %vm8430_vm15 = vcmask 48128   ;;  %vm4947_vm5 = vcmask 72704   ;;  %vm8431_vm9 = vcmask 56320  }
0x120b   : > { %4878 = vrot.lane.b32.xlu1 %v5227_v27, %s6465_s13  ;;  %vm4953_vm3 = vcmask 97280   ;;  %vm8433_vm2 = vmmov %vm8430_vm15  ;;  %vm3078_vm7 = vcmask 482768  }
0x120c   : > { %v4811_v42 = vrot.slane %v4810_v11, 4  ;;  %vm8434_vm1 = vmmov %vm8433_vm2 }
0x120d   : > { %vm8435_vm4 = vmmov %vm8434_vm1 }
0x120e   : > { %4884 = vrot.lane.b32.xlu0 %v5228_v25, %s6465_s13  ;;  %vm8436_vm8 = vmmov %vm8434_vm1 }
0x120f   : > { %4890 = vrot.lane.b32.xlu1 %v5229_v44, %s6465_s13  ;;  %vm8437_vm0 = vmmov %vm8434_vm1 }
0x1210   : > { %vm8438_vm6 = vmmov %vm8437_vm0 }
0x1213   : > { %4732 = vperm.xlu1 %6364, %v6397_v14   ;;  %v4812_v14 = vadd.f32 %v4811_v42, %v4810_v11 }
0x1215   : > { %v4813_v60 = vrot.slane %v4812_v14, 2 }
0x1217   : > { %6365 = vset.pattern.permute.xlu1 %v6464_v55  ;;  %v4814_v13 = vadd.f32 %v4813_v60, %v4812_v14 }
0x1219   : > { %v4815_v31 = vrot.slane %v4814_v13, 1 }
0x121b   : > { %v4816_v19 = vadd.f32 %v4815_v31, %v4814_v13 }
0x1278   : > { %v4861_v52 = vpop.permute.xlu0 %4860 }
0x1279   : > { %v4863_v6 = vmul.f32 %v5222_v43, %v4861_v52  ;;  %v4864_v56 = vmul.f32 %v5223_v33, %v4861_v52  ;;  %v4867_v61 = vpop.permute.xlu1 %4866 }
0x127a   : > { %v8244_v28 = vmul.f32 %v5223_v33, %v4867_v61  ;;  %v4869_v55 = vmul.f32 %v5222_v43, %v4867_v61 }
0x127b   : > { %4900 = vrot.lane.b32.xlu1 %v4864_v56, %s6458_s10  ;;  %4896 = vrot.lane.b32.xlu0 %v4863_v6, %s6462_s25  ;;  %s6468_s10 = smov 4   ;;  %s6469_s25 = smov 6  }
0x127c   : > { %v4873_v38 = vpop.permute.xlu0 %4872 }
0x127d   : > { %v4875_v3 = vmul.f32 %v5222_v43, %v4873_v38  ;;  %v4879_v12 = vpop.permute.xlu1 %4878  ;;  %v4876_v1 = vmul.f32 %v5223_v33, %v4873_v38 }
0x127e   : > { %v4881_v40 = vmul.f32 %v5222_v43, %v4879_v12  ;;  %v4882_v53 = vmul.f32 %v5223_v33, %v4879_v12 }
0x127f   : > { %4904 = vrot.lane.b32.xlu0 %v4869_v55, %s6455_s15  ;;  %4908 = vrot.lane.b32.xlu1 %v4875_v3, %s6466_s24  ;;  %s6470_s15 = smov 8  }
0x1280   : > { %v4885_v32 = vpop.permute.xlu0 %4884 }
0x1281   : > { %v4888_v26 = vmul.f32 %v5223_v33, %v4885_v32  ;;  %v4891_v57 = vpop.permute.xlu1 %4890  ;;  %v4887_v16 = vmul.f32 %v5222_v43, %v4885_v32 }
0x1282   : > { %v4894_v34 = vmul.f32 %v5223_v33, %v4891_v57  ;;  %v4893_v9 = vmul.f32 %v5222_v43, %v4891_v57 }
0x1283   : > { %4912 = vrot.lane.b32.xlu0 %v4876_v1, %s6465_s13  ;;  %4916 = vrot.lane.b32.xlu1 %v4881_v40, %s6467_s26 }
0x1287   : > { %4920 = vrot.lane.b32.xlu0 %v4882_v53, %s6468_s10  ;;  %4928 = vrot.lane.b32.xlu1 %v4888_v26, %s6469_s25 }
0x128b   : > { %4936 = vrot.lane.b32.xlu1 %v4894_v34, %s6470_s15  ;;  %4924 = vrot.lane.b32.xlu0 %v4887_v16, %s6471_s27 }
0x128f   : > { %1145 = vperm.xlu1 %6365, %v6415_v45   ;;  %4932 = vrot.lane.b32.xlu0 %v4893_v9, %s6472_s29 }
0x1292   : > { %v4733_v10 = vpop.permute.xlu1 %4732 }
0x1293   : > { %1153 = vperm.xlu1 %6365, %v6416_v30   ;;  %1141 = vperm.xlu0 %6362, %v6417_v39   ;;  %v4735_v24 = vmul.f32 %v4733_v10, %v8216_v58  ;;  %v4749_v51 = vmul.f32 %v4733_v10, %v8233_v46  ;;  %v4742_v5 = vmul.f32 %v4733_v10, %v8237_v29 }
0x1297   : > { %1161 = vperm.xlu1 %6365, %v6418_v59   ;;  %1149 = vperm.xlu0 %6362, %v6419_v7  }
0x129b   : > { %1169 = vperm.xlu1 %6365, %v6420_v48   ;;  %1157 = vperm.xlu0 %6362, %v6421_v0  }
0x129f   : > { %4737 = vrot.lane.b32.xlu1 %v4735_v24, %s6473_s30  ;;  %1165 = vperm.xlu0 %6362, %v6422_v50  }
0x12a0   : > { %6366 = vset.pattern.permute.xlu1 %v6474_v47 }
0x12a3   : > { %4797 = vperm.xlu1 %6366, %v6423_v37   ;;  %3075 = vrot.lane.b32.xlu0 %v8428_v62, %s6475_s22  ;;  %v4766_v62 = vmul.f32 %v4733_v10, %v8235_v20 }
0x12a4   : > { %6367 = vset.pattern.permute.xlu0 %v6474_v47 }
0x12a7   : > { %4751 = vrot.lane.b32.xlu1 %v4749_v51, %s6476_s11  ;;  %4744 = vrot.lane.b32.xlu0 %v4742_v5, %s6477_s28 }
0x12ab   : > { %4756 = vrot.lane.b32.xlu1 %v4742_v5, %s6476_s11  ;;  %4801 = vperm.xlu0 %6367, %v6424_v63  }
0x12af   : > { %3080 = vrot.lane.b32.xlu1 %v6423_v37, %s6478_s8  ;;  %4761 = vrot.lane.b32.xlu0 %v4749_v51, %s6479_s14 }
0x12b3   : > { %4768 = vrot.lane.b32.xlu1 %v4766_v62, %s6480_s12  ;;  %3082 = vrot.lane.b32.xlu0 %v6424_v63, %s6478_s8 }
0x12b7   : > { %4786 = vrot.lane.b32.xlu1 %v6423_v37, %s6481_s17  ;;  %4773 = vrot.lane.b32.xlu0 %v4766_v62, %s6482_s18 }
0x12bb   : > { %4779 = vrot.lane.b32.xlu1 %v8216_v58, %s6482_s18  ;;  %4788 = vrot.lane.b32.xlu0 %v6424_v63, %s6481_s17 }
0x12bf   : > { %4818 = vrot.lane.b32.xlu0 %v4816_v19, %s6483_s19 }
0x12ed   : > { %v4901_v49 = vpop.permute.xlu1 %4900  ;;  %v4897_v27 = vpop.permute.xlu0 %4896 }
0x12ee   : > { %v4939_v25 = vsel %vm4264_vm10, 1.0, %v4897_v27  ;;  %vm8432_vm10 = vcmask 64512  }
0x12ef   : > { %v4940_v44 = vsel %vm4273_vm11, %v4939_v25, %v4901_v49  ;;  %vm4949_vm11 = vcmask 80896  }
0x12f1   : > { %v4909_v46 = vpop.permute.xlu1 %4908  ;;  %v4905_v22 = vpop.permute.xlu0 %4904 }
0x12f2   : > { %v4941_v20 = vsel %vm4282_vm12, %v4940_v44, %v4905_v22  ;;  %vm4951_vm12 = vcmask 89088  }
0x12f3   : > { %v4942_v2 = vsel %vm4291_vm13, %v4941_v20, %v8244_v28  ;;  %vm4955_vm13 = vcmask 105472  }
0x12f4   : > { %v4943_v58 = vsel %vm8429_vm14, %v4942_v2, %v4909_v46  ;;  %vm8439_vm14 = vmmov %vm8437_vm0 }
0x12f5   : > { %v4913_v29 = vpop.permute.xlu0 %4912  ;;  %v4917_v15 = vpop.permute.xlu1 %4916 }
0x12f6   : > { %v4944_v43 = vsel %vm8430_vm15, %v4943_v58, %v4913_v29  ;;  %vm4740_vm15 = vcmask 285952  }
0x12f7   : > { %v4945_v6 = vsel %vm8431_vm9, %v4944_v43, %v4917_v15  ;;  %vm4747_vm9 = vcmask 310552  }
0x12f9   : > { %v4921_v33 = vpop.permute.xlu0 %4920  ;;  %v4929_v52 = vpop.permute.xlu1 %4928 }
0x12fa   : > { %v4946_v56 = vsel %vm8432_vm10, %v4945_v6, %v4921_v33  ;;  %vm4754_vm10 = vcmask 335152  }
0x12fd   : > { %v4925_v61 = vpop.permute.xlu0 %4924  ;;  %v4937_v3 = vpop.permute.xlu1 %4936 }
0x12fe   : > { %v4948_v38 = vsel %vm4947_vm5, %v4946_v56, %v4925_v61  ;;  %vm8440_vm5 = vmmov %vm8437_vm0 }
0x12ff   : > { %v4950_v55 = vsel %vm4949_vm11, %v4948_v38, %v4929_v52  ;;  %vm4759_vm11 = vcmask 359752  }
0x1301   : > { %v4933_v28 = vpop.permute.xlu0 %4932 }
0x1302   : > { %v4952_v12 = vsel %vm4951_vm12, %v4950_v55, %v4933_v28  ;;  %vm4764_vm12 = vcmask 384352  }
0x1303   : > { %v4954_v1 = vsel %vm4953_vm3, %v4952_v12, %v4937_v3  ;;  %vm4771_vm3 = vcmask 408952  }
0x1304   : > { %v4956_v40 = vsel %vm4955_vm13, %v4954_v1, 0.0  ;;  %vm1202_vm13 = vcmask 40960  }
0x1305   : > { %v4957_v32 = vrot.slane %v4956_v40, 4 }
0x1307   : > { %v4958_v53 = vadd.f32 %v4957_v32, %v4956_v40 }
0x1309   : > { %v4959_v26 = vrot.slane %v4958_v53, 2 }
0x130b   : > { %v4960_v57 = vadd.f32 %v4959_v26, %v4958_v53 }
0x130d   : > { %v4961_v16 = vrot.slane %v4960_v57, 1 }
0x130e   : > { %v1146_v34 = vpop.permute.xlu1 %1145 }
0x130f   : > { %v4962_v9 = vadd.f32 %v4961_v16, %v4960_v57  ;;  %v1173_v39 = vmul.f32 %v8411_v41, %v1146_v34 }
0x1311   : > { %4964 = vrot.lane.b32.xlu1 %v4962_v9, %s6470_s15  ;;  %v1182_v0 = vsel %vm8434_vm1, %v1173_v39, 0.0  ;;  %vm4804_vm1 = vcmask 474384  }
0x1312   : > { %v1154_v45 = vpop.permute.xlu1 %1153  ;;  %v1142_v30 = vpop.permute.xlu0 %1141 }
0x1313   : > { %v1172_v59 = vmul.f32 %v8412_v18, %v1142_v30  ;;  %v1175_v24 = vmul.f32 %v8421_v23, %v1154_v45 }
0x1315   : > { %v1181_v7 = vsel %vm8433_vm2, %v1172_v59, 0.0  ;;  %v1186_v41 = vsel %vm8436_vm8, %v1175_v24, 0.0  ;;  %vm4776_vm2 = vcmask 433552   ;;  %vm8442_vm8 = vcmask 277768  }
0x1316   : > { %v1162_v10 = vpop.permute.xlu1 %1161  ;;  %v1150_v48 = vpop.permute.xlu0 %1149  ;;  %v1183_v47 = vadd.f32 %v1182_v0, %v1181_v7 }
0x1317   : > { %v1174_v50 = vmul.f32 %v8420_v35, %v1150_v48  ;;  %v1177_v18 = vmul.f32 %v8425_v17, %v1162_v10 }
0x1319   : > { %v1184_v37 = vsel %vm8435_vm4, %v1174_v50, 0.0  ;;  %v1190_v14 = vsel %vm8438_vm6, %v1177_v18, 0.0  ;;  %vm8441_vm4 = vcmask 269568   ;;  %vm4784_vm6 = vcmask 474544  }
0x131a   : > { %v1170_v4 = vpop.permute.xlu1 %1169  ;;  %v1185_v63 = vadd.f32 %v1184_v37, %v1183_v47  ;;  %v1158_v54 = vpop.permute.xlu0 %1157 }
0x131b   : > { %v1176_v11 = vmul.f32 %v8424_v21, %v1158_v54  ;;  %v1179_v60 = vmul.f32 %v8427_v8, %v1170_v4 }
0x131c   : > { %v1187_v51 = vadd.f32 %v1186_v41, %v1185_v63 }
0x131d   : > { %v1188_v5 = vsel %vm8437_vm0, %v1176_v11, 0.0  ;;  %v1194_v49 = vsel %vm8440_vm5, %v1179_v60, 0.0  ;;  %vm4782_vm0 = vcmask 441768   ;;  %vm4967_vm5 = vcmask 163904  }
0x131e   : > { %v4738_v42 = vpop.permute.xlu1 %4737  ;;  %v1189_v23 = vadd.f32 %v1188_v5, %v1187_v51  ;;  %v1166_v35 = vpop.permute.xlu0 %1165 }
0x131f   : > { %v1178_v62 = vmul.f32 %v8426_v36, %v1166_v35 }
0x1320   : > { %v1191_v13 = vadd.f32 %v1190_v14, %v1189_v23 }
0x1321   : > { %v1192_v17 = vsel %vm8439_vm14, %v1178_v62, 0.0  ;;  %vm8444_vm14 = vmmov %vm8442_vm8 }
0x1322   : > { %v4798_v21 = vpop.permute.xlu1 %4797  ;;  %v1193_v31 = vadd.f32 %v1192_v17, %v1191_v13  ;;  %v3076_v19 = vpop.permute.xlu0 %3075 }
0x1323   : > { %3079 = vst.msk [vmem:[%s6679_s16] sm:$0xff] %vm3078_vm7, %v3076_v19 }
0x1324   : > { %v1195_v27 = vadd.f32 %v1194_v49, %v1193_v31  ;;  %4741 = vst.msk [vmem:[%s6679_s16] sm:$0xff] %vm4740_vm15, %v4738_v42  ;;  %vm4821_vm15 = vcmask 57392  }
0x1326   : > { %v4752_v8 = vpop.permute.xlu1 %4751  ;;  %v1196_v36 = vrot.slane %v1195_v27, 4  ;;  %v4745_v25 = vpop.permute.xlu0 %4744 }
0x1327   : > { %4748 = vst.msk [vmem:[%s6679_s16] sm:$0xff] %vm4747_vm9, %v4745_v25 }
0x1328   : > { %v1197_v44 = vadd.f32 %v1196_v36, %v1195_v27  ;;  %4755 = vst.msk [vmem:[%s6679_s16] sm:$0xff] %vm4754_vm10, %v4752_v8 }
0x132a   : > { %v4757_v46 = vpop.permute.xlu1 %4756  ;;  %v1198_v22 = vrot.slane %v1197_v44, 2  ;;  %v4802_v20 = vpop.permute.xlu0 %4801 }
0x132b   : > { %4760 = vst.msk [vmem:[%s6679_s16] sm:$0xff] %vm4759_vm11, %v4757_v46 }
0x132c   : > { %v1199_v2 = vadd.f32 %v1198_v22, %v1197_v44 }
0x132e   : > { %v3081_v29 = vpop.permute.xlu1 %3080  ;;  %v1200_v15 = vrot.slane %v1199_v2, 1  ;;  %v4762_v58 = vpop.permute.xlu0 %4761 }
0x132f   : > { %3086 = vst.msk [vmem:[%s6679_s16 + $0x8] sm:$0xff] %vm3078_vm7, %v3081_v29 }
0x1330   : > { %4765 = vst.msk [vmem:[%s6679_s16] sm:$0xff] %vm4764_vm12, %v4762_v58  ;;  %v1201_v43 = vadd.f32 %v1200_v15, %v1199_v2 }
0x1332   : > { %v4769_v33 = vpop.permute.xlu1 %4768  ;;  %v3083_v52 = vpop.permute.xlu0 %3082  ;;  %1203 = vst.msk [vmem:[%s6679_s16 + $0x29] sm:$0x1] %vm1202_vm13, %v1201_v43 }
0x1333   : > { %4772 = vst.msk [vmem:[%s6679_s16] sm:$0xff] %vm4771_vm3, %v4769_v33 }
0x1334   : > { %3087 = vst.msk [vmem:[%s6679_s16 + $0x10] sm:$0xff] %vm3078_vm7, %v3083_v52  ;;  %vm8443_vm7 = vmmov %vm8441_vm4 }
0x1336   : > { %v4787_v6 = vpop.permute.xlu1 %4786  ;;  %v4774_v56 = vpop.permute.xlu0 %4773 }
0x1337   : > { %4792 = vst.msk [vmem:[%s6679_s16 + $0x8] sm:$0xff] %vm8441_vm4, %v4787_v6 }
0x1338   : > { %4794 = vst.msk [vmem:[%s6679_s16 + $0x8] sm:$0xff] %vm8442_vm8, %v4787_v6 }
0x1339   : > { %4777 = vst.msk [vmem:[%s6679_s16] sm:$0xff] %vm4776_vm2, %v4774_v56 }
0x133a   : > { %4805 = vst.msk [vmem:[%s6679_s16 + $0x8] sm:$0xff] %vm4804_vm1, %v4798_v21  ;;  %v4780_v61 = vpop.permute.xlu1 %4779  ;;  %v4789_v38 = vpop.permute.xlu0 %4788 }
0x133b   : > { %4783 = vst.msk [vmem:[%s6679_s16] sm:$0xff] %vm4782_vm0, %v4780_v61 }
0x133c   : > { %4785 = vst.msk [vmem:[%s6679_s16] sm:$0xff] %vm4784_vm6, %v4780_v61 }
0x133d   : > { %4793 = vst.msk [vmem:[%s6679_s16 + $0x10] sm:$0xff] %vm8443_vm7, %v4789_v38 }
0x133e   : > { %4795 = vst.msk [vmem:[%s6679_s16 + $0x10] sm:$0xff] %vm8444_vm14, %v4789_v38  ;;  %v4819_v55 = vpop.permute.xlu0 %4818 }
0x133f   : > { %4806 = vst.msk [vmem:[%s6679_s16 + $0x10] sm:$0xff] %vm4804_vm1, %v4802_v20 }
0x1340   : > { %4822 = vst.msk [vmem:[%s6679_s16 + $0x29] sm:$0x1] %vm4821_vm15, %v4819_v55 }
0x1383   : > { %v4965_v28 = vpop.permute.xlu1 %4964 }
0x1384   : > { %4968 = vst.msk [vmem:[%s6679_s16 + $0x29] sm:$0x1] %vm4967_vm5, %v4965_v28 }
0x1385 PF: > { %s17_s21 = sadd.s32 1, %s6447_s21  }
0x1386   : > { %p14_p4 = scmp.ge.s32.totalorder %s17_s21, 10  }
0x1388   :  { %16 = sbr.rel (!%p14_p4) target bundleno = 1 (0x1), region = 88 }

</bundles_post_ra>
